<compile_context>
chip_gen: v7x
topology: tpu7x:2x2x1
jax: 0.10.0
libtpu: 0.0.40
codegen_flags: <defaults>
</compile_context>

<pallas_src>
import functools

import jax
import jax.numpy as jnp
import numpy as np
from jax.experimental import pallas as pl
from jax.experimental.pallas import tpu as pltpu


def _round_up(a, b):
    return ((a + b - 1) // b) * b


# Cached probe result: does this JAX honor pipeline_mode=pl.Buffered(1)?
_SINGLE_BUFFER_OK = None


# ----------------------------------------------------------------------------
# Pallas kernel: one (tm, 3C) output slab of qkv = x @ Wqkv + b + LoRA
# ----------------------------------------------------------------------------
def _lora_qkv_kernel(x_ref, w_ref, bias_ref, a_ref, bq_ref, bv_ref, o_ref, *, C, r):
    cdt = w_ref.dtype
    x = x_ref[...].astype(cdt)                     # cast in-kernel; x read once
    # Base projection: (tm, C) @ (C, 3C) on the MXU, f32 accumulation.
    acc = jnp.dot(x, w_ref[...], preferred_element_type=jnp.float32)
    acc = acc + bias_ref[...]                      # f32 bias add on the VPU
    # LoRA contraction: (tm, C) @ (C, 2r) on the MXU — once per token tile.
    xa = jnp.dot(x, a_ref[...], preferred_element_type=jnp.float32)   # (tm, 2r)
    # Rank-r expansion on the VPU: r broadcast-FMAs per path.  The zero K
    # block and the block-diagonal zeros never touch the MXU.
    bq = bq_ref[...]                               # (r, C) f32
    bv = bv_ref[...]
    new_q = xa[:, 0:1] * bq[0:1, :]
    new_v = xa[:, r:r + 1] * bv[0:1, :]
    for k in range(1, r):                          # r is small & static: unrolls
        new_q = new_q + xa[:, k:k + 1] * bq[k:k + 1, :]
        new_v = new_v + xa[:, r + k:r + k + 1] * bv[k:k + 1, :]
    # Lane-dense stores per q/k/v column range (C is a multiple of 128 in SAM).
    o_ref[:, :C] = (acc[:, :C] + new_q).astype(o_ref.dtype)
    o_ref[:, C:2 * C] = acc[:, C:2 * C].astype(o_ref.dtype)
    o_ref[:, 2 * C:] = (acc[:, 2 * C:] + new_v).astype(o_ref.dtype)


# ----------------------------------------------------------------------------
# One-time parameter packing (cache the result; do NOT redo per forward call)
# ----------------------------------------------------------------------------
def pack_lora_qkv_params(wqkv_t, bias, aq_t, bq_t, av_t, bv_t,
                         compute_dtype=jnp.bfloat16):
    wqkv_c = wqkv_t.astype(compute_dtype)                                  # (C, 3C)
    bias2 = bias.reshape(1, -1).astype(jnp.float32)                        # (1, 3C)
    a_cat_c = jnp.concatenate([aq_t, av_t], axis=1).astype(compute_dtype)  # (C, 2r)
    bq_f32 = bq_t.astype(jnp.float32)                                      # (r, C)
    bv_f32 = bv_t.astype(jnp.float32)                                      # (r, C)
    return wqkv_c, bias2, a_cat_c, bq_f32, bv_f32


# ----------------------------------------------------------------------------
# Wrapper: tiling, padding, VMEM budgeting, single-buffered invariant weights
# ----------------------------------------------------------------------------
def lora_qkv_pallas(x, wqkv_c, bias2, a_cat_c, bq_f32, bv_f32, *,
                    tm_target=512, out_dtype=jnp.float32,
                    single_buffer_weights=True):
    """LoRA-QKV projection (PyTorch _LoRA_qkv semantics).

    x:        (B, H, W, C)   SAM ViT attention input (channels-last, any float dtype)
    wqkv_c:   (C, 3C)        qkv weight, pre-transposed + cast to compute dtype
    bias2:    (1, 3C) f32
    a_cat_c:  (C, 2r)        [Aq | Av], pre-transposed + cast to compute dtype
    bq_f32 / bv_f32: (r, C) f32
    Returns   (B, H, W, 3C) in out_dtype (f32 keeps PyTorch semantics; bf16
              halves output HBM writeback if downstream attention is bf16).
    """
    global _SINGLE_BUFFER_OK
    B, H, W, C = x.shape
    OUT = wqkv_c.shape[1]
    assert OUT == 3 * C, "wqkv must map C -> 3C"
    r = bq_f32.shape[0]
    N = B * H * W
    out_dtype = jnp.dtype(out_dtype)

    # Token tiling with minimal padding: n_pad ≈ round_up(N, 8).
    tm_target = max(8, int(tm_target))
    num_i = max(1, -(-N // tm_target))
    tm = _round_up(-(-N // num_i), 8)
    n_pad = num_i * tm

    xf = x.reshape(N, C)
    if n_pad != N:
        xf = jnp.pad(xf, ((0, n_pad - N), (0, 0)))

    kernel = functools.partial(_lora_qkv_kernel, C=C, r=r)

    def run(single_buf):
        inv_kw = dict(pipeline_mode=pl.Buffered(1)) if single_buf else {}
        csz = wqkv_c.dtype.itemsize
        wbuf = 1 if single_buf else 2
        est = (2 * tm * C * xf.dtype.itemsize                 # x tiles (dbl-buffered)
               + wbuf * (C * OUT * csz + OUT * 4              # W + bias
                         + C * 2 * r * csz + 2 * r * C * 4)   # A_cat + Bq + Bv
               + 2 * tm * OUT * out_dtype.itemsize            # output tiles
               + 3 * tm * OUT * 4)                            # acc + temporaries
        try:
            cap = int(getattr(pltpu.get_tpu_info(), "vmem_capacity_bytes",
                              128 * 2 ** 20))
        except Exception:
            cap = 128 * 2 ** 20
        vmem_limit = int(min(max(est, 32 * 2 ** 20), int(cap * 0.85)))

        in_specs = [
            pl.BlockSpec((tm, C), lambda i: (i, 0)),               # x (streams)
            pl.BlockSpec((C, OUT), lambda i: (0, 0), **inv_kw),    # Wqkv (invariant)
            pl.BlockSpec((1, OUT), lambda i: (0, 0), **inv_kw),    # bias (invariant)
            pl.BlockSpec((C, 2 * r), lambda i: (0, 0), **inv_kw),  # A_cat (invariant)
            pl.BlockSpec((r, C), lambda i: (0, 0), **inv_kw),      # Bq (invariant)
            pl.BlockSpec((r, C), lambda i: (0, 0), **inv_kw),      # Bv (invariant)
        ]
        return pl.pallas_call(
            kernel,
            out_shape=jax.ShapeDtypeStruct((n_pad, OUT), out_dtype),
            grid_spec=pltpu.PrefetchScalarGridSpec(
                num_scalar_prefetch=0,
                grid=(num_i,),                  # token axis only: x read once,
                in_specs=in_specs,              # weights stay VMEM-resident
                out_specs=pl.BlockSpec((tm, OUT), lambda i: (i, 0)),
            ),
            compiler_params=pltpu.CompilerParams(
                dimension_semantics=("parallel",),   # v7x: split tokens across TCs
                vmem_limit_bytes=vmem_limit),
        )(xf, wqkv_c, bias2, a_cat_c, bq_f32, bv_f32)

    use_single = single_buffer_weights and _SINGLE_BUFFER_OK is not False
    if use_single and _SINGLE_BUFFER_OK is None:
        # One-time probe: some JAX versions ignore/reject pipeline_mode here.
        try:
            out = jax.block_until_ready(run(True))
            _SINGLE_BUFFER_OK = True
        except Exception:
            _SINGLE_BUFFER_OK = False
            out = run(False)
    elif use_single:
        out = run(True)
    else:
        out = run(False)

    return out[:N].reshape(B, H, W, OUT)


# ----------------------------------------------------------------------------
# Pure-JAX reference (mirrors _LoRA_qkv.forward exactly, f32 end to end)
# ----------------------------------------------------------------------------
def lora_qkv_ref(x, wqkv_t, bias, aq_t, bq_t, av_t, bv_t):
    B, H, W, C = x.shape
    xf = x.reshape(-1, C)
    qkv = xf @ wqkv_t + bias
    qkv = qkv.at[:, :C].add((xf @ aq_t) @ bq_t)
    qkv = qkv.at[:, 2 * C:].add((xf @ av_t) @ bv_t)
    return qkv.reshape(B, H, W, 3 * C)


# ----------------------------------------------------------------------------
# Minimal SurgerySAM-style wrapper around the kernel
# ----------------------------------------------------------------------------
class SurgerySAMLoRAQKV:
    """Deterministically initialized LoRA-QKV block (one image-encoder block's
    attn.qkv after SurgerySAM.apply_lora_to_block).  Packed / cast operand
    forms are cached at init time (per compute dtype), not rebuilt per call."""

    def __init__(self, dim=128, r=4, key=jax.random.PRNGKey(0)):
        ks = jax.random.split(key, 6)
        s = 1.0 / np.sqrt(dim)
        # nn.Linear(dim, 3*dim) weight (3C, C) + bias; stored transposed (C, 3C)
        self.wqkv_t = jax.random.uniform(ks[0], (dim, 3 * dim),
                                         minval=-s, maxval=s, dtype=jnp.float32)
        self.bias = jax.random.uniform(ks[1], (3 * dim,),
                                       minval=-s, maxval=s, dtype=jnp.float32)
        # LoRA A: (r, C) -> stored (C, r); LoRA B: (C, r) -> stored (r, C)
        self.aq_t = jax.random.uniform(ks[2], (dim, r), minval=-s, maxval=s,
                                       dtype=jnp.float32)
        self.bq_t = jax.random.uniform(ks[3], (r, dim), minval=-s, maxval=s,
                                       dtype=jnp.float32)
        self.av_t = jax.random.uniform(ks[4], (dim, r), minval=-s, maxval=s,
                                       dtype=jnp.float32)
        self.bv_t = jax.random.uniform(ks[5], (r, dim), minval=-s, maxval=s,
                                       dtype=jnp.float32)
        self._packed = {}

    def _params(self, compute_dtype):
        key = jnp.dtype(compute_dtype).name
        if key not in self._packed:
            self._packed[key] = pack_lora_qkv_params(
                self.wqkv_t, self.bias, self.aq_t, self.bq_t,
                self.av_t, self.bv_t, compute_dtype)
        return self._packed[key]

    def __call__(self, x, *, compute_dtype=jnp.bfloat16, **kw):
        return lora_qkv_pallas(x, *self._params(compute_dtype), **kw)

    def reference(self, x):
        return lora_qkv_ref(x, self.wqkv_t, self.bias,
                            self.aq_t, self.bq_t, self.av_t, self.bv_t)


if __name__ == "__main__":
    key = jax.random.PRNGKey(0)
    k_in, k_par = jax.random.split(key)

    # SAM windowed-attention-shaped demo: 2 windows of 14x14 tokens, 128 ch.
    # N = 392 is not a multiple of 8*tiles for every tm -> exercises padding.
    B, H, W, C, r = 2, 14, 14, 128, 4
    x = jax.random.normal(k_in, (B, H, W, C), dtype=jnp.float32)

    module = SurgerySAMLoRAQKV(dim=C, r=r, key=k_par)
    ref = module.reference(x)

    # Exact path: f32 operands, small token tiles -> multi-step grid + padding.
    out_f32 = jax.block_until_ready(
        module(x, compute_dtype=jnp.float32, tm_target=128))
    np.testing.assert_allclose(np.asarray(out_f32), np.asarray(ref),
                               rtol=1e-4, atol=1e-4)

    # Default perf path: bf16 matmul operands, f32 accumulation + f32 store,
    # full-width (3C) output slab, single grid step.
    out = jax.block_until_ready(module(x))
    np.testing.assert_allclose(np.asarray(out), np.asarray(ref),
                               rtol=3e-2, atol=3e-2)

    # bf16 output store (halves writeback traffic when downstream is bf16).
    out_bf16 = jax.block_until_ready(module(x, out_dtype=jnp.bfloat16))
    assert out_bf16.dtype == jnp.bfloat16
    np.testing.assert_allclose(
        np.asarray(jnp.asarray(out_bf16, dtype=jnp.float32)), np.asarray(ref),
        rtol=5e-2, atol=5e-2)

    assert out.shape == (B, H, W, 3 * C)
    print("KERNEL_OK")
</pallas_src>

<mosaic_0001>
module attributes {stable_mosaic.version = 11 : i64} {
  func.func @_lora_qkv_kernel(%arg0: i32, %arg1: memref<104x128xf32, #tpu.memory_space<vmem>>, %arg2: memref<128x384xf32, #tpu.memory_space<vmem>>, %arg3: memref<1x384xf32, #tpu.memory_space<vmem>>, %arg4: memref<128x8xf32, #tpu.memory_space<vmem>>, %arg5: memref<4x128xf32, #tpu.memory_space<vmem>>, %arg6: memref<4x128xf32, #tpu.memory_space<vmem>>, %arg7: memref<104x384xf32, #tpu.memory_space<vmem>>) attributes {dimension_semantics = [#tpu.dimension_semantics<parallel>], iteration_bounds = array<i64: 4>, scalar_prefetch = 0 : i64, scratch_operands = 0 : i64, tpu.core_type = #tpu.core_type<tc>, window_params = [{transform_indices = @transform_0, window_bounds = array<i64: 104, 128>}, {pipeline_mode = #tpu.pipeline_mode<synchronous>, transform_indices = @transform_1, window_bounds = array<i64: 128, 384>}, {pipeline_mode = #tpu.pipeline_mode<synchronous>, transform_indices = @transform_2, window_bounds = array<i64: 1, 384>}, {pipeline_mode = #tpu.pipeline_mode<synchronous>, transform_indices = @transform_3, window_bounds = array<i64: 128, 8>}, {pipeline_mode = #tpu.pipeline_mode<synchronous>, transform_indices = @transform_4, window_bounds = array<i64: 4, 128>}, {pipeline_mode = #tpu.pipeline_mode<synchronous>, transform_indices = @transform_5, window_bounds = array<i64: 4, 128>}, {transform_indices = @transform_6, window_bounds = array<i64: 104, 384>}]} {
    %c0 = arith.constant 0 : index
    %c0_0 = arith.constant 0 : index
    %0 = vector.load %arg1[%c0, %c0_0] : memref<104x128xf32, #tpu.memory_space<vmem>>, vector<104x128xf32>
    %c0_1 = arith.constant 0 : index
    %c0_2 = arith.constant 0 : index
    %1 = vector.load %arg2[%c0_1, %c0_2] : memref<128x384xf32, #tpu.memory_space<vmem>>, vector<128x384xf32>
    %cst = arith.constant dense<0.000000e+00> : vector<104x384xf32>
    %2 = tpu.matmul %0, %1, %cst {dimension_numbers = #tpu.dot_dimension_numbers<[1], [0], [0], [1], [0, 0, 1, 1], [], []>} : vector<104x128xf32>, vector<128x384xf32>, vector<104x384xf32> -> vector<104x384xf32>
    %c0_3 = arith.constant 0 : index
    %c0_4 = arith.constant 0 : index
    %3 = vector.load %arg3[%c0_3, %c0_4] : memref<1x384xf32, #tpu.memory_space<vmem>>, vector<1x384xf32>
    %4 = vector.broadcast %3 : vector<1x384xf32> to vector<104x384xf32>
    %5 = arith.addf %2, %4 : vector<104x384xf32>
    %c0_5 = arith.constant 0 : index
    %c0_6 = arith.constant 0 : index
    %6 = vector.load %arg4[%c0_5, %c0_6] : memref<128x8xf32, #tpu.memory_space<vmem>>, vector<128x8xf32>
    %cst_7 = arith.constant dense<0.000000e+00> : vector<104x8xf32>
    %7 = tpu.matmul %0, %6, %cst_7 {dimension_numbers = #tpu.dot_dimension_numbers<[1], [0], [0], [1], [0, 0, 1, 1], [], []>} : vector<104x128xf32>, vector<128x8xf32>, vector<104x8xf32> -> vector<104x8xf32>
    %c0_8 = arith.constant 0 : index
    %c0_9 = arith.constant 0 : index
    %8 = vector.load %arg5[%c0_8, %c0_9] : memref<4x128xf32, #tpu.memory_space<vmem>>, vector<4x128xf32>
    %c0_10 = arith.constant 0 : index
    %c0_11 = arith.constant 0 : index
    %9 = vector.load %arg6[%c0_10, %c0_11] : memref<4x128xf32, #tpu.memory_space<vmem>>, vector<4x128xf32>
    %10 = vector.extract_strided_slice %7 {offsets = [0, 0], sizes = [104, 1], strides = [1, 1]} : vector<104x8xf32> to vector<104x1xf32>
    %11 = vector.extract_strided_slice %8 {offsets = [0, 0], sizes = [1, 128], strides = [1, 1]} : vector<4x128xf32> to vector<1x128xf32>
    %12 = vector.broadcast %10 : vector<104x1xf32> to vector<104x128xf32>
    %13 = vector.broadcast %11 : vector<1x128xf32> to vector<104x128xf32>
    %14 = arith.mulf %12, %13 : vector<104x128xf32>
    %15 = vector.extract_strided_slice %7 {offsets = [0, 4], sizes = [104, 1], strides = [1, 1]} : vector<104x8xf32> to vector<104x1xf32>
    %16 = vector.extract_strided_slice %9 {offsets = [0, 0], sizes = [1, 128], strides = [1, 1]} : vector<4x128xf32> to vector<1x128xf32>
    %17 = vector.broadcast %15 : vector<104x1xf32> to vector<104x128xf32>
    %18 = vector.broadcast %16 : vector<1x128xf32> to vector<104x128xf32>
    %19 = arith.mulf %17, %18 : vector<104x128xf32>
    %20 = vector.extract_strided_slice %7 {offsets = [0, 1], sizes = [104, 1], strides = [1, 1]} : vector<104x8xf32> to vector<104x1xf32>
    %21 = vector.extract_strided_slice %8 {offsets = [1, 0], sizes = [1, 128], strides = [1, 1]} : vector<4x128xf32> to vector<1x128xf32>
    %22 = vector.broadcast %20 : vector<104x1xf32> to vector<104x128xf32>
    %23 = vector.broadcast %21 : vector<1x128xf32> to vector<104x128xf32>
    %24 = arith.mulf %22, %23 : vector<104x128xf32>
    %25 = arith.addf %14, %24 : vector<104x128xf32>
    %26 = vector.extract_strided_slice %7 {offsets = [0, 5], sizes = [104, 1], strides = [1, 1]} : vector<104x8xf32> to vector<104x1xf32>
    %27 = vector.extract_strided_slice %9 {offsets = [1, 0], sizes = [1, 128], strides = [1, 1]} : vector<4x128xf32> to vector<1x128xf32>
    %28 = vector.broadcast %26 : vector<104x1xf32> to vector<104x128xf32>
    %29 = vector.broadcast %27 : vector<1x128xf32> to vector<104x128xf32>
    %30 = arith.mulf %28, %29 : vector<104x128xf32>
    %31 = arith.addf %19, %30 : vector<104x128xf32>
    %32 = vector.extract_strided_slice %7 {offsets = [0, 2], sizes = [104, 1], strides = [1, 1]} : vector<104x8xf32> to vector<104x1xf32>
    %33 = vector.extract_strided_slice %8 {offsets = [2, 0], sizes = [1, 128], strides = [1, 1]} : vector<4x128xf32> to vector<1x128xf32>
    %34 = vector.broadcast %32 : vector<104x1xf32> to vector<104x128xf32>
    %35 = vector.broadcast %33 : vector<1x128xf32> to vector<104x128xf32>
    %36 = arith.mulf %34, %35 : vector<104x128xf32>
    %37 = arith.addf %25, %36 : vector<104x128xf32>
    %38 = vector.extract_strided_slice %7 {offsets = [0, 6], sizes = [104, 1], strides = [1, 1]} : vector<104x8xf32> to vector<104x1xf32>
    %39 = vector.extract_strided_slice %9 {offsets = [2, 0], sizes = [1, 128], strides = [1, 1]} : vector<4x128xf32> to vector<1x128xf32>
    %40 = vector.broadcast %38 : vector<104x1xf32> to vector<104x128xf32>
    %41 = vector.broadcast %39 : vector<1x128xf32> to vector<104x128xf32>
    %42 = arith.mulf %40, %41 : vector<104x128xf32>
    %43 = arith.addf %31, %42 : vector<104x128xf32>
    %44 = vector.extract_strided_slice %7 {offsets = [0, 3], sizes = [104, 1], strides = [1, 1]} : vector<104x8xf32> to vector<104x1xf32>
    %45 = vector.extract_strided_slice %8 {offsets = [3, 0], sizes = [1, 128], strides = [1, 1]} : vector<4x128xf32> to vector<1x128xf32>
    %46 = vector.broadcast %44 : vector<104x1xf32> to vector<104x128xf32>
    %47 = vector.broadcast %45 : vector<1x128xf32> to vector<104x128xf32>
    %48 = arith.mulf %46, %47 : vector<104x128xf32>
    %49 = arith.addf %37, %48 : vector<104x128xf32>
    %50 = vector.extract_strided_slice %7 {offsets = [0, 7], sizes = [104, 1], strides = [1, 1]} : vector<104x8xf32> to vector<104x1xf32>
    %51 = vector.extract_strided_slice %9 {offsets = [3, 0], sizes = [1, 128], strides = [1, 1]} : vector<4x128xf32> to vector<1x128xf32>
    %52 = vector.broadcast %50 : vector<104x1xf32> to vector<104x128xf32>
    %53 = vector.broadcast %51 : vector<1x128xf32> to vector<104x128xf32>
    %54 = arith.mulf %52, %53 : vector<104x128xf32>
    %55 = arith.addf %43, %54 : vector<104x128xf32>
    %56 = vector.extract_strided_slice %5 {offsets = [0, 0], sizes = [104, 128], strides = [1, 1]} : vector<104x384xf32> to vector<104x128xf32>
    %57 = arith.addf %56, %49 : vector<104x128xf32>
    %c0_12 = arith.constant 0 : index
    %c0_13 = arith.constant 0 : index
    %58 = vector.load %arg7[%c0_12, %c0_13] : memref<104x384xf32, #tpu.memory_space<vmem>>, vector<104x128xf32>
    tpu.vector_store %arg7[%c0_12, %c0_13], %57 {strides = array<i32>} : memref<104x384xf32, #tpu.memory_space<vmem>>, vector<104x128xf32>,
    %59 = vector.extract_strided_slice %5 {offsets = [0, 128], sizes = [104, 128], strides = [1, 1]} : vector<104x384xf32> to vector<104x128xf32>
    %c0_14 = arith.constant 0 : index
    %c128 = arith.constant 128 : index
    %60 = vector.load %arg7[%c0_14, %c128] : memref<104x384xf32, #tpu.memory_space<vmem>>, vector<104x128xf32>
    tpu.vector_store %arg7[%c0_14, %c128], %59 {strides = array<i32>} : memref<104x384xf32, #tpu.memory_space<vmem>>, vector<104x128xf32>,
    %61 = vector.extract_strided_slice %5 {offsets = [0, 256], sizes = [104, 128], strides = [1, 1]} : vector<104x384xf32> to vector<104x128xf32>
    %62 = arith.addf %61, %55 : vector<104x128xf32>
    %c0_15 = arith.constant 0 : index
    %c256 = arith.constant 256 : index
    %63 = vector.load %arg7[%c0_15, %c256] : memref<104x384xf32, #tpu.memory_space<vmem>>, vector<104x128xf32>
    tpu.vector_store %arg7[%c0_15, %c256], %62 {strides = array<i32>} : memref<104x384xf32, #tpu.memory_space<vmem>>, vector<104x128xf32>,
    return
  }
  func.func @transform_0(%arg0: i32) -> (i32, i32) {
    %c0_i32 = arith.constant 0 : i32
    %c0_i32_0 = arith.constant 0 : i32
    return %arg0, %c0_i32 : i32, i32
  }
  func.func @transform_1(%arg0: i32) -> (i32, i32) {
    %c0_i32 = arith.constant 0 : i32
    %c0_i32_0 = arith.constant 0 : i32
    %c0_i32_1 = arith.constant 0 : i32
    return %c0_i32, %c0_i32_0 : i32, i32
  }
  func.func @transform_2(%arg0: i32) -> (i32, i32) {
    %c0_i32 = arith.constant 0 : i32
    %c0_i32_0 = arith.constant 0 : i32
    %c0_i32_1 = arith.constant 0 : i32
    return %c0_i32, %c0_i32_0 : i32, i32
  }
  func.func @transform_3(%arg0: i32) -> (i32, i32) {
    %c0_i32 = arith.constant 0 : i32
    %c0_i32_0 = arith.constant 0 : i32
    %c0_i32_1 = arith.constant 0 : i32
    return %c0_i32, %c0_i32_0 : i32, i32
  }
  func.func @transform_4(%arg0: i32) -> (i32, i32) {
    %c0_i32 = arith.constant 0 : i32
    %c0_i32_0 = arith.constant 0 : i32
    %c0_i32_1 = arith.constant 0 : i32
    return %c0_i32, %c0_i32_0 : i32, i32
  }
  func.func @transform_5(%arg0: i32) -> (i32, i32) {
    %c0_i32 = arith.constant 0 : i32
    %c0_i32_0 = arith.constant 0 : i32
    %c0_i32_1 = arith.constant 0 : i32
    return %c0_i32, %c0_i32_0 : i32, i32
  }
  func.func @transform_6(%arg0: i32) -> (i32, i32) {
    %c0_i32 = arith.constant 0 : i32
    %c0_i32_0 = arith.constant 0 : i32
    return %arg0, %c0_i32 : i32, i32
  }
}

module attributes {stable_mosaic.version = 11 : i64} {
  func.func @_lora_qkv_kernel(%arg0: i32, %arg1: memref<104x128xf32, #tpu.memory_space<vmem>>, %arg2: memref<128x384xf32, #tpu.memory_space<vmem>>, %arg3: memref<1x384xf32, #tpu.memory_space<vmem>>, %arg4: memref<128x8xf32, #tpu.memory_space<vmem>>, %arg5: memref<4x128xf32, #tpu.memory_space<vmem>>, %arg6: memref<4x128xf32, #tpu.memory_space<vmem>>, %arg7: memref<104x384xf32, #tpu.memory_space<vmem>>) attributes {dimension_semantics = [#tpu.dimension_semantics<parallel>], iteration_bounds = array<i64: 4>, scalar_prefetch = 0 : i64, scratch_operands = 0 : i64, tpu.core_type = #tpu.core_type<tc>, window_params = [{transform_indices = @transform_0, window_bounds = array<i64: 104, 128>}, {pipeline_mode = #tpu.pipeline_mode<synchronous>, transform_indices = @transform_1, window_bounds = array<i64: 128, 384>}, {pipeline_mode = #tpu.pipeline_mode<synchronous>, transform_indices = @transform_2, window_bounds = array<i64: 1, 384>}, {pipeline_mode = #tpu.pipeline_mode<synchronous>, transform_indices = @transform_3, window_bounds = array<i64: 128, 8>}, {pipeline_mode = #tpu.pipeline_mode<synchronous>, transform_indices = @transform_4, window_bounds = array<i64: 4, 128>}, {pipeline_mode = #tpu.pipeline_mode<synchronous>, transform_indices = @transform_5, window_bounds = array<i64: 4, 128>}, {transform_indices = @transform_6, window_bounds = array<i64: 104, 384>}]} {
    %c0 = arith.constant 0 : index
    %c0_0 = arith.constant 0 : index
    %0 = vector.load %arg1[%c0, %c0_0] : memref<104x128xf32, #tpu.memory_space<vmem>>, vector<104x128xf32>
    %c0_1 = arith.constant 0 : index
    %c0_2 = arith.constant 0 : index
    %1 = vector.load %arg2[%c0_1, %c0_2] : memref<128x384xf32, #tpu.memory_space<vmem>>, vector<128x384xf32>
    %cst = arith.constant dense<0.000000e+00> : vector<104x384xf32>
    %2 = tpu.matmul %0, %1, %cst {dimension_numbers = #tpu.dot_dimension_numbers<[1], [0], [0], [1], [0, 0, 1, 1], [], []>} : vector<104x128xf32>, vector<128x384xf32>, vector<104x384xf32> -> vector<104x384xf32>
    %c0_3 = arith.constant 0 : index
    %c0_4 = arith.constant 0 : index
    %3 = vector.load %arg3[%c0_3, %c0_4] : memref<1x384xf32, #tpu.memory_space<vmem>>, vector<1x384xf32>
    %4 = vector.broadcast %3 : vector<1x384xf32> to vector<104x384xf32>
    %5 = arith.addf %2, %4 : vector<104x384xf32>
    %c0_5 = arith.constant 0 : index
    %c0_6 = arith.constant 0 : index
    %6 = vector.load %arg4[%c0_5, %c0_6] : memref<128x8xf32, #tpu.memory_space<vmem>>, vector<128x8xf32>
    %cst_7 = arith.constant dense<0.000000e+00> : vector<104x8xf32>
    %7 = tpu.matmul %0, %6, %cst_7 {dimension_numbers = #tpu.dot_dimension_numbers<[1], [0], [0], [1], [0, 0, 1, 1], [], []>} : vector<104x128xf32>, vector<128x8xf32>, vector<104x8xf32> -> vector<104x8xf32>
    %c0_8 = arith.constant 0 : index
    %c0_9 = arith.constant 0 : index
    %8 = vector.load %arg5[%c0_8, %c0_9] : memref<4x128xf32, #tpu.memory_space<vmem>>, vector<4x128xf32>
    %c0_10 = arith.constant 0 : index
    %c0_11 = arith.constant 0 : index
    %9 = vector.load %arg6[%c0_10, %c0_11] : memref<4x128xf32, #tpu.memory_space<vmem>>, vector<4x128xf32>
    %10 = vector.extract_strided_slice %7 {offsets = [0, 0], sizes = [104, 1], strides = [1, 1]} : vector<104x8xf32> to vector<104x1xf32>
    %11 = vector.extract_strided_slice %8 {offsets = [0, 0], sizes = [1, 128], strides = [1, 1]} : vector<4x128xf32> to vector<1x128xf32>
    %12 = vector.broadcast %10 : vector<104x1xf32> to vector<104x128xf32>
    %13 = vector.broadcast %11 : vector<1x128xf32> to vector<104x128xf32>
    %14 = arith.mulf %12, %13 : vector<104x128xf32>
    %15 = vector.extract_strided_slice %7 {offsets = [0, 4], sizes = [104, 1], strides = [1, 1]} : vector<104x8xf32> to vector<104x1xf32>
    %16 = vector.extract_strided_slice %9 {offsets = [0, 0], sizes = [1, 128], strides = [1, 1]} : vector<4x128xf32> to vector<1x128xf32>
    %17 = vector.broadcast %15 : vector<104x1xf32> to vector<104x128xf32>
    %18 = vector.broadcast %16 : vector<1x128xf32> to vector<104x128xf32>
    %19 = arith.mulf %17, %18 : vector<104x128xf32>
    %20 = vector.extract_strided_slice %7 {offsets = [0, 1], sizes = [104, 1], strides = [1, 1]} : vector<104x8xf32> to vector<104x1xf32>
    %21 = vector.extract_strided_slice %8 {offsets = [1, 0], sizes = [1, 128], strides = [1, 1]} : vector<4x128xf32> to vector<1x128xf32>
    %22 = vector.broadcast %20 : vector<104x1xf32> to vector<104x128xf32>
    %23 = vector.broadcast %21 : vector<1x128xf32> to vector<104x128xf32>
    %24 = arith.mulf %22, %23 : vector<104x128xf32>
    %25 = arith.addf %14, %24 : vector<104x128xf32>
    %26 = vector.extract_strided_slice %7 {offsets = [0, 5], sizes = [104, 1], strides = [1, 1]} : vector<104x8xf32> to vector<104x1xf32>
    %27 = vector.extract_strided_slice %9 {offsets = [1, 0], sizes = [1, 128], strides = [1, 1]} : vector<4x128xf32> to vector<1x128xf32>
    %28 = vector.broadcast %26 : vector<104x1xf32> to vector<104x128xf32>
    %29 = vector.broadcast %27 : vector<1x128xf32> to vector<104x128xf32>
    %30 = arith.mulf %28, %29 : vector<104x128xf32>
    %31 = arith.addf %19, %30 : vector<104x128xf32>
    %32 = vector.extract_strided_slice %7 {offsets = [0, 2], sizes = [104, 1], strides = [1, 1]} : vector<104x8xf32> to vector<104x1xf32>
    %33 = vector.extract_strided_slice %8 {offsets = [2, 0], sizes = [1, 128], strides = [1, 1]} : vector<4x128xf32> to vector<1x128xf32>
    %34 = vector.broadcast %32 : vector<104x1xf32> to vector<104x128xf32>
    %35 = vector.broadcast %33 : vector<1x128xf32> to vector<104x128xf32>
    %36 = arith.mulf %34, %35 : vector<104x128xf32>
    %37 = arith.addf %25, %36 : vector<104x128xf32>
    %38 = vector.extract_strided_slice %7 {offsets = [0, 6], sizes = [104, 1], strides = [1, 1]} : vector<104x8xf32> to vector<104x1xf32>
    %39 = vector.extract_strided_slice %9 {offsets = [2, 0], sizes = [1, 128], strides = [1, 1]} : vector<4x128xf32> to vector<1x128xf32>
    %40 = vector.broadcast %38 : vector<104x1xf32> to vector<104x128xf32>
    %41 = vector.broadcast %39 : vector<1x128xf32> to vector<104x128xf32>
    %42 = arith.mulf %40, %41 : vector<104x128xf32>
    %43 = arith.addf %31, %42 : vector<104x128xf32>
    %44 = vector.extract_strided_slice %7 {offsets = [0, 3], sizes = [104, 1], strides = [1, 1]} : vector<104x8xf32> to vector<104x1xf32>
    %45 = vector.extract_strided_slice %8 {offsets = [3, 0], sizes = [1, 128], strides = [1, 1]} : vector<4x128xf32> to vector<1x128xf32>
    %46 = vector.broadcast %44 : vector<104x1xf32> to vector<104x128xf32>
    %47 = vector.broadcast %45 : vector<1x128xf32> to vector<104x128xf32>
    %48 = arith.mulf %46, %47 : vector<104x128xf32>
    %49 = arith.addf %37, %48 : vector<104x128xf32>
    %50 = vector.extract_strided_slice %7 {offsets = [0, 7], sizes = [104, 1], strides = [1, 1]} : vector<104x8xf32> to vector<104x1xf32>
    %51 = vector.extract_strided_slice %9 {offsets = [3, 0], sizes = [1, 128], strides = [1, 1]} : vector<4x128xf32> to vector<1x128xf32>
    %52 = vector.broadcast %50 : vector<104x1xf32> to vector<104x128xf32>
    %53 = vector.broadcast %51 : vector<1x128xf32> to vector<104x128xf32>
    %54 = arith.mulf %52, %53 : vector<104x128xf32>
    %55 = arith.addf %43, %54 : vector<104x128xf32>
    %56 = vector.extract_strided_slice %5 {offsets = [0, 0], sizes = [104, 128], strides = [1, 1]} : vector<104x384xf32> to vector<104x128xf32>
    %57 = arith.addf %56, %49 : vector<104x128xf32>
    %c0_12 = arith.constant 0 : index
    %c0_13 = arith.constant 0 : index
    %58 = vector.load %arg7[%c0_12, %c0_13] : memref<104x384xf32, #tpu.memory_space<vmem>>, vector<104x128xf32>
    tpu.vector_store %arg7[%c0_12, %c0_13], %57 {strides = array<i32>} : memref<104x384xf32, #tpu.memory_space<vmem>>, vector<104x128xf32>,
    %59 = vector.extract_strided_slice %5 {offsets = [0, 128], sizes = [104, 128], strides = [1, 1]} : vector<104x384xf32> to vector<104x128xf32>
    %c0_14 = arith.constant 0 : index
    %c128 = arith.constant 128 : index
    %60 = vector.load %arg7[%c0_14, %c128] : memref<104x384xf32, #tpu.memory_space<vmem>>, vector<104x128xf32>
    tpu.vector_store %arg7[%c0_14, %c128], %59 {strides = array<i32>} : memref<104x384xf32, #tpu.memory_space<vmem>>, vector<104x128xf32>,
    %61 = vector.extract_strided_slice %5 {offsets = [0, 256], sizes = [104, 128], strides = [1, 1]} : vector<104x384xf32> to vector<104x128xf32>
    %62 = arith.addf %61, %55 : vector<104x128xf32>
    %c0_15 = arith.constant 0 : index
    %c256 = arith.constant 256 : index
    %63 = vector.load %arg7[%c0_15, %c256] : memref<104x384xf32, #tpu.memory_space<vmem>>, vector<104x128xf32>
    tpu.vector_store %arg7[%c0_15, %c256], %62 {strides = array<i32>} : memref<104x384xf32, #tpu.memory_space<vmem>>, vector<104x128xf32>,
    return
  }
  func.func @transform_0(%arg0: i32) -> (i32, i32) {
    %c0_i32 = arith.constant 0 : i32
    %c0_i32_0 = arith.constant 0 : i32
    return %arg0, %c0_i32 : i32, i32
  }
  func.func @transform_1(%arg0: i32) -> (i32, i32) {
    %c0_i32 = arith.constant 0 : i32
    %c0_i32_0 = arith.constant 0 : i32
    %c0_i32_1 = arith.constant 0 : i32
    return %c0_i32, %c0_i32_0 : i32, i32
  }
  func.func @transform_2(%arg0: i32) -> (i32, i32) {
    %c0_i32 = arith.constant 0 : i32
    %c0_i32_0 = arith.constant 0 : i32
    %c0_i32_1 = arith.constant 0 : i32
    return %c0_i32, %c0_i32_0 : i32, i32
  }
  func.func @transform_3(%arg0: i32) -> (i32, i32) {
    %c0_i32 = arith.constant 0 : i32
    %c0_i32_0 = arith.constant 0 : i32
    %c0_i32_1 = arith.constant 0 : i32
    return %c0_i32, %c0_i32_0 : i32, i32
  }
  func.func @transform_4(%arg0: i32) -> (i32, i32) {
    %c0_i32 = arith.constant 0 : i32
    %c0_i32_0 = arith.constant 0 : i32
    %c0_i32_1 = arith.constant 0 : i32
    return %c0_i32, %c0_i32_0 : i32, i32
  }
  func.func @transform_5(%arg0: i32) -> (i32, i32) {
    %c0_i32 = arith.constant 0 : i32
    %c0_i32_0 = arith.constant 0 : i32
    %c0_i32_1 = arith.constant 0 : i32
    return %c0_i32, %c0_i32_0 : i32, i32
  }
  func.func @transform_6(%arg0: i32) -> (i32, i32) {
    %c0_i32 = arith.constant 0 : i32
    %c0_i32_0 = arith.constant 0 : i32
    return %arg0, %c0_i32 : i32, i32
  }
}

</mosaic_0001>

<bundles_post_ra>
// kernel: tpu_custom_call.1
= control target key start
LH: loop header
LB: loop body
LE: loop exit
PB: predicated region body
PF: predicated region fallthrough
CT: control target
= control target key end

     0   :  { %11 = vsyncpa [#allocation3], 0  ;;  %s3185_s0 = inlined_call_operand.hbm [shape: f32[416,128], index: 0, kind: input, shape index: {}]   ;;  %s3186_s1 = inlined_call_operand.hbm [shape: f32[128,384], index: 1, kind: input, shape index: {}]   ;;  %s3187_s2 = inlined_call_operand.vmem [shape: f32[1,384], index: 2, kind: input, shape index: {}]   ;;  %s3188_s3 = inlined_call_operand.vmem [shape: f32[128,8], index: 3, kind: input, shape index: {}]   ;;  %s3189_s4 = inlined_call_operand.vmem [shape: f32[4,128], index: 4, kind: input, shape index: {}]   ;;  %s3190_s5 = inlined_call_operand.vmem [shape: f32[4,128], index: 5, kind: input, shape index: {}]   ;;  %s3191_s6 = inlined_call_operand.hbm [shape: f32[416,384], index: 6, kind: output, shape index: {}]  }
   0x1   :  { %13 = vsyncpa [#allocation3 + $0x1], 0 }
   0x2   :  { %14 = vsyncpa [#allocation6], 0 }
   0x3   :  { %15 = vsyncpa [#allocation4], 0 }
   0x4   :  { %17 = vsyncpa [#allocation4 + $0x1], 0  ;;  %s2264_s21 = smov 0   ;;  %s2266_s22 = smov 0  }
   0x5   :  { %s2268_s23 = smov 0   ;;  %s2270_s24 = smov 0  }
   0x6 LB: > { %s2285_s25 = sadd.s32 4294967295, %s2207_s24   ;;  %s1592_s26 = sadd.s32 4294967294, %s2207_s24   ;;  %s2207_s24 = sphi %s2270_s24, %s3240_s24   ;;  %s2203_s23 = sphi %s2268_s23, %s3239_s23   ;;  %s2199_s22 = sphi %s2266_s22, %s3238_s22   ;;  %s2195_s21 = sphi %s2264_s21, %s3237_s21  }
   0x7   : > { %p43_p0 = scmp.ne.s32.totalorder %s2199_s22, %s2195_s21  ;;  %p3192_p1 = scmp.eq.s32.totalorder %s2285_s25, 0 }
   0x8   : > { %p178_p3 = scmp.eq.s32.totalorder %s1592_s26, 3  ;;  %p1593_p5 = scmp.ge.s32.totalorder %s2207_s24, 1 }
   0x9   : > { %p2294_p4 = por %p3192_p1, %p43_p0  ;;  %p185_p7 = scmp.lt.s32.totalorder %s2207_s24, 5 }
   0xa   : > { %p2299_p6 = por %p178_p3, %p43_p0  ;;  %s2209_s30 = smov [#allocation5]  }
   0xb   : > { %s3211_s27 = scalar_select %p2294_p4, 1, 0 }
   0xc   : > { %s3212_s28 = scalar_select %p2299_p6, 1, 0 }
   0xd   : > { %p2304_p8 = pnand %p1593_p5, %p185_p7  ;;  %s197_s7 = sshll.u32 %s2209_s30, 4  ;;  %s198_s7 = int_to_ptr.vmem [resolvable:$true] %s197_s7 }
   0xe   : > { %s2317_s9 = sadd.s32 1, %s2207_s24   ;;  %s30_s10 = sadd.s32 1, %s2203_s23 }
   0xf   : > { %s3213_s29 = scalar_select %p2304_p8, 1, 0 }
  0x10   : > { %p1911_p9 = pneg %p2304_p8  ;;  %s27_s11 = ssub.s32 %s2207_s24, %s2317_s9 }
  0x11   : > { %s2079_s14 = scalar_lea.hbm %s3186_s1, 6144 }
  0x12   : > { %p2312_p10 = pnand %p1911_p9, %p3192_p1  ;;  %p2080_p11 = scmp.ne.s32.totalorder %s3186_s1, %s2079_s14 }
  0x13   : > { %p2086_p3 = scmp.lt.u32.totalorder %s2079_s14, %s3186_s1 }
  0x14   : > { %p2081_p12 = pneg %p2312_p10 }
  0x16   : > { %p2082_p13 = pnand %p2081_p12, %p2080_p11 }
  0x18   : > { %p2083_p0 = pneg %p2082_p13 }
  0x1a   : > { %p2088_p5 = pnand %p2086_p3, %p2083_p0 }
  0x1c   : > { %2091 = shalt.err (!%p2088_p5)
}
  0x1d   : > { %s2092_s19 = scalar_lea.vmem %s198_s7, 6144  ;;  %p2100_p2 = scmp.lt.s32.totalorder %s198_s7, %s198_s7 }
  0x1e   : > { %p2093_p7 = scmp.ne.s32.totalorder %s198_s7, %s2092_s19  ;;  %p2101_p6 = scmp.lt.s32.totalorder %s2092_s19, %s2092_s19 }
  0x20   : > { %p2095_p9 = pnand %p2093_p7, %p2081_p12  ;;  %p2102_p4 = por %p2101_p6, %p2100_p2 }
  0x22   : > { %p2096_p1 = pneg %p2095_p9 }
  0x24   : > { %p2103_p8 = pnand %p2102_p4, %p2096_p1 }
  0x26   : > { %2106 = shalt.err (!%p2103_p8)
}
  0x27   : > { %s2210_s20 = smov 384   ;;  %s2211_s26 = smov 24  }
  0x28   : > { %1914 = dma.hbm_to_vmem [thread:$0]  (!%p2312_p10), %s3186_s1, 6144, %s198_s7, [#allocation6], %s2210_s20, %s2210_s20, %s2211_s26  }
  0x29   : > { %p28_p11 = scmp.eq.s32.totalorder %s27_s11, 0  ;;  %p37_p2 = scmp.ne.s32.totalorder %s2203_s23, %s2199_s22 }
  0x2a   : > { %p38_p1 = scmp.eq.s32.totalorder %s2207_s24, 0  ;;  %p1924_p4 = scmp.lt.s32.totalorder %s2207_s24, 4 }
  0x2b   : > { %s2343_s13 = scalar_select %p28_p11, %s2203_s23, %s30_s10  }
  0x2c   : > { %p39_p6 = por %p38_p1, %p37_p2  ;;  %p3215_p8 = scmp.eq.s32.totalorder %s2285_s25, 3 }
  0x2d   : > { %s223_s15 = sand.u32 1, %s2203_s23   ;;  %s1602_s16 = smul.u32 1664, %s2207_s24 }
  0x2e   : > { %p2347_p12 = por %p3215_p8, %p37_p2  ;;  %s1899_s17 = smul.u32 104, %s223_s15 }
  0x2f   : > { %s2356_s19 = scalar_lea.hbm %s3185_s0, %s1602_s16  ;;  %p2358_p10 = pnand %p1924_p4, %p39_p6 }
  0x30   : > { %s227_s10 = scalar_lea.vmem [#allocation2], %s1899_s17  ;;  %s2364_s20 = scalar_lea.sflag [#allocation3], %s223_s15 }
  0x31   : > { %s234_s11 = sshll.u32 %s227_s10, 4  ;;  %s2107_s26 = scalar_lea.hbm %s2356_s19, 1664  ;;  %s2362_s11 = int_to_ptr.vmem [resolvable:$true] %s234_s11 }
  0x32   : > { %p2108_p13 = scmp.ne.s32.totalorder %s2356_s19, %s2107_s26  ;;  %p2109_p0 = pneg %p2358_p10 }
  0x33   : > { %s2112_s16 = scalar_lea.hbm %s3185_s0, 6656  ;;  %p2113_p7 = scmp.lt.u32.totalorder %s2356_s19, %s3185_s0 }
  0x34   : > { %p2110_p3 = pnand %p2109_p0, %p2108_p13  ;;  %p2114_p9 = scmp.lt.u32.totalorder %s2112_s16, %s2107_s26 }
  0x35   : > { %p2116_p2 = scmp.lt.u32.totalorder %s2107_s26, %s2356_s19 }
  0x36   : > { %p2111_p5 = pneg %p2110_p3  ;;  %p2115_p11 = por %p2114_p9, %p2113_p7 }
  0x38   : > { %p2117_p1 = por %p2116_p2, %p2115_p11 }
  0x3a   : > { %p2118_p4 = pnand %p2117_p1, %p2111_p5 }
  0x3c   : > { %2121 = shalt.err (!%p2118_p4)
}
  0x3d   : > { %s2122_s15 = scalar_lea.vmem %s2362_s11, 1664  ;;  %s2212_s17 = smov [#allocation2]  }
  0x3e   : > { %p2123_p6 = scmp.ne.s32.totalorder %s2362_s11, %s2122_s15  ;;  %s2127_s10 = sshll.u32 %s2212_s17, 4  ;;  %s2128_s10 = int_to_ptr.vmem [resolvable:$false] %s2127_s10 }
  0x3f   : > { %s2129_s30 = scalar_lea.vmem %s2128_s10, 3328  ;;  %p2130_p3 = scmp.lt.s32.totalorder %s2362_s11, %s2128_s10 }
  0x40   : > { %p2125_p8 = pnand %p2123_p6, %p2109_p0  ;;  %p2131_p7 = scmp.lt.s32.totalorder %s2129_s30, %s2122_s15 }
  0x42   : > { %p2126_p13 = pneg %p2125_p8  ;;  %p2132_p9 = por %p2131_p7, %p2130_p3 }
  0x44   : > { %p2133_p11 = pnand %p2132_p9, %p2126_p13 }
  0x46   : > { %2136 = shalt.err (!%p2133_p11)
}
  0x47   : > { %s2213_s26 = smov 128   ;;  %s2214_s12 = smov 8  }
  0x48   : > { %1918 = dma.hbm_to_vmem [thread:$0]  (!%p2358_p10), %s2356_s19, 1664, %s2362_s11, %s2364_s20, %s2213_s26, %s2213_s26, %s2214_s12  }
  0x49   : > { %p3218_p0 = scmp.ne.s32.totalorder %s3213_s29, 0 }
  0x4b   : > { %246 = sbr.rel (%p3218_p0) target bundleno = 807 (0x327), region = 44 }
  0x52   : > { %s2395_s16 = sand.u32 1, %s2199_s22   ;;  %p3219_p5 = scmp.ne.s32.totalorder %s3211_s27, 0 }
  0x53   : > { %s1900_s8 = smul.u32 104, %s2395_s16  ;;  %s249_s18 = scalar_lea.sflag [#allocation3], %s2395_s16 }
  0x55   : > { %s2399_s15 = scalar_lea.vmem [#allocation2], %s1900_s8 }
  0x56   : > { %2182 = dma.done.wait (%p3219_p5), %s249_s18, 1664  }
  0x57   : > { %2184 = vsyncadd (%p3219_p5), %s249_s18, 4294965632  ;;  %p3220_p10 = scmp.eq.s32.totalorder %s2285_s25, 0 }
  0x59   : > { %2186 = dma.done.wait (%p3220_p10), [#allocation6], 6144   ;;  %p3221_p2 = pmov %p3220_p10 }
  0x5a   : > { %v2215_v0 = vmov 0.0|0.0   ;;  %vm2216_vm0 = vmmov 0   ;;  %v2217_v1 = vmov 0.0   ;;  %v301_v2 = vld [vmem:[#allocation5 + $0x8] sm:$0xff]  ;;  %v304_v3 = vld [vmem:[#allocation5 + $0x20] sm:$0xff]  ;;  %v302_v4 = vld [vmem:[#allocation5 + $0x10] sm:$0xff] }
  0x5b   : > { %2188 = vsyncadd (%p3221_p2), [#allocation6], 4294961152  ;;  %1835 = vmatprep.subr.bf16.mxu1 %v2215_v0  ;;  %1693 = vmatprep.mubr.msk.f32.mxu1 %vm2216_vm0, %v2217_v1  ;;  %v1803_v5 = vpack.c.bf16 %v304_v3, %v301_v2  ;;  %v305_v6 = vld [vmem:[#allocation5 + $0x28] sm:$0xff]  ;;  %v300_v7 = vld [vmem:[#allocation5] sm:$0xff]  ;;  %s1901_s10 = smul.u32 312, %s2395_s16 }
  0x5c   : > { %429 = vmatprep.mubr.f32.mxu0 %v2217_v1  ;;  %v303_v8 = vld [vmem:[#allocation5 + $0x18] sm:$0xff]  ;;  %v1836_v9 = vpack.c.bf16 %v305_v6, %v302_v4  ;;  %v310_v12 = vld [vmem:[#allocation5 + $0x50] sm:$0xff]  ;;  %v308_v13 = vld [vmem:[#allocation5 + $0x40] sm:$0xff]  ;;  %s1926_s27 = smul.u32 4992, %s2285_s25  ;;  %s1495_s25 = scalar_lea.sflag [#allocation4], %s2395_s16 }
  0x5d   : > { %v1805_v10 = vpack.c.bf16 %v303_v8, %v300_v7  ;;  %v307_v11 = vld [vmem:[#allocation5 + $0x38] sm:$0xff]  ;;  %1804 = vmatprep.subr.bf16.mxu0 %v1803_v5  ;;  %v306_v16 = vld [vmem:[#allocation5 + $0x30] sm:$0xff]  ;;  %v309_v17 = vld [vmem:[#allocation5 + $0x48] sm:$0xff]  ;;  %s2621_s30 = scalar_lea.vmem [#allocation7], %s1901_s10 }
  0x5e   : > { %v1807_v14 = vpack.c.bf16 %v310_v12, %v307_v11  ;;  %v311_v15 = vld [vmem:[#allocation5 + $0x58] sm:$0xff]  ;;  %1837 = vmatpush3.bf16.msra.mxu1 %v1836_v9  ;;  %v1809_v19 = vpack.c.bf16 %v309_v17, %v306_v16  ;;  %v313_v20 = vld [vmem:[#allocation5 + $0x68] sm:$0xff]  ;;  %v316_v21 = vld [vmem:[#allocation5 + $0x80] sm:$0xff]  ;;  %s1509_s29 = sshll.u32 %s2621_s30, 4  ;;  %s3138_s11 = scalar_lea.hbm %s3191_s6, %s1926_s27  ;;  %s3140_s29 = int_to_ptr.vmem [resolvable:$true] %s1509_s29 }
  0x5f   : > { %1806 = vmatpush1.bf16.msra.mxu0 %v1805_v10  ;;  %v1839_v18 = vpack.c.bf16 %v311_v15, %v308_v13  ;;  %v314_v22 = vld [vmem:[#allocation5 + $0x70] sm:$0xff]  ;;  %1838 = vmatprep.subr.bf16.mxu1 %v2215_v0  ;;  %v1811_v23 = vpack.c.bf16 %v316_v21, %v313_v20  ;;  %v317_v24 = vld [vmem:[#allocation5 + $0x88] sm:$0xff]  ;;  %v312_v25 = vld [vmem:[#allocation5 + $0x60] sm:$0xff]  ;;  %s2137_s20 = scalar_lea.vmem %s3140_s29, 4992 }
  0x60   : > { %1808 = vmatprep.subr.bf16.mxu0 %v1807_v14  ;;  %v315_v26 = vld [vmem:[#allocation5 + $0x78] sm:$0xff]  ;;  %v322_v28 = vld [vmem:[#allocation5 + $0xb0] sm:$0xff]  ;;  %v1842_v29 = vpack.c.bf16 %v317_v24, %v314_v22  ;;  %v320_v31 = vld [vmem:[#allocation5 + $0xa0] sm:$0xff]  ;;  %p2138_p1 = scmp.ne.s32.totalorder %s3140_s29, %s2137_s20 }
  0x61   : > { %v319_v27 = vld [vmem:[#allocation5 + $0x98] sm:$0xff]  ;;  %v1813_v30 = vpack.c.bf16 %v315_v26, %v312_v25  ;;  %v318_v34 = vld [vmem:[#allocation5 + $0x90] sm:$0xff]  ;;  %v321_v35 = vld [vmem:[#allocation5 + $0xa8] sm:$0xff] }
  0x62   : > { %1840 = vmatpush3.bf16.msra.mxu1 %v1839_v18  ;;  %v1815_v32 = vpack.c.bf16 %v322_v28, %v319_v27  ;;  %v323_v33 = vld [vmem:[#allocation5 + $0xb8] sm:$0xff]  ;;  %v325_v36 = vld [vmem:[#allocation5 + $0xc8] sm:$0xff]  ;;  %v328_v37 = vld [vmem:[#allocation5 + $0xe0] sm:$0xff]  ;;  %v1817_v39 = vpack.c.bf16 %v321_v35, %v318_v34  ;;  %p2139_p4 = pnand %p2138_p1, %p2347_p12 }
  0x63   : > { %1810 = vmatpush1.bf16.msra.mxu0 %v1809_v19  ;;  %1841 = vmatprep.subr.bf16.mxu1 %v2215_v0  ;;  %v1845_v38 = vpack.c.bf16 %v323_v33, %v320_v31  ;;  %v326_v40 = vld [vmem:[#allocation5 + $0xd0] sm:$0xff]  ;;  %v1819_v41 = vpack.c.bf16 %v328_v37, %v325_v36  ;;  %v329_v42 = vld [vmem:[#allocation5 + $0xe8] sm:$0xff]  ;;  %v324_v43 = vld [vmem:[#allocation5 + $0xc0] sm:$0xff] }
  0x64   : > { %1812 = vmatprep.subr.bf16.mxu0 %v1811_v23  ;;  %v327_v44 = vld [vmem:[#allocation5 + $0xd8] sm:$0xff]  ;;  %v334_v46 = vld [vmem:[#allocation5 + $0x110] sm:$0xff]  ;;  %v1848_v47 = vpack.c.bf16 %v329_v42, %v326_v40  ;;  %v332_v49 = vld [vmem:[#allocation5 + $0x100] sm:$0xff]  ;;  %p2140_p6 = pneg %p2139_p4 }
  0x65   : > { %v331_v45 = vld [vmem:[#allocation5 + $0xf8] sm:$0xff]  ;;  %v1821_v48 = vpack.c.bf16 %v327_v44, %v324_v43  ;;  %v330_v52 = vld [vmem:[#allocation5 + $0xf0] sm:$0xff]  ;;  %v333_v53 = vld [vmem:[#allocation5 + $0x108] sm:$0xff] }
  0x66   : > { %1843 = vmatpush3.bf16.msra.mxu1 %v1842_v29  ;;  %v1823_v50 = vpack.c.bf16 %v334_v46, %v331_v45  ;;  %v335_v51 = vld [vmem:[#allocation5 + $0x118] sm:$0xff]  ;;  %v337_v54 = vld [vmem:[#allocation5 + $0x128] sm:$0xff]  ;;  %v340_v55 = vld [vmem:[#allocation5 + $0x140] sm:$0xff]  ;;  %v1825_v57 = vpack.c.bf16 %v333_v53, %v330_v52 }
  0x67   : > { %1814 = vmatpush1.bf16.msra.mxu0 %v1813_v30  ;;  %1844 = vmatprep.subr.bf16.mxu1 %v2215_v0  ;;  %v1851_v56 = vpack.c.bf16 %v335_v51, %v332_v49  ;;  %v338_v58 = vld [vmem:[#allocation5 + $0x130] sm:$0xff]  ;;  %v1827_v59 = vpack.c.bf16 %v340_v55, %v337_v54  ;;  %v341_v60 = vld [vmem:[#allocation5 + $0x148] sm:$0xff]  ;;  %v336_v61 = vld [vmem:[#allocation5 + $0x120] sm:$0xff]  ;;  %v350_v49 = vlaneseq }
  0x68   : > { %1816 = vmatprep.subr.bf16.mxu0 %v1815_v32  ;;  %v339_v62 = vld [vmem:[#allocation5 + $0x138] sm:$0xff]  ;;  %v346_v2 = vld [vmem:[#allocation5 + $0x170] sm:$0xff]  ;;  %v1854_v3 = vpack.c.bf16 %v341_v60, %v338_v58  ;;  %v344_v5 = vld [vmem:[#allocation5 + $0x160] sm:$0xff] }
  0x69   : > { %v343_v63 = vld [vmem:[#allocation5 + $0x158] sm:$0xff]  ;;  %v1829_v4 = vpack.c.bf16 %v339_v62, %v336_v61  ;;  %v342_v8 = vld [vmem:[#allocation5 + $0x150] sm:$0xff]  ;;  %v345_v9 = vld [vmem:[#allocation5 + $0x168] sm:$0xff] }
  0x6a   : > { %1846 = vmatpush3.bf16.msra.mxu1 %v1845_v38  ;;  %v1831_v6 = vpack.c.bf16 %v346_v2, %v343_v63  ;;  %v347_v7 = vld [vmem:[#allocation5 + $0x178] sm:$0xff]  ;;  %v1833_v11 = vpack.c.bf16 %v345_v9, %v342_v8  ;;  %v638_v12 = vld [vmem:[%s3188_s3] sm:$0xff]  ;;  %v640_v16 = vld [vmem:[%s3188_s3 + $0x10] sm:$0xff] }
  0x6b   : > { %1818 = vmatpush1.bf16.msra.mxu0 %v1817_v39  ;;  %1847 = vmatprep.subr.bf16.mxu1 %v2215_v0  ;;  %v1857_v10 = vpack.c.bf16 %v347_v7, %v344_v5  ;;  %v639_v13 = vld [vmem:[%s3188_s3 + $0x8] sm:$0xff]  ;;  %v641_v17 = vld [vmem:[%s3188_s3 + $0x18] sm:$0xff]  ;;  %v642_v20 = vld [vmem:[%s3188_s3 + $0x20] sm:$0xff] }
  0x6c   : > { %1820 = vmatprep.subr.bf16.mxu0 %v1819_v41  ;;  %v2427_v14 = vld [vmem:[%s2399_s15] sm:$0xff]  ;;  %v1860_v15 = vpack.c.bf16 %v639_v13, %v638_v12  ;;  %v2442_v18 = vld [vmem:[%s2399_s15 + $0x8] sm:$0xff]  ;;  %v1863_v19 = vpack.c.bf16 %v641_v17, %v640_v16  ;;  %v2458_v22 = vld [vmem:[%s2399_s15 + $0x10] sm:$0xff] }
  0x6d   : > { %v643_v21 = vld [vmem:[%s3188_s3 + $0x28] sm:$0xff]  ;;  %v644_v24 = vld [vmem:[%s3188_s3 + $0x30] sm:$0xff]  ;;  %v645_v25 = vld [vmem:[%s3188_s3 + $0x38] sm:$0xff] }
  0x6e   : > { %1849 = vmatpush3.bf16.msra.mxu1 %v1848_v47  ;;  %v1866_v23 = vpack.c.bf16 %v643_v21, %v642_v20  ;;  %v2474_v26 = vld [vmem:[%s2399_s15 + $0x18] sm:$0xff]  ;;  %v1869_v27 = vpack.c.bf16 %v645_v25, %v644_v24  ;;  %v647_v29 = vld [vmem:[%s3188_s3 + $0x48] sm:$0xff]  ;;  %v648_v32 = vld [vmem:[%s3188_s3 + $0x50] sm:$0xff] }
  0x6f   : > { %1822 = vmatpush1.bf16.msra.mxu0 %v1821_v48  ;;  %1850 = vmatprep.subr.bf16.mxu1 %v2215_v0  ;;  %v646_v28 = vld [vmem:[%s3188_s3 + $0x40] sm:$0xff]  ;;  %v649_v33 = vld [vmem:[%s3188_s3 + $0x58] sm:$0xff]  ;;  %v2506_v34 = vld [vmem:[%s2399_s15 + $0x28] sm:$0xff]  ;;  %v3209_v48 = vmov 0  }
  0x70   : > { %1824 = vmatprep.subr.bf16.mxu0 %v1823_v50  ;;  %v2490_v30 = vld [vmem:[%s2399_s15 + $0x20] sm:$0xff]  ;;  %v1872_v31 = vpack.c.bf16 %v647_v29, %v646_v28  ;;  %v1875_v35 = vpack.c.bf16 %v649_v33, %v648_v32  ;;  %v2522_v38 = vld [vmem:[%s2399_s15 + $0x30] sm:$0xff]  ;;  %v294_v42 = vld [vmem:[%s2399_s15 + $0x38] sm:$0xff]  ;;  %1978 = vset.pattern.permute.xlu1 %v3209_v48  ;;  %v2596_v50 = vshrl.u32 %v350_v49, 7 }
  0x71   : > { %v650_v36 = vld [vmem:[%s3188_s3 + $0x60] sm:$0xff]  ;;  %v651_v37 = vld [vmem:[%s3188_s3 + $0x68] sm:$0xff]  ;;  %v652_v40 = vld [vmem:[%s3188_s3 + $0x70] sm:$0xff]  ;;  %1986 = vset.pattern.permute.xlu0 %v3209_v48 }
  0x72   : > { %1852 = vmatpush3.bf16.msra.mxu1 %v1851_v56  ;;  %v1878_v39 = vpack.c.bf16 %v651_v37, %v650_v36  ;;  %v653_v41 = vld [vmem:[%s3188_s3 + $0x78] sm:$0xff]  ;;  %v295_v44 = vld [vmem:[%s2399_s15 + $0x40] sm:$0xff]  ;;  %v296_v45 = vld [vmem:[%s2399_s15 + $0x48] sm:$0xff]  ;;  %v2599_v51 = vsub.s32 1, %v2596_v50  ;;  %v2614_v58 = vsub.s32 2, %v2596_v50 }
  0x73   : > { %1826 = vmatpush1.bf16.msra.mxu0 %v1825_v57  ;;  %1853 = vmatprep.subr.bf16.mxu1 %v2215_v0  ;;  %v1881_v43 = vpack.c.bf16 %v653_v41, %v652_v40  ;;  %v297_v46 = vld [vmem:[%s2399_s15 + $0x50] sm:$0xff]  ;;  %v299_v47 = vld [vmem:[%s2399_s15 + $0x60] sm:$0xff] }
  0x74   : > { %1828 = vmatprep.subr.bf16.mxu0 %v1827_v59  ;;  %v348_v52 = vld [vmem:[%s3187_s2] sm:$0x7]  ;;  %v2617_v59 = vsub.s32 0, %v2596_v50 }
  0x76   : > { %1855 = vmatpush3.bf16.msra.mxu1 %v1854_v3  ;;  %v2628_v3 = vrot.slane %v348_v52, %v2614_v58 }
  0x77   : > { %1830 = vmatpush1.bf16.msra.mxu0 %v1829_v4  ;;  %1856 = vmatprep.subr.bf16.mxu1 %v2215_v0  ;;  %v2631_v4 = vrot.slane %v348_v52, %v2617_v59 }
  0x78   : > { %1832 = vmatprep.subr.bf16.mxu0 %v1831_v6 }
  0x7a   : > { %1858 = vmatpush3.bf16.msra.mxu1 %v1857_v10 }
  0x7b   : > { %1834 = vmatpush1.bf16.msra.mxu0 %v1833_v11  ;;  %1883 = vmatprep.subr.bf16.mxu1 %v2215_v0 }
  0x7c   : > { %1859 = vmatprep.subr.bf16.mxu0 %v2215_v0 }
  0x7d   : > { %1694 = vmatmul.mubr.f32.vlgmr.msra.gmra.mrb[0].mxu1 %v2427_v14 }
  0x7e   : > { %430 = vmatmul.mubr.f32.vlgmr.msra.gmra.mrb[0].mxu0 %v2427_v14  ;;  %1891 = vmatpush3.bf16.msra.mxu1 %v1860_v15 }
  0x7f   : > { %1696 = vmatprep.mubr.msk.f32.mxu1 %vm2216_vm0, %v2217_v1  ;;  %435 = vmatprep.mubr.f32.mxu0 %v2217_v1 }
  0x80   : > { %1884 = vmatprep.subr.bf16.mxu1 %v2215_v0  ;;  %1861 = vmatpush3.bf16.msra.mxu0 %v1860_v15 }
  0x81   : > { %1697 = vmatmul.mubr.f32.gmra.mrb[2].mxu1 %v2442_v18  ;;  %1862 = vmatprep.subr.bf16.mxu0 %v2215_v0 }
  0x82   : > { %436 = vmatmul.mubr.f32.gmra.mrb[2].mxu0 %v2442_v18  ;;  %1699 = vmatprep.mubr.msk.f32.mxu1 %vm2216_vm0, %v2217_v1 }
  0x83   : > { %441 = vmatprep.mubr.f32.mxu0 %v2217_v1  ;;  %1892 = vmatpush3.bf16.msra.mxu1 %v1863_v19 }
  0x84   : > { %1885 = vmatprep.subr.bf16.mxu1 %v2215_v0  ;;  %1864 = vmatpush3.bf16.msra.mxu0 %v1863_v19 }
  0x85   : > { %1700 = vmatmul.mubr.f32.gmra.mrb[4].mxu1 %v2458_v22  ;;  %1865 = vmatprep.subr.bf16.mxu0 %v2215_v0 }
  0x86   : > { %442 = vmatmul.mubr.f32.gmra.mrb[4].mxu0 %v2458_v22  ;;  %1702 = vmatprep.mubr.msk.f32.mxu1 %vm2216_vm0, %v2217_v1 }
  0x87   : > { %447 = vmatprep.mubr.f32.mxu0 %v2217_v1  ;;  %1893 = vmatpush3.bf16.msra.mxu1 %v1866_v23 }
  0x88   : > { %1886 = vmatprep.subr.bf16.mxu1 %v2215_v0  ;;  %1867 = vmatpush3.bf16.msra.mxu0 %v1866_v23 }
  0x89   : > { %1703 = vmatmul.mubr.f32.gmra.mrb[6].mxu1 %v2474_v26  ;;  %1868 = vmatprep.subr.bf16.mxu0 %v2215_v0 }
  0x8a   : > { %448 = vmatmul.mubr.f32.gmra.mrb[6].mxu0 %v2474_v26  ;;  %1705 = vmatprep.mubr.msk.f32.mxu1 %vm2216_vm0, %v2217_v1 }
  0x8b   : > { %453 = vmatprep.mubr.f32.mxu0 %v2217_v1  ;;  %1894 = vmatpush3.bf16.msra.mxu1 %v1869_v27 }
  0x8c   : > { %1887 = vmatprep.subr.bf16.mxu1 %v2215_v0  ;;  %1870 = vmatpush3.bf16.msra.mxu0 %v1869_v27 }
  0x8d   : > { %1706 = vmatmul.mubr.f32.gmra.mrb[8].mxu1 %v2490_v30  ;;  %1871 = vmatprep.subr.bf16.mxu0 %v2215_v0 }
  0x8e   : > { %454 = vmatmul.mubr.f32.gmra.mrb[8].mxu0 %v2490_v30  ;;  %1708 = vmatprep.mubr.msk.f32.mxu1 %vm2216_vm0, %v2217_v1 }
  0x8f   : > { %459 = vmatprep.mubr.f32.mxu0 %v2217_v1  ;;  %1895 = vmatpush3.bf16.msra.mxu1 %v1872_v31 }
  0x90   : > { %1888 = vmatprep.subr.bf16.mxu1 %v2215_v0  ;;  %1873 = vmatpush3.bf16.msra.mxu0 %v1872_v31 }
  0x91   : > { %1709 = vmatmul.mubr.f32.gmra.mrb[10].mxu1 %v2506_v34  ;;  %1874 = vmatprep.subr.bf16.mxu0 %v2215_v0 }
  0x92   : > { %460 = vmatmul.mubr.f32.gmra.mrb[10].mxu0 %v2506_v34  ;;  %1711 = vmatprep.mubr.msk.f32.mxu1 %vm2216_vm0, %v2217_v1 }
  0x93   : > { %465 = vmatprep.mubr.f32.mxu0 %v2217_v1  ;;  %1896 = vmatpush3.bf16.msra.mxu1 %v1875_v35 }
  0x94   : > { %1889 = vmatprep.subr.bf16.mxu1 %v2215_v0  ;;  %1876 = vmatpush3.bf16.msra.mxu0 %v1875_v35 }
  0x95   : > { %1712 = vmatmul.mubr.f32.gmra.mrb[12].mxu1 %v2522_v38  ;;  %1877 = vmatprep.subr.bf16.mxu0 %v2215_v0 }
  0x96   : > { %466 = vmatmul.mubr.f32.gmra.mrb[12].mxu0 %v2522_v38  ;;  %1714 = vmatprep.mubr.msk.f32.mxu1 %vm2216_vm0, %v2217_v1 }
  0x97   : > { %471 = vmatprep.mubr.f32.mxu0 %v2217_v1  ;;  %1897 = vmatpush3.bf16.msra.mxu1 %v1878_v39 }
  0x98   : > { %1879 = vmatpush3.bf16.msra.mxu0 %v1878_v39  ;;  %1890 = vmatprep.subr.bf16.mxu1 %v2215_v0 }
  0x99   : > { %1715 = vmatmul.mubr.f32.gmra.mrb[14].mxu1 %v294_v42  ;;  %1880 = vmatprep.subr.bf16.mxu0 %v2215_v0  ;;  %v298_v0 = vld [vmem:[%s2399_s15 + $0x58] sm:$0xff]  ;;  %s2226_s15 = smov [#allocation7]  }
  0x9a   : > { %472 = vmatmul.mubr.f32.gmra.mrb[14].mxu0 %v294_v42  ;;  %1717 = vmatprep.mubr.msk.f32.mxu1 %vm2216_vm0, %v2217_v1  ;;  %s2141_s17 = sshll.u32 %s2226_s15, 4  ;;  %s2142_s17 = int_to_ptr.vmem [resolvable:$false] %s2141_s17 }
  0x9b   : > { %477 = vmatprep.mubr.f32.mxu0 %v2217_v1  ;;  %1898 = vmatpush3.bf16.msra.mxu1 %v1881_v43  ;;  %s2143_s10 = scalar_lea.vmem %s2142_s17, 9984  ;;  %p2144_p8 = scmp.lt.s32.totalorder %s3140_s29, %s2142_s17 }
  0x9c   : > { %1882 = vmatpush3.bf16.msra.mxu0 %v1881_v43  ;;  %p2145_p13 = scmp.lt.s32.totalorder %s2143_s10, %s2137_s20 }
  0x9d   : > { %1718 = vmatmul.mubr.f32.gmra.mrb[16].mxu1 %v295_v44 }
  0x9e   : > { %478 = vmatmul.mubr.f32.gmra.mrb[16].mxu0 %v295_v44  ;;  %1720 = vmatprep.mubr.msk.f32.mxu1 %vm2216_vm0, %v2217_v1  ;;  %p2146_p3 = por %p2145_p13, %p2144_p8 }
  0x9f   : > { %483 = vmatprep.mubr.f32.mxu0 %v2217_v1 }
  0xa0   : > { %p2147_p7 = pnand %p2146_p3, %p2140_p6 }
  0xa1   : > { %1721 = vmatmul.mubr.f32.gmra.mrb[18].mxu1 %v296_v45 }
  0xa2   : > { %484 = vmatmul.mubr.f32.gmra.mrb[18].mxu0 %v296_v45  ;;  %1723 = vmatprep.mubr.msk.f32.mxu1 %vm2216_vm0, %v2217_v1 }
  0xa3   : > { %489 = vmatprep.mubr.f32.mxu0 %v2217_v1 }
  0xa5   : > { %1724 = vmatmul.mubr.f32.gmra.mrb[20].mxu1 %v297_v46 }
  0xa6   : > { %490 = vmatmul.mubr.f32.gmra.mrb[20].mxu0 %v297_v46  ;;  %1726 = vmatprep.mubr.msk.f32.mxu1 %vm2216_vm0, %v2217_v1 }
  0xa7   : > { %495 = vmatprep.mubr.f32.mxu0 %v2217_v1 }
  0xa9   : > { %1727 = vmatmul.mubr.f32.gmra.mrb[22].mxu1 %v298_v0 }
  0xaa   : > { %496 = vmatmul.mubr.f32.gmra.mrb[22].mxu0 %v298_v0  ;;  %1729 = vmatprep.mubr.msk.f32.mxu1 %vm2216_vm0, %v2217_v1 }
  0xab   : > { %501 = vmatprep.mubr.f32.mxu0 %v2217_v1 }
  0xad   : > { %1730 = vmatmul.mubr.f32.gmra.mrb[24].mxu1 %v299_v47 }
  0xae   : > { %502 = vmatmul.mubr.f32.gmra.mrb[24].mxu0 %v299_v47  ;;  %1785 = vmatprep.mubr.msk.f32.mxu1 %vm2216_vm0, %v2217_v1 }
  0xaf   : > { %1764 = vmatprep.mubr.msk.f32.mxu0 %vm2216_vm0, %v2217_v1 }
  0xb1   : > { %1786 = vmatmul.mubr.f32.vlgmr.msra.gmra.mrb[26].mxu1 %v294_v42 }
  0xb2   : > { %1765 = vmatmul.mubr.f32.vlgmr.msra.gmra.mrb[26].mxu0 %v2427_v14  ;;  %1788 = vmatprep.mubr.msk.f32.mxu1 %vm2216_vm0, %v2217_v1 }
  0xb3   : > { %1767 = vmatprep.mubr.msk.f32.mxu0 %vm2216_vm0, %v2217_v1 }
  0xb5   : > { %1789 = vmatmul.mubr.f32.gmra.mrb[28].mxu1 %v295_v44 }
  0xb6   : > { %1768 = vmatmul.mubr.f32.gmra.mrb[28].mxu0 %v2442_v18  ;;  %1791 = vmatprep.mubr.msk.f32.mxu1 %vm2216_vm0, %v2217_v1 }
  0xb7   : > { %1770 = vmatprep.mubr.msk.f32.mxu0 %vm2216_vm0, %v2217_v1 }
  0xb9   : > { %1792 = vmatmul.mubr.f32.gmra.mrb[30].mxu1 %v296_v45 }
  0xba   : > { %1771 = vmatmul.mubr.f32.gmra.mrb[30].mxu0 %v2458_v22  ;;  %1794 = vmatprep.mubr.msk.f32.mxu1 %vm2216_vm0, %v2217_v1 }
  0xbb   : > { %1773 = vmatprep.mubr.msk.f32.mxu0 %vm2216_vm0, %v2217_v1 }
  0xbd   : > { %1795 = vmatmul.mubr.f32.gmra.mrb[32].mxu1 %v297_v46 }
  0xbe   : > { %1774 = vmatmul.mubr.f32.gmra.mrb[32].mxu0 %v2474_v26  ;;  %1797 = vmatprep.mubr.msk.f32.mxu1 %vm2216_vm0, %v2217_v1 }
  0xbf   : > { %1776 = vmatprep.mubr.msk.f32.mxu0 %vm2216_vm0, %v2217_v1 }
  0xc1   : > { %1798 = vmatmul.mubr.f32.gmra.mrb[34].mxu1 %v298_v0 }
  0xc2   : > { %1777 = vmatmul.mubr.f32.gmra.mrb[34].mxu0 %v2490_v30  ;;  %1800 = vmatprep.mubr.msk.f32.mxu1 %vm2216_vm0, %v2217_v1 }
  0xc3   : > { %1779 = vmatprep.mubr.msk.f32.mxu0 %vm2216_vm0, %v2217_v1 }
  0xc5   : > { %1801 = vmatmul.mubr.f32.gmra.mrb[36].mxu1 %v299_v47 }
  0xc6   : > { %1780 = vmatmul.mubr.f32.gmra.mrb[36].mxu0 %v2506_v34 }
  0xc7   : > { %1782 = vmatprep.mubr.msk.f32.mxu0 %vm2216_vm0, %v2217_v1  ;;  %v2606_v1 = vrot.slane %v348_v52, %v2599_v51 }
  0xca   : > { %1783 = vmatmul.mubr.f32.gmra.mrb[38].mxu0 %v2522_v38 }
 0x150   : > { %v2608_v53 = vpop.f32.mrb[0].mxu1 }
 0x151   : > { %v2610_v54 = vpop.f32.mrb[0].mxu0  ;;  %v1695_v55 = vpop.f32.mrb[1].mxu1 }
 0x152   : > { %v433_v56 = vpop.f32.mrb[1].mxu0 }
 0x153   : > { %v434_v57 = vadd.f32 %v433_v56, %v2606_v1 }
 0x154   : > { %v2619_v60 = vpop.f32.mrb[2].mxu1 }
 0x155   : > { %1455 = vst [vmem:[%s2621_s30 + $0x8] sm:$0xff] %v434_v57  ;;  %v2624_v61 = vpop.f32.mrb[2].mxu0  ;;  %v1698_v62 = vpop.f32.mrb[3].mxu1 }
 0x156   : > { %v439_v63 = vpop.f32.mrb[3].mxu0 }
 0x157   : > { %v440_v2 = vadd.f32 %v439_v63, %v2606_v1 }
 0x158   : > { %v584_v5 = vpop.f32.mrb[4].mxu1 }
 0x159   : > { %1456 = vst [vmem:[%s2621_s30 + $0x20] sm:$0xff] %v440_v2  ;;  %v443_v6 = vpop.f32.mrb[4].mxu0  ;;  %v2635_v7 = vadd.f32 %v584_v5, %v2628_v3  ;;  %v1701_v8 = vpop.f32.mrb[5].mxu1 }
 0x15a   : > { %v2638_v9 = vadd.f32 %v443_v6, %v2631_v4  ;;  %v445_v10 = vpop.f32.mrb[5].mxu0 }
 0x15b   : > { %v446_v11 = vadd.f32 %v445_v10, %v2606_v1 }
 0x15c   : > { %v589_v12 = vpop.f32.mrb[6].mxu1 }
 0x15d   : > { %1457 = vst [vmem:[%s2621_s30 + $0x38] sm:$0xff] %v446_v11  ;;  %v449_v13 = vpop.f32.mrb[6].mxu0  ;;  %v2643_v14 = vadd.f32 %v589_v12, %v2628_v3  ;;  %v1704_v15 = vpop.f32.mrb[7].mxu1 }
 0x15e   : > { %v2646_v16 = vadd.f32 %v449_v13, %v2631_v4  ;;  %v451_v17 = vpop.f32.mrb[7].mxu0 }
 0x15f   : > { %v452_v18 = vadd.f32 %v451_v17, %v2606_v1 }
 0x160   : > { %v594_v19 = vpop.f32.mrb[8].mxu1 }
 0x161   : > { %1458 = vst [vmem:[%s2621_s30 + $0x50] sm:$0xff] %v452_v18  ;;  %v455_v20 = vpop.f32.mrb[8].mxu0  ;;  %v2651_v21 = vadd.f32 %v594_v19, %v2628_v3  ;;  %v1707_v22 = vpop.f32.mrb[9].mxu1 }
 0x162   : > { %v2654_v23 = vadd.f32 %v455_v20, %v2631_v4  ;;  %v457_v24 = vpop.f32.mrb[9].mxu0 }
 0x163   : > { %v458_v25 = vadd.f32 %v457_v24, %v2606_v1 }
 0x164   : > { %v599_v26 = vpop.f32.mrb[10].mxu1 }
 0x165   : > { %1459 = vst [vmem:[%s2621_s30 + $0x68] sm:$0xff] %v458_v25  ;;  %v461_v27 = vpop.f32.mrb[10].mxu0  ;;  %v2659_v28 = vadd.f32 %v599_v26, %v2628_v3  ;;  %v1710_v29 = vpop.f32.mrb[11].mxu1 }
 0x166   : > { %v2662_v30 = vadd.f32 %v461_v27, %v2631_v4  ;;  %v463_v31 = vpop.f32.mrb[11].mxu0 }
 0x167   : > { %3222 = vst [vmem:[#allocation11_spill] sm:$0xff] %v2659_v28  ;;  %v464_v32 = vadd.f32 %v463_v31, %v2606_v1 }
 0x168   : > { %3223 = vst [vmem:[#allocation12_spill] sm:$0xff] %v2662_v30  ;;  %v604_v33 = vpop.f32.mrb[12].mxu1 }
 0x169   : > { %1460 = vst [vmem:[%s2621_s30 + $0x80] sm:$0xff] %v464_v32  ;;  %v467_v34 = vpop.f32.mrb[12].mxu0  ;;  %v2667_v35 = vadd.f32 %v604_v33, %v2628_v3  ;;  %v1713_v36 = vpop.f32.mrb[13].mxu1 }
 0x16a   : > { %v2670_v37 = vadd.f32 %v467_v34, %v2631_v4  ;;  %v469_v38 = vpop.f32.mrb[13].mxu0 }
 0x16b   : > { %v470_v39 = vadd.f32 %v469_v38, %v2606_v1 }
 0x16c   : > { %v2673_v40 = vpop.f32.mrb[14].mxu1 }
 0x16d   : > { %1461 = vst [vmem:[%s2621_s30 + $0x98] sm:$0xff] %v470_v39  ;;  %v2676_v41 = vpop.f32.mrb[14].mxu0  ;;  %v1716_v42 = vpop.f32.mrb[15].mxu1 }
 0x16e   : > { %v475_v43 = vpop.f32.mrb[15].mxu0 }
 0x16f   : > { %v476_v44 = vadd.f32 %v475_v43, %v2606_v1 }
 0x170   : > { %v2679_v45 = vpop.f32.mrb[16].mxu1 }
 0x171   : > { %1462 = vst [vmem:[%s2621_s30 + $0xb0] sm:$0xff] %v476_v44  ;;  %v2682_v46 = vpop.f32.mrb[16].mxu0  ;;  %v1719_v0 = vpop.f32.mrb[17].mxu1  ;;  %v3203_v44 = vmov 4  }
 0x172   : > { %v481_v47 = vpop.f32.mrb[17].mxu0 }
 0x173   : > { %v482_v49 = vadd.f32 %v481_v47, %v2606_v1 }
 0x174   : > { %v619_v52 = vpop.f32.mrb[18].mxu1 }
 0x175   : > { %1463 = vst [vmem:[%s2621_s30 + $0xc8] sm:$0xff] %v482_v49  ;;  %v485_v55 = vpop.f32.mrb[18].mxu0  ;;  %v2687_v56 = vadd.f32 %v619_v52, %v2628_v3  ;;  %v1722_v57 = vpop.f32.mrb[19].mxu1 }
 0x176   : > { %v2690_v62 = vadd.f32 %v485_v55, %v2631_v4  ;;  %v487_v63 = vpop.f32.mrb[19].mxu0  ;;  %v3201_v57 = vmov 1  }
 0x177   : > { %v488_v2 = vadd.f32 %v487_v63, %v2606_v1 }
 0x178   : > { %v624_v5 = vpop.f32.mrb[20].mxu1 }
 0x179   : > { %1464 = vst [vmem:[%s2621_s30 + $0xe0] sm:$0xff] %v488_v2  ;;  %v491_v6 = vpop.f32.mrb[20].mxu0  ;;  %v2695_v8 = vadd.f32 %v624_v5, %v2628_v3  ;;  %v1725_v10 = vpop.f32.mrb[21].mxu1 }
 0x17a   : > { %v2698_v11 = vadd.f32 %v491_v6, %v2631_v4  ;;  %v493_v12 = vpop.f32.mrb[21].mxu0  ;;  %v3199_v10 = vmov 5  }
 0x17b   : > { %v494_v13 = vadd.f32 %v493_v12, %v2606_v1 }
 0x17c   : > { %v629_v15 = vpop.f32.mrb[22].mxu1 }
 0x17d   : > { %1465 = vst [vmem:[%s2621_s30 + $0xf8] sm:$0xff] %v494_v13  ;;  %v497_v17 = vpop.f32.mrb[22].mxu0  ;;  %v2703_v18 = vadd.f32 %v629_v15, %v2628_v3  ;;  %v1728_v19 = vpop.f32.mrb[23].mxu1  ;;  %v3197_v15 = vmov 2  }
 0x17e   : > { %v2706_v20 = vadd.f32 %v497_v17, %v2631_v4  ;;  %v499_v22 = vpop.f32.mrb[23].mxu0  ;;  %v3195_v17 = vmov 6   ;;  %v3207_v19 = vmov 3  }
 0x17f   : > { %3224 = vst [vmem:[#allocation13_spill] sm:$0xff] %v2703_v18  ;;  %v500_v24 = vadd.f32 %v499_v22, %v2606_v1  ;;  %v3205_v22 = vmov 7  }
 0x180   : > { %v634_v25 = vpop.f32.mrb[24].mxu1 }
 0x181   : > { %1466 = vst [vmem:[%s2621_s30 + $0x110] sm:$0xff] %v500_v24  ;;  %v503_v26 = vpop.f32.mrb[24].mxu0  ;;  %v2711_v27 = vadd.f32 %v634_v25, %v2628_v3  ;;  %v1731_v29 = vpop.f32.mrb[25].mxu1 }
 0x182   : > { %v2714_v31 = vadd.f32 %v503_v26, %v2631_v4  ;;  %v505_v32 = vpop.f32.mrb[25].mxu0 }
 0x183   : > { %v506_v33 = vadd.f32 %v505_v32, %v2606_v1 }
 0x184   : > { %v755_v34 = vpop.f32.mrb[26].mxu1 }
 0x185   : > { %1467 = vst [vmem:[%s2621_s30 + $0x128] sm:$0xff] %v506_v33  ;;  %v2718_v36 = vpop.f32.mrb[26].mxu0  ;;  %823 = vperm.xlu1 %1978, %v755_v34   ;;  %v1787_v38 = vpop.f32.mrb[27].mxu1 }
 0x186   : > { %788 = vperm.xlu0 %1986, %v2718_v36   ;;  %v1766_v39 = vpop.f32.mrb[27].mxu0 }
 0x188   : > { %v760_v42 = vpop.f32.mrb[28].mxu1 }
 0x189   : > { %v2721_v43 = vpop.f32.mrb[28].mxu0  ;;  %1979 = vset.pattern.permute.xlu1 %v3203_v44  ;;  %v1790_v0 = vpop.f32.mrb[29].mxu1 }
 0x18a   : > { %828 = vperm.xlu0 %1986, %v760_v42   ;;  %v1769_v47 = vpop.f32.mrb[29].mxu0  ;;  %897 = vperm.xlu1 %1979, %v755_v34  }
 0x18c   : > { %v2724_v1 = vpop.f32.mrb[30].mxu1 }
 0x18d   : > { %v2726_v49 = vpop.f32.mrb[30].mxu0  ;;  %v1793_v52 = vpop.f32.mrb[31].mxu1 }
 0x18e   : > { %1994 = vset.pattern.permute.xlu0 %v3203_v44  ;;  %v1772_v55 = vpop.f32.mrb[31].mxu0  ;;  %1980 = vset.pattern.permute.xlu1 %v3201_v57 }
 0x18f   : > { %901 = vperm.xlu0 %1994, %v760_v42   ;;  %966 = vperm.xlu1 %1980, %v755_v34  }
 0x190   : > { %v2730_v63 = vpop.f32.mrb[32].mxu1 }
 0x191   : > { %v2732_v2 = vpop.f32.mrb[32].mxu0  ;;  %v1796_v5 = vpop.f32.mrb[33].mxu1 }
 0x192   : > { %v1775_v6 = vpop.f32.mrb[33].mxu0 }
 0x193   : > { %1995 = vset.pattern.permute.xlu0 %v3201_v57  ;;  %1981 = vset.pattern.permute.xlu1 %v3199_v10 }
 0x194   : > { %970 = vperm.xlu0 %1995, %v760_v42   ;;  %1048 = vperm.xlu1 %1981, %v755_v34   ;;  %v2746_v24 = vpop.f32.mrb[34].mxu1 }
 0x195   : > { %v2736_v12 = vpop.f32.mrb[34].mxu0  ;;  %v1799_v25 = vpop.f32.mrb[35].mxu1 }
 0x196   : > { %v1778_v13 = vpop.f32.mrb[35].mxu0  ;;  %v785_v25 = vld [vmem:[%s3190_s5] sm:$0xf] }
 0x198   : > { %1996 = vset.pattern.permute.xlu0 %v3199_v10  ;;  %1982 = vset.pattern.permute.xlu1 %v3197_v15  ;;  %v2748_v26 = vpop.f32.mrb[36].mxu1 }
 0x199   : > { %1052 = vperm.xlu0 %1996, %v760_v42   ;;  %1130 = vperm.xlu1 %1982, %v755_v34   ;;  %v1802_v29 = vpop.f32.mrb[37].mxu1  ;;  %v2776_v32 = vpop.f32.mrb[36].mxu0 }
 0x19a   : > { %v1781_v33 = vpop.f32.mrb[37].mxu0 }
 0x19b   : > { %v1319_v33 = vsub.s32 3, %v2596_v50 }
 0x19d   : > { %1997 = vset.pattern.permute.xlu0 %v3197_v15  ;;  %1983 = vset.pattern.permute.xlu1 %v3195_v17  ;;  %v2888_v30 = vrot.slane %v785_v25, %v1319_v33 }
 0x19e   : > { %1134 = vperm.xlu0 %1997, %v760_v42   ;;  %1212 = vperm.xlu1 %1983, %v755_v34  }
 0x1a2   : > { %1998 = vset.pattern.permute.xlu0 %v3195_v17  ;;  %1984 = vset.pattern.permute.xlu1 %v3207_v19 }
 0x1a3   : > { %1216 = vperm.xlu0 %1998, %v760_v42   ;;  %1294 = vperm.xlu1 %1984, %v755_v34  }
 0x1a7   : > { %1999 = vset.pattern.permute.xlu0 %v3207_v19  ;;  %1985 = vset.pattern.permute.xlu1 %v3205_v22 }
 0x1a8   : > { %1298 = vperm.xlu0 %1999, %v760_v42   ;;  %1376 = vperm.xlu1 %1985, %v755_v34   ;;  %v2779_v34 = vpop.f32.mrb[38].mxu0 }
 0x1a9   : > { %v1784_v38 = vpop.f32.mrb[39].mxu0 }
 0x1ac   : > { %2000 = vset.pattern.permute.xlu0 %v3205_v22  ;;  %1987 = vset.pattern.permute.xlu1 %v3203_v44 }
 0x1ad   : > { %1380 = vperm.xlu0 %2000, %v760_v42   ;;  %869 = vperm.xlu1 %1987, %v2718_v36  }
 0x1b1   : > { %2001 = vset.pattern.permute.xlu0 %v3209_v48  ;;  %1988 = vset.pattern.permute.xlu1 %v3201_v57 }
 0x1b2   : > { %793 = vperm.xlu0 %2001, %v2721_v43   ;;  %938 = vperm.xlu1 %1988, %v2718_v36  }
 0x1b6   : > { %2002 = vset.pattern.permute.xlu0 %v3203_v44  ;;  %1989 = vset.pattern.permute.xlu1 %v3199_v10 }
 0x1b7   : > { %873 = vperm.xlu0 %2002, %v2721_v43   ;;  %1020 = vperm.xlu1 %1989, %v2718_v36  }
 0x1bb   : > { %2003 = vset.pattern.permute.xlu0 %v3201_v57  ;;  %1990 = vset.pattern.permute.xlu1 %v3197_v15 }
 0x1bc   : > { %942 = vperm.xlu0 %2003, %v2721_v43   ;;  %1102 = vperm.xlu1 %1990, %v2718_v36  }
 0x1c0   : > { %2004 = vset.pattern.permute.xlu0 %v3199_v10  ;;  %1991 = vset.pattern.permute.xlu1 %v3195_v17 }
 0x1c1   : > { %1024 = vperm.xlu0 %2004, %v2721_v43   ;;  %1184 = vperm.xlu1 %1991, %v2718_v36  }
 0x1c5   : > { %2005 = vset.pattern.permute.xlu0 %v3197_v15  ;;  %1992 = vset.pattern.permute.xlu1 %v3207_v19 }
 0x1c6   : > { %1106 = vperm.xlu0 %2005, %v2721_v43   ;;  %1266 = vperm.xlu1 %1992, %v2718_v36  }
 0x1ca   : > { %2006 = vset.pattern.permute.xlu0 %v3195_v17  ;;  %1993 = vset.pattern.permute.xlu1 %v3205_v22 }
 0x1cb   : > { %1188 = vperm.xlu0 %2006, %v2721_v43   ;;  %1348 = vperm.xlu1 %1993, %v2718_v36  }
 0x1cf   : > { %2007 = vset.pattern.permute.xlu0 %v3207_v19  ;;  %2009 = vset.pattern.permute.xlu1 %v3209_v48 }
 0x1d0   : > { %1270 = vperm.xlu0 %2007, %v2721_v43   ;;  %833 = vperm.xlu1 %2009, %v2724_v1  }
 0x1d4   : > { %2008 = vset.pattern.permute.xlu0 %v3205_v22  ;;  %2010 = vset.pattern.permute.xlu1 %v3203_v44 }
 0x1d5   : > { %1352 = vperm.xlu0 %2008, %v2721_v43   ;;  %905 = vperm.xlu1 %2010, %v2724_v1  }
 0x1d9   : > { %2025 = vset.pattern.permute.xlu0 %v3209_v48  ;;  %2011 = vset.pattern.permute.xlu1 %v3201_v57 }
 0x1da   : > { %838 = vperm.xlu0 %2025, %v2730_v63   ;;  %974 = vperm.xlu1 %2011, %v2724_v1  }
 0x1de   : > { %2026 = vset.pattern.permute.xlu0 %v3203_v44  ;;  %2012 = vset.pattern.permute.xlu1 %v3199_v10 }
 0x1df   : > { %909 = vperm.xlu0 %2026, %v2730_v63   ;;  %1056 = vperm.xlu1 %2012, %v2724_v1  }
 0x1e3   : > { %2027 = vset.pattern.permute.xlu0 %v3201_v57  ;;  %2013 = vset.pattern.permute.xlu1 %v3197_v15 }
 0x1e4   : > { %978 = vperm.xlu0 %2027, %v2730_v63   ;;  %1138 = vperm.xlu1 %2013, %v2724_v1  }
 0x1e8   : > { %2028 = vset.pattern.permute.xlu0 %v3199_v10  ;;  %2014 = vset.pattern.permute.xlu1 %v3195_v17 }
 0x1e9   : > { %1060 = vperm.xlu0 %2028, %v2730_v63   ;;  %1220 = vperm.xlu1 %2014, %v2724_v1  }
 0x1ed   : > { %2029 = vset.pattern.permute.xlu0 %v3197_v15  ;;  %2015 = vset.pattern.permute.xlu1 %v3207_v19 }
 0x1ee   : > { %1142 = vperm.xlu0 %2029, %v2730_v63   ;;  %1302 = vperm.xlu1 %2015, %v2724_v1  }
 0x1f2   : > { %2030 = vset.pattern.permute.xlu0 %v3195_v17  ;;  %2016 = vset.pattern.permute.xlu1 %v3205_v22 }
 0x1f3   : > { %1224 = vperm.xlu0 %2030, %v2730_v63   ;;  %1384 = vperm.xlu1 %2016, %v2724_v1  }
 0x1f7   : > { %2031 = vset.pattern.permute.xlu0 %v3207_v19  ;;  %2017 = vset.pattern.permute.xlu1 %v3209_v48 }
 0x1f8   : > { %1306 = vperm.xlu0 %2031, %v2730_v63   ;;  %798 = vperm.xlu1 %2017, %v2726_v49  }
 0x1fc   : > { %2032 = vset.pattern.permute.xlu0 %v3205_v22  ;;  %2018 = vset.pattern.permute.xlu1 %v3203_v44 }
 0x1fd   : > { %1388 = vperm.xlu0 %2032, %v2730_v63   ;;  %877 = vperm.xlu1 %2018, %v2726_v49   ;;  %v784_v63 = vld [vmem:[%s3189_s4] sm:$0xf] }
 0x1fe   : > { %v2847_v6 = vrot.slane %v784_v63, %v2599_v51  ;;  %v2853_v13 = vrot.slane %v784_v63, %v2617_v59  ;;  %v2859_v29 = vrot.slane %v784_v63, %v2614_v58 }
 0x201   : > { %2048 = vset.pattern.permute.xlu0 %v3209_v48  ;;  %2019 = vset.pattern.permute.xlu1 %v3201_v57 }
 0x202   : > { %808 = vperm.xlu0 %2048, %v2736_v12   ;;  %946 = vperm.xlu1 %2019, %v2726_v49  }
 0x204   : > { %v824_v36 = vpop.permute.xlu1 %823 }
 0x205   : > { %v2825_v39 = vpop.permute.xlu0 %788 }
 0x206   : > { %2049 = vset.pattern.permute.xlu0 %v3203_v44  ;;  %2020 = vset.pattern.permute.xlu1 %v3199_v10  ;;  %v2867_v44 = vrot.slane %v785_v25, %v2617_v59 }
 0x207   : > { %885 = vperm.xlu0 %2049, %v2736_v12   ;;  %1028 = vperm.xlu1 %2020, %v2726_v49  }
 0x209   : > { %v829_v42 = vpop.permute.xlu0 %828  ;;  %v898_v43 = vpop.permute.xlu1 %897 }
 0x20b   : > { %2050 = vset.pattern.permute.xlu0 %v3201_v57  ;;  %2021 = vset.pattern.permute.xlu1 %v3197_v15 }
 0x20c   : > { %954 = vperm.xlu0 %2050, %v2736_v12   ;;  %1110 = vperm.xlu1 %2021, %v2726_v49  }
 0x20e   : > { %v902_v0 = vpop.permute.xlu0 %901  ;;  %v967_v47 = vpop.permute.xlu1 %966 }
 0x210   : > { %2051 = vset.pattern.permute.xlu0 %v3199_v10  ;;  %2022 = vset.pattern.permute.xlu1 %v3195_v17 }
 0x211   : > { %1036 = vperm.xlu0 %2051, %v2736_v12   ;;  %1192 = vperm.xlu1 %2022, %v2726_v49  }
 0x213   : > { %v971_v1 = vpop.permute.xlu0 %970  ;;  %v1049_v52 = vpop.permute.xlu1 %1048 }
 0x214   : > { %v1001_v10 = vmul.f32 %v2847_v6, %v971_v1 }
 0x215   : > { %2052 = vset.pattern.permute.xlu0 %v3197_v15  ;;  %2023 = vset.pattern.permute.xlu1 %v3207_v19  ;;  %v863_v15 = vmul.f32 %v2853_v13, %v829_v42  ;;  %v2877_v42 = vrot.slane %v784_v63, %v1319_v33  ;;  %v3225_v63 = vmov 7  }
 0x216   : > { %1118 = vperm.xlu0 %2052, %v2736_v12   ;;  %1274 = vperm.xlu1 %2023, %v2726_v49  }
 0x218   : > { %v1053_v55 = vpop.permute.xlu0 %1052  ;;  %v1131_v5 = vpop.permute.xlu1 %1130 }
 0x219   : > { %v1164_v50 = vmul.f32 %v2859_v29, %v1131_v5  ;;  %v931_v5 = vmul.f32 %v2867_v44, %v898_v43  ;;  %v474_v43 = vadd.f32 %v2676_v41, %v2631_v4  ;;  %v3228_v41 = vmov 1  }
 0x21a   : > { %2053 = vset.pattern.permute.xlu0 %v3195_v17  ;;  %2024 = vset.pattern.permute.xlu1 %v3205_v22  ;;  %v1000_v17 = vmul.f32 %v2847_v6, %v967_v47  ;;  %v2870_v22 = vrot.slane %v785_v25, %v2599_v51  ;;  %v2880_v47 = vrot.slane %v785_v25, %v2614_v58 }
 0x21b   : > { %1200 = vperm.xlu0 %2053, %v2736_v12   ;;  %1356 = vperm.xlu1 %2024, %v2726_v49   ;;  %v862_v49 = vmul.f32 %v2853_v13, %v824_v36  ;;  %v1014_v51 = vadd.f32 %v1001_v10, %v863_v15  ;;  %v932_v58 = vmul.f32 %v2867_v44, %v902_v0  ;;  %v3226_v15 = vmov 4  }
 0x21c   : > { %v1082_v36 = vmul.f32 %v2870_v22, %v1049_v52 }
 0x21d   : > { %v1135_v38 = vpop.permute.xlu0 %1134  ;;  %v1213_v57 = vpop.permute.xlu1 %1212  ;;  %v1013_v59 = vadd.f32 %v1000_v17, %v862_v49  ;;  %v1083_v17 = vmul.f32 %v2870_v22, %v1053_v55 }
 0x21e   : > { %v1165_v1 = vmul.f32 %v2859_v29, %v1135_v38  ;;  %v1246_v10 = vmul.f32 %v2880_v47, %v1213_v57  ;;  %v1095_v25 = vadd.f32 %v1082_v36, %v931_v5 }
 0x21f   : > { %2054 = vset.pattern.permute.xlu0 %v3207_v19  ;;  %2033 = vset.pattern.permute.xlu1 %v3209_v48  ;;  %v1177_v48 = vadd.f32 %v1164_v50, %v1013_v59  ;;  %v1096_v49 = vadd.f32 %v1083_v17, %v932_v58  ;;  %v3227_v59 = vmov 0  }
 0x220   : > { %1282 = vperm.xlu0 %2054, %v2736_v12   ;;  %803 = vperm.xlu1 %2033, %v2732_v2   ;;  %v1178_v52 = vadd.f32 %v1165_v1, %v1014_v51  ;;  %v1259_v57 = vadd.f32 %v1246_v10, %v1095_v25  ;;  %v610_v51 = vadd.f32 %v2673_v40, %v2628_v3  ;;  %v3229_v40 = vmov 5  }
 0x221   : > { %v615_v10 = vadd.f32 %v2679_v45, %v2628_v3 }
 0x222   : > { %v1217_v19 = vpop.permute.xlu0 %1216  ;;  %v1295_v18 = vpop.permute.xlu1 %1294 }
 0x223   : > { %v1328_v28 = vmul.f32 %v2877_v42, %v1295_v18  ;;  %v1247_v50 = vmul.f32 %v2880_v47, %v1217_v19 }
 0x224   : > { %2055 = vset.pattern.permute.xlu0 %v3225_v63  ;;  %2034 = vset.pattern.permute.xlu1 %v3226_v15 }
 0x225   : > { %1364 = vperm.xlu0 %2055, %v2736_v12   ;;  %v1341_v18 = vadd.f32 %v1328_v28, %v1177_v48  ;;  %881 = vperm.xlu1 %2034, %v2732_v2   ;;  %v480_v48 = vadd.f32 %v2682_v46, %v2631_v4  ;;  %v1260_v5 = vadd.f32 %v1247_v50, %v1096_v49 }
 0x227   : > { %v1299_v33 = vpop.permute.xlu0 %1298  ;;  %v1436_v38 = vadd.f32 %v1341_v18, %v474_v43  ;;  %v1377_v0 = vpop.permute.xlu1 %1376 }
 0x228   : > { %v1329_v55 = vmul.f32 %v2877_v42, %v1299_v33  ;;  %v1410_v12 = vmul.f32 %v2888_v30, %v1377_v0  ;;  %v3230_v33 = vmov 2   ;;  %v3231_v0 = vmov 6  }
 0x229   : > { %2056 = vset.pattern.permute.xlu0 %v3227_v59  ;;  %1449 = vst [vmem:[%s2621_s30 + $0xa8] sm:$0xff] %v1436_v38  ;;  %2035 = vset.pattern.permute.xlu1 %v3228_v41 }
 0x22a   : > { %v1342_v28 = vadd.f32 %v1329_v55, %v1178_v52  ;;  %848 = vperm.xlu0 %2056, %v2748_v26   ;;  %v1423_v1 = vadd.f32 %v1410_v12, %v1259_v57  ;;  %950 = vperm.xlu1 %2035, %v2732_v2   ;;  %v3232_v57 = vmov 3  }
 0x22c   : > { %v1437_v19 = vadd.f32 %v1342_v28, %v480_v48  ;;  %v1381_v36 = vpop.permute.xlu0 %1380  ;;  %v1475_v58 = vadd.f32 %v1423_v1, %v610_v51  ;;  %v870_v17 = vpop.permute.xlu1 %869  ;;  %v855_v28 = vmul.f32 %v2853_v13, %v2825_v39 }
 0x22d   : > { %v1411_v46 = vmul.f32 %v2888_v30, %v1381_v36 }
 0x22e   : > { %1450 = vst [vmem:[%s2621_s30 + $0xc0] sm:$0xff] %v1437_v19  ;;  %2057 = vset.pattern.permute.xlu0 %v3226_v15  ;;  %1488 = vst [vmem:[%s2621_s30 + $0xb8] sm:$0xff] %v1475_v58  ;;  %2036 = vset.pattern.permute.xlu1 %v3229_v40 }
 0x22f   : > { %v1424_v43 = vadd.f32 %v1411_v46, %v1260_v5  ;;  %917 = vperm.xlu0 %2057, %v2748_v26   ;;  %1032 = vperm.xlu1 %2036, %v2732_v2  }
 0x231   : > { %v1476_v52 = vadd.f32 %v1424_v43, %v615_v10  ;;  %v794_v18 = vpop.permute.xlu0 %793  ;;  %v939_v25 = vpop.permute.xlu1 %938  ;;  %v924_v43 = vmul.f32 %v2867_v44, %v870_v17 }
 0x232   : > { %v993_v12 = vmul.f32 %v2847_v6, %v939_v25  ;;  %v856_v5 = vmul.f32 %v2853_v13, %v794_v18 }
 0x233   : > { %1489 = vst [vmem:[%s2621_s30 + $0xd0] sm:$0xff] %v1476_v52  ;;  %2058 = vset.pattern.permute.xlu0 %v3228_v41  ;;  %2037 = vset.pattern.permute.xlu1 %v3230_v33 }
 0x234   : > { %986 = vperm.xlu0 %2058, %v2748_v26   ;;  %1114 = vperm.xlu1 %2037, %v2732_v2   ;;  %v1006_v1 = vadd.f32 %v993_v12, %v855_v28 }
 0x236   : > { %v874_v45 = vpop.permute.xlu0 %873  ;;  %v1021_v38 = vpop.permute.xlu1 %1020 }
 0x237   : > { %v1075_v36 = vmul.f32 %v2870_v22, %v1021_v38 }
 0x238   : > { %2059 = vset.pattern.permute.xlu0 %v3229_v40  ;;  %2038 = vset.pattern.permute.xlu1 %v3231_v0 }
 0x239   : > { %1068 = vperm.xlu0 %2059, %v2748_v26   ;;  %1196 = vperm.xlu1 %2038, %v2732_v2   ;;  %v1088_v25 = vadd.f32 %v1075_v36, %v924_v43 }
 0x23b   : > { %v943_v55 = vpop.permute.xlu0 %942  ;;  %v1103_v49 = vpop.permute.xlu1 %1102 }
 0x23c   : > { %v1157_v51 = vmul.f32 %v2859_v29, %v1103_v49  ;;  %v994_v58 = vmul.f32 %v2847_v6, %v943_v55 }
 0x23d   : > { %2060 = vset.pattern.permute.xlu0 %v3230_v33  ;;  %2039 = vset.pattern.permute.xlu1 %v3232_v57 }
 0x23e   : > { %1150 = vperm.xlu0 %2060, %v2748_v26   ;;  %1278 = vperm.xlu1 %2039, %v2732_v2   ;;  %v1170_v10 = vadd.f32 %v1157_v51, %v1006_v1  ;;  %v1007_v38 = vadd.f32 %v994_v58, %v856_v5  ;;  %v925_v51 = vmul.f32 %v2867_v44, %v874_v45 }
 0x240   : > { %v1025_v50 = vpop.permute.xlu0 %1024  ;;  %v1185_v48 = vpop.permute.xlu1 %1184 }
 0x241   : > { %v1239_v52 = vmul.f32 %v2880_v47, %v1185_v48  ;;  %v1076_v1 = vmul.f32 %v2870_v22, %v1025_v50 }
 0x242   : > { %2061 = vset.pattern.permute.xlu0 %v3231_v0  ;;  %2040 = vset.pattern.permute.xlu1 %v3225_v63 }
 0x243   : > { %1232 = vperm.xlu0 %2061, %v2748_v26   ;;  %1360 = vperm.xlu1 %2040, %v2732_v2   ;;  %v432_v2 = vadd.f32 %v2610_v54, %v2631_v4  ;;  %v1252_v28 = vadd.f32 %v1239_v52, %v1088_v25  ;;  %v575_v54 = vadd.f32 %v2608_v53, %v2628_v3 }
 0x244   : > { %v1089_v50 = vadd.f32 %v1076_v1, %v925_v51 }
 0x245   : > { %v1107_v19 = vpop.permute.xlu0 %1106  ;;  %v1267_v46 = vpop.permute.xlu1 %1266 }
 0x246   : > { %v1321_v39 = vmul.f32 %v2877_v42, %v1267_v46  ;;  %v1158_v55 = vmul.f32 %v2859_v29, %v1107_v19 }
 0x247   : > { %2062 = vset.pattern.permute.xlu0 %v3232_v57  ;;  %2041 = vset.pattern.permute.xlu1 %v3227_v59 }
 0x248   : > { %1314 = vperm.xlu0 %2062, %v2748_v26   ;;  %v1334_v18 = vadd.f32 %v1321_v39, %v1170_v10  ;;  %843 = vperm.xlu1 %2041, %v2746_v24   ;;  %v1171_v19 = vadd.f32 %v1158_v55, %v1007_v38  ;;  %v438_v39 = vadd.f32 %v2624_v61, %v2631_v4 }
 0x249   : > { %v580_v61 = vadd.f32 %v2619_v60, %v2628_v3 }
 0x24a   : > { %v1189_v49 = vpop.permute.xlu0 %1188  ;;  %v1429_v12 = vadd.f32 %v1334_v18, %v432_v2  ;;  %v1349_v17 = vpop.permute.xlu1 %1348 }
 0x24b   : > { %v1403_v48 = vmul.f32 %v2888_v30, %v1349_v17  ;;  %v1240_v10 = vmul.f32 %v2880_v47, %v1189_v49 }
 0x24c   : > { %2071 = vset.pattern.permute.xlu0 %v3227_v59  ;;  %1442 = vst [vmem:[%s2621_s30] sm:$0xff] %v1429_v12  ;;  %2042 = vset.pattern.permute.xlu1 %v3226_v15 }
 0x24d   : > { %818 = vperm.xlu0 %2071, %v2779_v34   ;;  %v1416_v36 = vadd.f32 %v1403_v48, %v1252_v28  ;;  %913 = vperm.xlu1 %2042, %v2746_v24   ;;  %v1253_v2 = vadd.f32 %v1240_v10, %v1089_v50 }
 0x24f   : > { %v1271_v5 = vpop.permute.xlu0 %1270  ;;  %v1468_v58 = vadd.f32 %v1416_v36, %v575_v54  ;;  %v834_v45 = vpop.permute.xlu1 %833 }
 0x250   : > { %v1322_v46 = vmul.f32 %v2877_v42, %v1271_v5  ;;  %v864_v1 = vmul.f32 %v2853_v13, %v834_v45 }
 0x251   : > { %2072 = vset.pattern.permute.xlu0 %v3226_v15  ;;  %1481 = vst [vmem:[%s2621_s30 + $0x10] sm:$0xff] %v1468_v58  ;;  %2043 = vset.pattern.permute.xlu1 %v3228_v41 }
 0x252   : > { %v1335_v53 = vadd.f32 %v1322_v46, %v1171_v19  ;;  %893 = vperm.xlu0 %2072, %v2779_v34   ;;  %982 = vperm.xlu1 %2043, %v2746_v24  }
 0x254   : > { %v1430_v43 = vadd.f32 %v1335_v53, %v438_v39  ;;  %v1353_v52 = vpop.permute.xlu0 %1352  ;;  %v906_v18 = vpop.permute.xlu1 %905 }
 0x255   : > { %v1404_v25 = vmul.f32 %v2888_v30, %v1353_v52 }
 0x256   : > { %1443 = vst [vmem:[%s2621_s30 + $0x18] sm:$0xff] %v1430_v43  ;;  %2073 = vset.pattern.permute.xlu0 %v3228_v41  ;;  %2044 = vset.pattern.permute.xlu1 %v3229_v40 }
 0x257   : > { %v1417_v4 = vadd.f32 %v1404_v25, %v1253_v2  ;;  %962 = vperm.xlu0 %2073, %v2779_v34   ;;  %1064 = vperm.xlu1 %2044, %v2746_v24  }
 0x259   : > { %v1469_v38 = vadd.f32 %v1417_v4, %v580_v61  ;;  %v839_v55 = vpop.permute.xlu0 %838  ;;  %v975_v49 = vpop.permute.xlu1 %974 }
 0x25a   : > { %v1002_v48 = vmul.f32 %v2847_v6, %v975_v49  ;;  %v865_v58 = vmul.f32 %v2853_v13, %v839_v55 }
 0x25b   : > { %1482 = vst [vmem:[%s2621_s30 + $0x28] sm:$0xff] %v1469_v38  ;;  %2074 = vset.pattern.permute.xlu0 %v3229_v40  ;;  %2045 = vset.pattern.permute.xlu1 %v3230_v33 }
 0x25c   : > { %1044 = vperm.xlu0 %2074, %v2779_v34   ;;  %1146 = vperm.xlu1 %2045, %v2746_v24   ;;  %v1015_v19 = vadd.f32 %v1002_v48, %v864_v1 }
 0x25e   : > { %v910_v60 = vpop.permute.xlu0 %909  ;;  %v1057_v3 = vpop.permute.xlu1 %1056 }
 0x25f   : > { %v1084_v5 = vmul.f32 %v2870_v22, %v1057_v3 }
 0x260   : > { %2075 = vset.pattern.permute.xlu0 %v3230_v33  ;;  %2046 = vset.pattern.permute.xlu1 %v3231_v0 }
 0x261   : > { %1126 = vperm.xlu0 %2075, %v2779_v34   ;;  %1228 = vperm.xlu1 %2046, %v2746_v24  }
 0x263   : > { %v979_v12 = vpop.permute.xlu0 %978  ;;  %v1139_v17 = vpop.permute.xlu1 %1138 }
 0x264   : > { %v1166_v54 = vmul.f32 %v2859_v29, %v1139_v17  ;;  %v1003_v46 = vmul.f32 %v2847_v6, %v979_v12 }
 0x265   : > { %2076 = vset.pattern.permute.xlu0 %v3231_v0  ;;  %2047 = vset.pattern.permute.xlu1 %v3232_v57 }
 0x266   : > { %1208 = vperm.xlu0 %2076, %v2779_v34   ;;  %1310 = vperm.xlu1 %2047, %v2746_v24   ;;  %v1179_v10 = vadd.f32 %v1166_v54, %v1015_v19  ;;  %v1016_v52 = vadd.f32 %v1003_v46, %v865_v58 }
 0x268   : > { %v1061_v28 = vpop.permute.xlu0 %1060  ;;  %v1221_v51 = vpop.permute.xlu1 %1220 }
 0x269   : > { %v1248_v39 = vmul.f32 %v2880_v47, %v1221_v51 }
 0x26a   : > { %2077 = vset.pattern.permute.xlu0 %v3232_v57  ;;  %2063 = vset.pattern.permute.xlu1 %v3227_v59  ;;  %v933_v59 = vmul.f32 %v2867_v44, %v906_v18 }
 0x26b   : > { %1290 = vperm.xlu0 %2077, %v2779_v34   ;;  %813 = vperm.xlu1 %2063, %v2776_v32  }
 0x26c   : > { %v1097_v43 = vadd.f32 %v1084_v5, %v933_v59 }
 0x26d   : > { %v1143_v36 = vpop.permute.xlu0 %1142  ;;  %v1303_v50 = vpop.permute.xlu1 %1302 }
 0x26e   : > { %v1330_v45 = vmul.f32 %v2877_v42, %v1303_v50  ;;  %v1167_v2 = vmul.f32 %v2859_v29, %v1143_v36  ;;  %v1261_v38 = vadd.f32 %v1248_v39, %v1097_v43 }
 0x26f   : > { %2078 = vset.pattern.permute.xlu0 %v3225_v63  ;;  %2064 = vset.pattern.permute.xlu1 %v3226_v15  ;;  %v934_v15 = vmul.f32 %v2867_v44, %v910_v60 }
 0x270   : > { %1372 = vperm.xlu0 %2078, %v2779_v34   ;;  %v1343_v53 = vadd.f32 %v1330_v45, %v1179_v10  ;;  %889 = vperm.xlu1 %2064, %v2776_v32   ;;  %v1085_v34 = vmul.f32 %v2870_v22, %v1061_v28  ;;  %v1180_v55 = vadd.f32 %v1167_v2, %v1016_v52 }
 0x272   : > { %v1225_v25 = vpop.permute.xlu0 %1224  ;;  %v1438_v61 = vadd.f32 %v1343_v53, %v2690_v62  ;;  %v1385_v4 = vpop.permute.xlu1 %1384  ;;  %v1098_v48 = vadd.f32 %v1085_v34, %v934_v15 }
 0x273   : > { %v1412_v18 = vmul.f32 %v2888_v30, %v1385_v4 }
 0x274   : > { %1396 = vperm.xlu0 %2078, %v2748_v26   ;;  %1451 = vst [vmem:[%s2621_s30 + $0xd8] sm:$0xff] %v1438_v61  ;;  %2065 = vset.pattern.permute.xlu1 %v3228_v41  ;;  %v1249_v26 = vmul.f32 %v2880_v47, %v1225_v25 }
 0x275   : > { %v1425_v49 = vadd.f32 %v1412_v18, %v1261_v38  ;;  %958 = vperm.xlu1 %2065, %v2776_v32  }
 0x276   : > { %v1262_v51 = vadd.f32 %v1249_v26, %v1098_v48 }
 0x277   : > { %v1307_v62 = vpop.permute.xlu0 %1306  ;;  %v1477_v3 = vadd.f32 %v1425_v49, %v2687_v56  ;;  %v799_v17 = vpop.permute.xlu1 %798 }
 0x278   : > { %v1331_v12 = vmul.f32 %v2877_v42, %v1307_v62 }
 0x279   : > { %1490 = vst [vmem:[%s2621_s30 + $0xe8] sm:$0xff] %v1477_v3  ;;  %2066 = vset.pattern.permute.xlu1 %v3229_v40 }
 0x27a   : > { %v1344_v60 = vadd.f32 %v1331_v12, %v1180_v55  ;;  %1040 = vperm.xlu1 %2066, %v2776_v32  }
 0x27c   : > { %v1439_v41 = vadd.f32 %v1344_v60, %v2698_v11  ;;  %v1389_v28 = vpop.permute.xlu0 %1388  ;;  %v878_v56 = vpop.permute.xlu1 %877 }
 0x27d   : > { %v1413_v1 = vmul.f32 %v2888_v30, %v1389_v28  ;;  %v926_v52 = vmul.f32 %v2867_v44, %v878_v56 }
 0x27e   : > { %1452 = vst [vmem:[%s2621_s30 + $0xf0] sm:$0xff] %v1439_v41  ;;  %2067 = vset.pattern.permute.xlu1 %v3230_v33 }
 0x27f   : > { %v1426_v54 = vadd.f32 %v1413_v1, %v1262_v51  ;;  %1122 = vperm.xlu1 %2067, %v2776_v32  }
 0x281   : > { %v1478_v19 = vadd.f32 %v1426_v54, %v2695_v8  ;;  %v809_v36 = vpop.permute.xlu0 %808  ;;  %v947_v5 = vpop.permute.xlu1 %946 }
 0x282   : > { %v995_v33 = vmul.f32 %v2847_v6, %v947_v5  ;;  %v859_v39 = vmul.f32 %v2853_v13, %v809_v36 }
 0x283   : > { %1491 = vst [vmem:[%s2621_s30 + $0x100] sm:$0xff] %v1478_v19  ;;  %2068 = vset.pattern.permute.xlu1 %v3231_v0  ;;  %v857_v0 = vmul.f32 %v2853_v13, %v799_v17 }
 0x284   : > { %1204 = vperm.xlu1 %2068, %v2776_v32  }
 0x285   : > { %v1008_v45 = vadd.f32 %v995_v33, %v857_v0 }
 0x286   : > { %v886_v11 = vpop.permute.xlu0 %885  ;;  %v1029_v40 = vpop.permute.xlu1 %1028 }
 0x287   : > { %v1077_v59 = vmul.f32 %v2870_v22, %v1029_v40  ;;  %v928_v49 = vmul.f32 %v2867_v44, %v886_v11 }
 0x288   : > { %2069 = vset.pattern.permute.xlu1 %v3232_v57 }
 0x289   : > { %1286 = vperm.xlu1 %2069, %v2776_v32   ;;  %v1090_v61 = vadd.f32 %v1077_v59, %v926_v52 }
 0x28b   : > { %v955_v58 = vpop.permute.xlu0 %954  ;;  %v1111_v46 = vpop.permute.xlu1 %1110 }
 0x28c   : > { %v1159_v10 = vmul.f32 %v2859_v29, %v1111_v46 }
 0x28d   : > { %2070 = vset.pattern.permute.xlu1 %v3225_v63  ;;  %v997_v63 = vmul.f32 %v2847_v6, %v955_v58 }
 0x28e   : > { %1368 = vperm.xlu1 %2070, %v2776_v32   ;;  %v1172_v32 = vadd.f32 %v1159_v10, %v1008_v45 }
 0x290   : > { %v1037_v8 = vpop.permute.xlu0 %1036  ;;  %v1193_v50 = vpop.permute.xlu1 %1192 }
 0x291   : > { %v1241_v2 = vmul.f32 %v2880_v47, %v1193_v50  ;;  %v1079_v62 = vmul.f32 %v2870_v22, %v1037_v8 }
 0x292   : > { %1392 = vperm.xlu1 %2070, %v2746_v24   ;;  %v1010_v24 = vadd.f32 %v997_v63, %v859_v39 }
 0x293   : > { %v1254_v34 = vadd.f32 %v1241_v2, %v1090_v61 }
 0x295   : > { %v1119_v57 = vpop.permute.xlu0 %1118  ;;  %v1275_v53 = vpop.permute.xlu1 %1274 }
 0x296   : > { %v1323_v43 = vmul.f32 %v2877_v42, %v1275_v53  ;;  %v1161_v4 = vmul.f32 %v2859_v29, %v1119_v57 }
 0x298   : > { %v1336_v25 = vadd.f32 %v1323_v43, %v1172_v32  ;;  %v1174_v3 = vadd.f32 %v1161_v4, %v1010_v24 }
 0x29a   : > { %v1201_v38 = vpop.permute.xlu0 %1200  ;;  %v1431_v18 = vadd.f32 %v1336_v25, %v2638_v9  ;;  %v1357_v15 = vpop.permute.xlu1 %1356  ;;  %v1092_v9 = vadd.f32 %v1079_v62, %v928_v49 }
 0x29b   : > { %v1405_v55 = vmul.f32 %v2888_v30, %v1357_v15  ;;  %v1243_v41 = vmul.f32 %v2880_v47, %v1201_v38 }
 0x29c   : > { %1444 = vst [vmem:[%s2621_s30 + $0x30] sm:$0xff] %v1431_v18 }
 0x29d   : > { %v1418_v12 = vadd.f32 %v1405_v55, %v1254_v34  ;;  %v1256_v56 = vadd.f32 %v1243_v41, %v1092_v9 }
 0x29f   : > { %v1283_v17 = vpop.permute.xlu0 %1282  ;;  %v1470_v48 = vadd.f32 %v1418_v12, %v2635_v7  ;;  %v804_v26 = vpop.permute.xlu1 %803 }
 0x2a0   : > { %v1325_v60 = vmul.f32 %v2877_v42, %v1283_v17  ;;  %v858_v0 = vmul.f32 %v2853_v13, %v804_v26 }
 0x2a1   : > { %1483 = vst [vmem:[%s2621_s30 + $0x40] sm:$0xff] %v1470_v48 }
 0x2a2   : > { %v1338_v28 = vadd.f32 %v1325_v60, %v1174_v3 }
 0x2a4   : > { %v1433_v51 = vadd.f32 %v1338_v28, %v2654_v23  ;;  %v1365_v1 = vpop.permute.xlu0 %1364  ;;  %v882_v54 = vpop.permute.xlu1 %881 }
 0x2a5   : > { %v1407_v19 = vmul.f32 %v2888_v30, %v1365_v1  ;;  %v927_v43 = vmul.f32 %v2867_v44, %v882_v54 }
 0x2a6   : > { %1446 = vst [vmem:[%s2621_s30 + $0x60] sm:$0xff] %v1433_v51 }
 0x2a7   : > { %v1420_v36 = vadd.f32 %v1407_v19, %v1256_v56 }
 0x2a9   : > { %v1472_v7 = vadd.f32 %v1420_v36, %v2651_v21  ;;  %v849_v5 = vpop.permute.xlu0 %848  ;;  %v951_v11 = vpop.permute.xlu1 %950 }
 0x2aa   : > { %v996_v23 = vmul.f32 %v2847_v6, %v951_v11  ;;  %v867_v59 = vmul.f32 %v2853_v13, %v849_v5 }
 0x2ab   : > { %1485 = vst [vmem:[%s2621_s30 + $0x70] sm:$0xff] %v1472_v7 }
 0x2ac   : > { %v1009_v45 = vadd.f32 %v996_v23, %v858_v0 }
 0x2ae   : > { %v3063_v40 = vpop.permute.xlu0 %917  ;;  %v1033_v58 = vpop.permute.xlu1 %1032 }
 0x2af   : > { %v1078_v21 = vmul.f32 %v2870_v22, %v1033_v58 }
 0x2b1   : > { %v1091_v25 = vadd.f32 %v1078_v21, %v927_v43 }
 0x2b3   : > { %v987_v46 = vpop.permute.xlu0 %986  ;;  %v1115_v8 = vpop.permute.xlu1 %1114 }
 0x2b4   : > { %v1160_v10 = vmul.f32 %v2859_v29, %v1115_v8  ;;  %v1005_v39 = vmul.f32 %v2847_v6, %v987_v46 }
 0x2b6   : > { %v1173_v53 = vadd.f32 %v1160_v10, %v1009_v45  ;;  %v1018_v61 = vadd.f32 %v1005_v39, %v867_v59 }
 0x2b8   : > { %v3065_v33 = vpop.permute.xlu0 %1068  ;;  %v1197_v50 = vpop.permute.xlu1 %1196 }
 0x2b9   : > { %v1242_v52 = vmul.f32 %v2880_v47, %v1197_v50  ;;  %v1087_v43 = vmul.f32 %v2870_v22, %v3065_v33 }
 0x2bb   : > { %v1255_v15 = vadd.f32 %v1242_v52, %v1091_v25 }
 0x2bd   : > { %v1151_v57 = vpop.permute.xlu0 %1150  ;;  %v1279_v63 = vpop.permute.xlu1 %1278 }
 0x2be   : > { %v1324_v32 = vmul.f32 %v2877_v42, %v1279_v63  ;;  %v1169_v24 = vmul.f32 %v2859_v29, %v1151_v57 }
 0x2c0   : > { %v1337_v2 = vadd.f32 %v1324_v32, %v1173_v53  ;;  %v1182_v55 = vadd.f32 %v1169_v24, %v1018_v61  ;;  %v936_v32 = vmul.f32 %v2867_v44, %v3063_v40 }
 0x2c2   : > { %v1233_v4 = vpop.permute.xlu0 %1232  ;;  %v1432_v38 = vadd.f32 %v1337_v2, %v2646_v16  ;;  %v1361_v18 = vpop.permute.xlu1 %1360 }
 0x2c3   : > { %v1406_v34 = vmul.f32 %v2888_v30, %v1361_v18 }
 0x2c4   : > { %1445 = vst [vmem:[%s2621_s30 + $0x48] sm:$0xff] %v1432_v38  ;;  %v1251_v38 = vmul.f32 %v2880_v47, %v1233_v4 }
 0x2c5   : > { %v1419_v49 = vadd.f32 %v1406_v34, %v1255_v15 }
 0x2c7   : > { %v1315_v62 = vpop.permute.xlu0 %1314  ;;  %v1471_v3 = vadd.f32 %v1419_v49, %v2643_v14  ;;  %v844_v12 = vpop.permute.xlu1 %843 }
 0x2c8   : > { %v1333_v17 = vmul.f32 %v2877_v42, %v1315_v62 }
 0x2c9   : > { %1484 = vst [vmem:[%s2621_s30 + $0x58] sm:$0xff] %v1471_v3 }
 0x2ca   : > { %v1346_v48 = vadd.f32 %v1333_v17, %v1182_v55 }
 0x2cc   : > { %v1441_v26 = vadd.f32 %v1346_v48, %v2714_v31  ;;  %v819_v60 = vpop.permute.xlu0 %818  ;;  %v3084_v16 = vpop.permute.xlu1 %913  ;;  %v866_v31 = vmul.f32 %v2853_v13, %v844_v12 }
 0x2cd   : > { %v861_v19 = vmul.f32 %v2853_v13, %v819_v60 }
 0x2ce   : > { %1454 = vst [vmem:[%s2621_s30 + $0x120] sm:$0xff] %v1441_v26 }
 0x2d1   : > { %v894_v9 = vpop.permute.xlu0 %893  ;;  %v983_v41 = vpop.permute.xlu1 %982 }
 0x2d2   : > { %v1004_v14 = vmul.f32 %v2847_v6, %v983_v41  ;;  %v930_v10 = vmul.f32 %v2867_v44, %v894_v9 }
 0x2d4   : > { %v1017_v11 = vadd.f32 %v1004_v14, %v866_v31  ;;  %v935_v31 = vmul.f32 %v2867_v44, %v3084_v16 }
 0x2d6   : > { %v963_v28 = vpop.permute.xlu0 %962  ;;  %v3087_v51 = vpop.permute.xlu1 %1064 }
 0x2d7   : > { %v999_v36 = vmul.f32 %v2847_v6, %v963_v28 }
 0x2d9   : > { %v1012_v58 = vadd.f32 %v999_v36, %v861_v19 }
 0x2db   : > { %v1045_v1 = vpop.permute.xlu0 %1044  ;;  %v1147_v56 = vpop.permute.xlu1 %1146 }
 0x2dc   : > { %v1168_v5 = vmul.f32 %v2859_v29, %v1147_v56  ;;  %v1081_v45 = vmul.f32 %v2870_v22, %v1045_v1 }
 0x2de   : > { %v1181_v50 = vadd.f32 %v1168_v5, %v1017_v11  ;;  %v1094_v52 = vadd.f32 %v1081_v45, %v930_v10 }
 0x2e0   : > { %v1127_v54 = vpop.permute.xlu0 %1126  ;;  %v1229_v7 = vpop.permute.xlu1 %1228 }
 0x2e1   : > { %v1163_v46 = vmul.f32 %v2859_v29, %v1127_v54 }
 0x2e3   : > { %v1176_v57 = vadd.f32 %v1163_v46, %v1012_v58 }
 0x2e5   : > { %v1209_v8 = vpop.permute.xlu0 %1208  ;;  %v1311_v23 = vpop.permute.xlu1 %1310 }
 0x2e6   : > { %v1332_v0 = vmul.f32 %v2877_v42, %v1311_v23  ;;  %v1245_v2 = vmul.f32 %v2880_v47, %v1209_v8  ;;  %v3234_v8 = vld [vmem:[#allocation11_spill] sm:$0xff] }
 0x2e8   : > { %v1345_v21 = vadd.f32 %v1332_v0, %v1181_v50  ;;  %v1258_v18 = vadd.f32 %v1245_v2, %v1094_v52 }
 0x2ea   : > { %v1291_v59 = vpop.permute.xlu0 %1290  ;;  %v1440_v39 = vadd.f32 %v1345_v21, %v2706_v20  ;;  %v814_v63 = vpop.permute.xlu1 %813  ;;  %v1100_v20 = vadd.f32 %v1087_v43, %v936_v32 }
 0x2eb   : > { %v1327_v53 = vmul.f32 %v2877_v42, %v1291_v59  ;;  %v860_v60 = vmul.f32 %v2853_v13, %v814_v63 }
 0x2ec   : > { %1453 = vst [vmem:[%s2621_s30 + $0x108] sm:$0xff] %v1440_v39  ;;  %v1264_v55 = vadd.f32 %v1251_v38, %v1100_v20 }
 0x2ed   : > { %v1340_v25 = vadd.f32 %v1327_v53, %v1176_v57 }
 0x2ef   : > { %v1435_v61 = vadd.f32 %v1340_v25, %v2670_v37  ;;  %v1373_v24 = vpop.permute.xlu0 %1372  ;;  %v890_v15 = vpop.permute.xlu1 %889 }
 0x2f0   : > { %v1409_v40 = vmul.f32 %v2888_v30, %v1373_v24 }
 0x2f1   : > { %1448 = vst [vmem:[%s2621_s30 + $0x90] sm:$0xff] %v1435_v61 }
 0x2f2   : > { %v1422_v34 = vadd.f32 %v1409_v40, %v1258_v18 }
 0x2f3   : > { %v1397_v33 = vpop.permute.xlu0 %1396 }
 0x2f4   : > { %v1474_v49 = vadd.f32 %v1422_v34, %v2667_v35  ;;  %v1415_v62 = vmul.f32 %v2888_v30, %v1397_v33  ;;  %v959_v3 = vpop.permute.xlu1 %958 }
 0x2f5   : > { %v998_v48 = vmul.f32 %v2847_v6, %v959_v3  ;;  %v1086_v6 = vmul.f32 %v2870_v22, %v3087_v51 }
 0x2f6   : > { %1487 = vst [vmem:[%s2621_s30 + $0xa0] sm:$0xff] %v1474_v49  ;;  %v1428_v37 = vadd.f32 %v1415_v62, %v1264_v55 }
 0x2f7   : > { %v1011_v41 = vadd.f32 %v998_v48, %v860_v60  ;;  %v1099_v58 = vadd.f32 %v1086_v6, %v935_v31 }
 0x2f8   : > { %v1480_v12 = vadd.f32 %v1428_v37, %v2711_v27  ;;  %v929_v27 = vmul.f32 %v2867_v44, %v890_v15 }
 0x2f9   : > { %v1041_v17 = vpop.permute.xlu1 %1040 }
 0x2fa   : > { %1493 = vst [vmem:[%s2621_s30 + $0x130] sm:$0xff] %v1480_v12  ;;  %v1080_v35 = vmul.f32 %v2870_v22, %v1041_v17 }
 0x2fc   : > { %v1093_v13 = vadd.f32 %v1080_v35, %v929_v27 }
 0x2fe   : > { %v1123_v4 = vpop.permute.xlu1 %1122 }
 0x2ff   : > { %v1162_v9 = vmul.f32 %v2859_v29, %v1123_v4  ;;  %v3233_v29 = vld [vmem:[#allocation12_spill] sm:$0xff] }
 0x301   : > { %v1175_v1 = vadd.f32 %v1162_v9, %v1011_v41 }
 0x303   : > { %v1205_v26 = vpop.permute.xlu1 %1204 }
 0x304   : > { %v1244_v54 = vmul.f32 %v2880_v47, %v1205_v26 }
 0x306   : > { %v1257_v5 = vadd.f32 %v1244_v54, %v1093_v13 }
 0x308   : > { %v1287_v28 = vpop.permute.xlu1 %1286 }
 0x309   : > { %v1326_v56 = vmul.f32 %v2877_v42, %v1287_v28  ;;  %v1250_v42 = vmul.f32 %v2880_v47, %v1229_v7  ;;  %v3235_v47 = vld [vmem:[#allocation13_spill] sm:$0xff] }
 0x30b   : > { %v1339_v14 = vadd.f32 %v1326_v56, %v1175_v1  ;;  %v1263_v51 = vadd.f32 %v1250_v42, %v1099_v58 }
 0x30d   : > { %v1434_v19 = vadd.f32 %v1339_v14, %v3233_v29  ;;  %v1369_v36 = vpop.permute.xlu1 %1368 }
 0x30e   : > { %v1408_v11 = vmul.f32 %v2888_v30, %v1369_v36 }
 0x30f   : > { %1447 = vst [vmem:[%s2621_s30 + $0x78] sm:$0xff] %v1434_v19 }
 0x310   : > { %v1421_v46 = vadd.f32 %v1408_v11, %v1257_v5 }
 0x311   : > { %v1393_v22 = vpop.permute.xlu1 %1392 }
 0x312   : > { %v1473_v23 = vadd.f32 %v1421_v46, %v3234_v8  ;;  %v1414_v50 = vmul.f32 %v2888_v30, %v1393_v22 }
 0x314   : > { %1486 = vst [vmem:[%s2621_s30 + $0x88] sm:$0xff] %v1473_v23  ;;  %v1427_v44 = vadd.f32 %v1414_v50, %v1263_v51 }
 0x316   : > { %v1479_v16 = vadd.f32 %v1427_v44, %v3235_v47 }
 0x318   : > { %1492 = vst [vmem:[%s2621_s30 + $0x118] sm:$0xff] %v1479_v16 }
 0x319   : > { %2150 = shalt.err (!%p2147_p7)
}
 0x31a   : > { %s2151_s30 = scalar_lea.hbm %s3138_s11, 4992  ;;  %s2155_s8 = scalar_lea.hbm %s3191_s6, 19968 }
 0x31b   : > { %p2152_p9 = scmp.ne.s32.totalorder %s3138_s11, %s2151_s30  ;;  %p2156_p5 = scmp.lt.u32.totalorder %s3138_s11, %s3191_s6 }
 0x31c   : > { %p2157_p10 = scmp.lt.u32.totalorder %s2155_s8, %s2151_s30  ;;  %p2159_p1 = scmp.lt.u32.totalorder %s2151_s30, %s3138_s11 }
 0x31d   : > { %p2153_p11 = pnand %p2152_p9, %p2347_p12 }
 0x31e   : > { %p2158_p2 = por %p2157_p10, %p2156_p5 }
 0x31f   : > { %p2154_p0 = pneg %p2153_p11 }
 0x320   : > { %p2160_p4 = por %p2159_p1, %p2158_p2 }
 0x322   : > { %p2161_p6 = pnand %p2160_p4, %p2154_p0 }
 0x324   : > { %2164 = shalt.err (!%p2161_p6)
}
 0x325   : > { %s2227_s19 = smov 384   ;;  %s2228_s7 = smov 24  }
 0x326   : > { %1909 = dma.vmem_to_hbm [thread:$0]  (%p2347_p12), %s3140_s29, 4992, %s3138_s11, %s1495_s25, %s2227_s19, %s2227_s19, %s2228_s7  }
 0x327 PF: > { %p1927_p8 = scmp.ge.s32.totalorder %s2207_s24, 2  ;;  %s1524_s20 = sand.u32 1, %s2195_s21  }
 0x328   : > { %p3236_p13 = scmp.ne.s32.totalorder %s3212_s28, 0  ;;  %s1525_s15 = scalar_lea.sflag [#allocation4], %s1524_s20 }
 0x32a   : > { %p1920_p3 = pnand %p1927_p8, %p3236_p13 }
 0x32c   : > { %2190 = dma.done.wait (!%p1920_p3), %s1525_s15, 4992  }
 0x32d   : > { %2192 = vsyncadd (!%p1920_p3), %s1525_s15, 4294962304  ;;  %p20_p7 = scmp.ge.s32.totalorder %s2317_s9, 6   ;;  %s3237_s21 = smov %s2199_s22 }
 0x32e   : > { %s3238_s22 = smov %s2203_s23  ;;  %s3239_s23 = smov %s2343_s13 }
 0x32f   : > { %s3240_s24 = smov %s2317_s9  ;;  %22 = sbr.rel (!%p20_p7) target bundleno = 6 (0x6), region = 93 }
 0x336   :  { %1530 = vsyncpa [#allocation3], 1 }
 0x337   :  { %1532 = vsyncpa [#allocation3 + $0x1], 1 }
 0x338   :  { %1533 = vsyncpa [#allocation6], 1 }
 0x339   :  { %1534 = vsyncpa [#allocation4], 1 }
 0x33a   :  { %1536 = vsyncpa [#allocation4 + $0x1], 1 }

// kernel: tpu_custom_call.1
= control target key start
LH: loop header
LB: loop body
LE: loop exit
PB: predicated region body
PF: predicated region fallthrough
CT: control target
= control target key end

     0   :  { %11 = vsyncpa [#allocation3], 0  ;;  %s3185_s0 = inlined_call_operand.hbm [shape: f32[416,128], index: 0, kind: input, shape index: {}]   ;;  %s3186_s1 = inlined_call_operand.hbm [shape: f32[128,384], index: 1, kind: input, shape index: {}]   ;;  %s3187_s2 = inlined_call_operand.vmem [shape: f32[1,384], index: 2, kind: input, shape index: {}]   ;;  %s3188_s3 = inlined_call_operand.vmem [shape: f32[128,8], index: 3, kind: input, shape index: {}]   ;;  %s3189_s4 = inlined_call_operand.vmem [shape: f32[4,128], index: 4, kind: input, shape index: {}]   ;;  %s3190_s5 = inlined_call_operand.vmem [shape: f32[4,128], index: 5, kind: input, shape index: {}]   ;;  %s3191_s6 = inlined_call_operand.hbm [shape: f32[416,384], index: 6, kind: output, shape index: {}]  }
   0x1   :  { %13 = vsyncpa [#allocation3 + $0x1], 0 }
   0x2   :  { %14 = vsyncpa [#allocation6], 0 }
   0x3   :  { %15 = vsyncpa [#allocation4], 0 }
   0x4   :  { %17 = vsyncpa [#allocation4 + $0x1], 0  ;;  %s2264_s21 = smov 0   ;;  %s2266_s22 = smov 0  }
   0x5   :  { %s2268_s23 = smov 0   ;;  %s2270_s24 = smov 0  }
   0x6 LB: > { %s2285_s25 = sadd.s32 4294967295, %s2207_s24   ;;  %s1592_s26 = sadd.s32 4294967294, %s2207_s24   ;;  %s2207_s24 = sphi %s2270_s24, %s3240_s24   ;;  %s2203_s23 = sphi %s2268_s23, %s3239_s23   ;;  %s2199_s22 = sphi %s2266_s22, %s3238_s22   ;;  %s2195_s21 = sphi %s2264_s21, %s3237_s21  }
   0x7   : > { %p43_p0 = scmp.ne.s32.totalorder %s2199_s22, %s2195_s21  ;;  %p3192_p1 = scmp.eq.s32.totalorder %s2285_s25, 0 }
   0x8   : > { %p178_p3 = scmp.eq.s32.totalorder %s1592_s26, 3  ;;  %p1593_p5 = scmp.ge.s32.totalorder %s2207_s24, 1 }
   0x9   : > { %p2294_p4 = por %p3192_p1, %p43_p0  ;;  %p185_p7 = scmp.lt.s32.totalorder %s2207_s24, 5 }
   0xa   : > { %p2299_p6 = por %p178_p3, %p43_p0  ;;  %s2209_s30 = smov [#allocation5]  }
   0xb   : > { %s3211_s27 = scalar_select %p2294_p4, 1, 0 }
   0xc   : > { %s3212_s28 = scalar_select %p2299_p6, 1, 0 }
   0xd   : > { %p2304_p8 = pnand %p1593_p5, %p185_p7  ;;  %s197_s7 = sshll.u32 %s2209_s30, 4  ;;  %s198_s7 = int_to_ptr.vmem [resolvable:$true] %s197_s7 }
   0xe   : > { %s2317_s9 = sadd.s32 1, %s2207_s24   ;;  %s30_s10 = sadd.s32 1, %s2203_s23 }
   0xf   : > { %s3213_s29 = scalar_select %p2304_p8, 1, 0 }
  0x10   : > { %p1911_p9 = pneg %p2304_p8  ;;  %s27_s11 = ssub.s32 %s2207_s24, %s2317_s9 }
  0x11   : > { %s2079_s14 = scalar_lea.hbm %s3186_s1, 6144 }
  0x12   : > { %p2312_p10 = pnand %p1911_p9, %p3192_p1  ;;  %p2080_p11 = scmp.ne.s32.totalorder %s3186_s1, %s2079_s14 }
  0x13   : > { %p2086_p3 = scmp.lt.u32.totalorder %s2079_s14, %s3186_s1 }
  0x14   : > { %p2081_p12 = pneg %p2312_p10 }
  0x16   : > { %p2082_p13 = pnand %p2081_p12, %p2080_p11 }
  0x18   : > { %p2083_p0 = pneg %p2082_p13 }
  0x1a   : > { %p2088_p5 = pnand %p2086_p3, %p2083_p0 }
  0x1c   : > { %2091 = shalt.err (!%p2088_p5)
}
  0x1d   : > { %s2092_s19 = scalar_lea.vmem %s198_s7, 6144  ;;  %p2100_p2 = scmp.lt.s32.totalorder %s198_s7, %s198_s7 }
  0x1e   : > { %p2093_p7 = scmp.ne.s32.totalorder %s198_s7, %s2092_s19  ;;  %p2101_p6 = scmp.lt.s32.totalorder %s2092_s19, %s2092_s19 }
  0x20   : > { %p2095_p9 = pnand %p2093_p7, %p2081_p12  ;;  %p2102_p4 = por %p2101_p6, %p2100_p2 }
  0x22   : > { %p2096_p1 = pneg %p2095_p9 }
  0x24   : > { %p2103_p8 = pnand %p2102_p4, %p2096_p1 }
  0x26   : > { %2106 = shalt.err (!%p2103_p8)
}
  0x27   : > { %s2210_s20 = smov 384   ;;  %s2211_s26 = smov 24  }
  0x28   : > { %1914 = dma.hbm_to_vmem [thread:$0]  (!%p2312_p10), %s3186_s1, 6144, %s198_s7, [#allocation6], %s2210_s20, %s2210_s20, %s2211_s26  }
  0x29   : > { %p28_p11 = scmp.eq.s32.totalorder %s27_s11, 0  ;;  %p37_p2 = scmp.ne.s32.totalorder %s2203_s23, %s2199_s22 }
  0x2a   : > { %p38_p1 = scmp.eq.s32.totalorder %s2207_s24, 0  ;;  %p1924_p4 = scmp.lt.s32.totalorder %s2207_s24, 4 }
  0x2b   : > { %s2343_s13 = scalar_select %p28_p11, %s2203_s23, %s30_s10  }
  0x2c   : > { %p39_p6 = por %p38_p1, %p37_p2  ;;  %p3215_p8 = scmp.eq.s32.totalorder %s2285_s25, 3 }
  0x2d   : > { %s223_s15 = sand.u32 1, %s2203_s23   ;;  %s1602_s16 = smul.u32 1664, %s2207_s24 }
  0x2e   : > { %p2347_p12 = por %p3215_p8, %p37_p2  ;;  %s1899_s17 = smul.u32 104, %s223_s15 }
  0x2f   : > { %s2356_s19 = scalar_lea.hbm %s3185_s0, %s1602_s16  ;;  %p2358_p10 = pnand %p1924_p4, %p39_p6 }
  0x30   : > { %s227_s10 = scalar_lea.vmem [#allocation2], %s1899_s17  ;;  %s2364_s20 = scalar_lea.sflag [#allocation3], %s223_s15 }
  0x31   : > { %s234_s11 = sshll.u32 %s227_s10, 4  ;;  %s2107_s26 = scalar_lea.hbm %s2356_s19, 1664  ;;  %s2362_s11 = int_to_ptr.vmem [resolvable:$true] %s234_s11 }
  0x32   : > { %p2108_p13 = scmp.ne.s32.totalorder %s2356_s19, %s2107_s26  ;;  %p2109_p0 = pneg %p2358_p10 }
  0x33   : > { %s2112_s16 = scalar_lea.hbm %s3185_s0, 6656  ;;  %p2113_p7 = scmp.lt.u32.totalorder %s2356_s19, %s3185_s0 }
  0x34   : > { %p2110_p3 = pnand %p2109_p0, %p2108_p13  ;;  %p2114_p9 = scmp.lt.u32.totalorder %s2112_s16, %s2107_s26 }
  0x35   : > { %p2116_p2 = scmp.lt.u32.totalorder %s2107_s26, %s2356_s19 }
  0x36   : > { %p2111_p5 = pneg %p2110_p3  ;;  %p2115_p11 = por %p2114_p9, %p2113_p7 }
  0x38   : > { %p2117_p1 = por %p2116_p2, %p2115_p11 }
  0x3a   : > { %p2118_p4 = pnand %p2117_p1, %p2111_p5 }
  0x3c   : > { %2121 = shalt.err (!%p2118_p4)
}
  0x3d   : > { %s2122_s15 = scalar_lea.vmem %s2362_s11, 1664  ;;  %s2212_s17 = smov [#allocation2]  }
  0x3e   : > { %p2123_p6 = scmp.ne.s32.totalorder %s2362_s11, %s2122_s15  ;;  %s2127_s10 = sshll.u32 %s2212_s17, 4  ;;  %s2128_s10 = int_to_ptr.vmem [resolvable:$false] %s2127_s10 }
  0x3f   : > { %s2129_s30 = scalar_lea.vmem %s2128_s10, 3328  ;;  %p2130_p3 = scmp.lt.s32.totalorder %s2362_s11, %s2128_s10 }
  0x40   : > { %p2125_p8 = pnand %p2123_p6, %p2109_p0  ;;  %p2131_p7 = scmp.lt.s32.totalorder %s2129_s30, %s2122_s15 }
  0x42   : > { %p2126_p13 = pneg %p2125_p8  ;;  %p2132_p9 = por %p2131_p7, %p2130_p3 }
  0x44   : > { %p2133_p11 = pnand %p2132_p9, %p2126_p13 }
  0x46   : > { %2136 = shalt.err (!%p2133_p11)
}
  0x47   : > { %s2213_s26 = smov 128   ;;  %s2214_s12 = smov 8  }
  0x48   : > { %1918 = dma.hbm_to_vmem [thread:$0]  (!%p2358_p10), %s2356_s19, 1664, %s2362_s11, %s2364_s20, %s2213_s26, %s2213_s26, %s2214_s12  }
  0x49   : > { %p3218_p0 = scmp.ne.s32.totalorder %s3213_s29, 0 }
  0x4b   : > { %246 = sbr.rel (%p3218_p0) target bundleno = 807 (0x327), region = 44 }
  0x52   : > { %s2395_s16 = sand.u32 1, %s2199_s22   ;;  %p3219_p5 = scmp.ne.s32.totalorder %s3211_s27, 0 }
  0x53   : > { %s1900_s8 = smul.u32 104, %s2395_s16  ;;  %s249_s18 = scalar_lea.sflag [#allocation3], %s2395_s16 }
  0x55   : > { %s2399_s15 = scalar_lea.vmem [#allocation2], %s1900_s8 }
  0x56   : > { %2182 = dma.done.wait (%p3219_p5), %s249_s18, 1664  }
  0x57   : > { %2184 = vsyncadd (%p3219_p5), %s249_s18, 4294965632  ;;  %p3220_p10 = scmp.eq.s32.totalorder %s2285_s25, 0 }
  0x59   : > { %2186 = dma.done.wait (%p3220_p10), [#allocation6], 6144   ;;  %p3221_p2 = pmov %p3220_p10 }
  0x5a   : > { %v2215_v0 = vmov 0.0|0.0   ;;  %vm2216_vm0 = vmmov 0   ;;  %v2217_v1 = vmov 0.0   ;;  %v301_v2 = vld [vmem:[#allocation5 + $0x8] sm:$0xff]  ;;  %v304_v3 = vld [vmem:[#allocation5 + $0x20] sm:$0xff]  ;;  %v302_v4 = vld [vmem:[#allocation5 + $0x10] sm:$0xff] }
  0x5b   : > { %2188 = vsyncadd (%p3221_p2), [#allocation6], 4294961152  ;;  %1835 = vmatprep.subr.bf16.mxu1 %v2215_v0  ;;  %1693 = vmatprep.mubr.msk.f32.mxu1 %vm2216_vm0, %v2217_v1  ;;  %v1803_v5 = vpack.c.bf16 %v304_v3, %v301_v2  ;;  %v305_v6 = vld [vmem:[#allocation5 + $0x28] sm:$0xff]  ;;  %v300_v7 = vld [vmem:[#allocation5] sm:$0xff]  ;;  %s1901_s10 = smul.u32 312, %s2395_s16 }
  0x5c   : > { %429 = vmatprep.mubr.f32.mxu0 %v2217_v1  ;;  %v303_v8 = vld [vmem:[#allocation5 + $0x18] sm:$0xff]  ;;  %v1836_v9 = vpack.c.bf16 %v305_v6, %v302_v4  ;;  %v310_v12 = vld [vmem:[#allocation5 + $0x50] sm:$0xff]  ;;  %v308_v13 = vld [vmem:[#allocation5 + $0x40] sm:$0xff]  ;;  %s1926_s27 = smul.u32 4992, %s2285_s25  ;;  %s1495_s25 = scalar_lea.sflag [#allocation4], %s2395_s16 }
  0x5d   : > { %v1805_v10 = vpack.c.bf16 %v303_v8, %v300_v7  ;;  %v307_v11 = vld [vmem:[#allocation5 + $0x38] sm:$0xff]  ;;  %1804 = vmatprep.subr.bf16.mxu0 %v1803_v5  ;;  %v306_v16 = vld [vmem:[#allocation5 + $0x30] sm:$0xff]  ;;  %v309_v17 = vld [vmem:[#allocation5 + $0x48] sm:$0xff]  ;;  %s2621_s30 = scalar_lea.vmem [#allocation7], %s1901_s10 }
  0x5e   : > { %v1807_v14 = vpack.c.bf16 %v310_v12, %v307_v11  ;;  %v311_v15 = vld [vmem:[#allocation5 + $0x58] sm:$0xff]  ;;  %1837 = vmatpush3.bf16.msra.mxu1 %v1836_v9  ;;  %v1809_v19 = vpack.c.bf16 %v309_v17, %v306_v16  ;;  %v313_v20 = vld [vmem:[#allocation5 + $0x68] sm:$0xff]  ;;  %v316_v21 = vld [vmem:[#allocation5 + $0x80] sm:$0xff]  ;;  %s1509_s29 = sshll.u32 %s2621_s30, 4  ;;  %s3138_s11 = scalar_lea.hbm %s3191_s6, %s1926_s27  ;;  %s3140_s29 = int_to_ptr.vmem [resolvable:$true] %s1509_s29 }
  0x5f   : > { %1806 = vmatpush1.bf16.msra.mxu0 %v1805_v10  ;;  %v1839_v18 = vpack.c.bf16 %v311_v15, %v308_v13  ;;  %v314_v22 = vld [vmem:[#allocation5 + $0x70] sm:$0xff]  ;;  %1838 = vmatprep.subr.bf16.mxu1 %v2215_v0  ;;  %v1811_v23 = vpack.c.bf16 %v316_v21, %v313_v20  ;;  %v317_v24 = vld [vmem:[#allocation5 + $0x88] sm:$0xff]  ;;  %v312_v25 = vld [vmem:[#allocation5 + $0x60] sm:$0xff]  ;;  %s2137_s20 = scalar_lea.vmem %s3140_s29, 4992 }
  0x60   : > { %1808 = vmatprep.subr.bf16.mxu0 %v1807_v14  ;;  %v315_v26 = vld [vmem:[#allocation5 + $0x78] sm:$0xff]  ;;  %v322_v28 = vld [vmem:[#allocation5 + $0xb0] sm:$0xff]  ;;  %v1842_v29 = vpack.c.bf16 %v317_v24, %v314_v22  ;;  %v320_v31 = vld [vmem:[#allocation5 + $0xa0] sm:$0xff]  ;;  %p2138_p1 = scmp.ne.s32.totalorder %s3140_s29, %s2137_s20 }
  0x61   : > { %v319_v27 = vld [vmem:[#allocation5 + $0x98] sm:$0xff]  ;;  %v1813_v30 = vpack.c.bf16 %v315_v26, %v312_v25  ;;  %v318_v34 = vld [vmem:[#allocation5 + $0x90] sm:$0xff]  ;;  %v321_v35 = vld [vmem:[#allocation5 + $0xa8] sm:$0xff] }
  0x62   : > { %1840 = vmatpush3.bf16.msra.mxu1 %v1839_v18  ;;  %v1815_v32 = vpack.c.bf16 %v322_v28, %v319_v27  ;;  %v323_v33 = vld [vmem:[#allocation5 + $0xb8] sm:$0xff]  ;;  %v325_v36 = vld [vmem:[#allocation5 + $0xc8] sm:$0xff]  ;;  %v328_v37 = vld [vmem:[#allocation5 + $0xe0] sm:$0xff]  ;;  %v1817_v39 = vpack.c.bf16 %v321_v35, %v318_v34  ;;  %p2139_p4 = pnand %p2138_p1, %p2347_p12 }
  0x63   : > { %1810 = vmatpush1.bf16.msra.mxu0 %v1809_v19  ;;  %1841 = vmatprep.subr.bf16.mxu1 %v2215_v0  ;;  %v1845_v38 = vpack.c.bf16 %v323_v33, %v320_v31  ;;  %v326_v40 = vld [vmem:[#allocation5 + $0xd0] sm:$0xff]  ;;  %v1819_v41 = vpack.c.bf16 %v328_v37, %v325_v36  ;;  %v329_v42 = vld [vmem:[#allocation5 + $0xe8] sm:$0xff]  ;;  %v324_v43 = vld [vmem:[#allocation5 + $0xc0] sm:$0xff] }
  0x64   : > { %1812 = vmatprep.subr.bf16.mxu0 %v1811_v23  ;;  %v327_v44 = vld [vmem:[#allocation5 + $0xd8] sm:$0xff]  ;;  %v334_v46 = vld [vmem:[#allocation5 + $0x110] sm:$0xff]  ;;  %v1848_v47 = vpack.c.bf16 %v329_v42, %v326_v40  ;;  %v332_v49 = vld [vmem:[#allocation5 + $0x100] sm:$0xff]  ;;  %p2140_p6 = pneg %p2139_p4 }
  0x65   : > { %v331_v45 = vld [vmem:[#allocation5 + $0xf8] sm:$0xff]  ;;  %v1821_v48 = vpack.c.bf16 %v327_v44, %v324_v43  ;;  %v330_v52 = vld [vmem:[#allocation5 + $0xf0] sm:$0xff]  ;;  %v333_v53 = vld [vmem:[#allocation5 + $0x108] sm:$0xff] }
  0x66   : > { %1843 = vmatpush3.bf16.msra.mxu1 %v1842_v29  ;;  %v1823_v50 = vpack.c.bf16 %v334_v46, %v331_v45  ;;  %v335_v51 = vld [vmem:[#allocation5 + $0x118] sm:$0xff]  ;;  %v337_v54 = vld [vmem:[#allocation5 + $0x128] sm:$0xff]  ;;  %v340_v55 = vld [vmem:[#allocation5 + $0x140] sm:$0xff]  ;;  %v1825_v57 = vpack.c.bf16 %v333_v53, %v330_v52 }
  0x67   : > { %1814 = vmatpush1.bf16.msra.mxu0 %v1813_v30  ;;  %1844 = vmatprep.subr.bf16.mxu1 %v2215_v0  ;;  %v1851_v56 = vpack.c.bf16 %v335_v51, %v332_v49  ;;  %v338_v58 = vld [vmem:[#allocation5 + $0x130] sm:$0xff]  ;;  %v1827_v59 = vpack.c.bf16 %v340_v55, %v337_v54  ;;  %v341_v60 = vld [vmem:[#allocation5 + $0x148] sm:$0xff]  ;;  %v336_v61 = vld [vmem:[#allocation5 + $0x120] sm:$0xff]  ;;  %v350_v49 = vlaneseq }
  0x68   : > { %1816 = vmatprep.subr.bf16.mxu0 %v1815_v32  ;;  %v339_v62 = vld [vmem:[#allocation5 + $0x138] sm:$0xff]  ;;  %v346_v2 = vld [vmem:[#allocation5 + $0x170] sm:$0xff]  ;;  %v1854_v3 = vpack.c.bf16 %v341_v60, %v338_v58  ;;  %v344_v5 = vld [vmem:[#allocation5 + $0x160] sm:$0xff] }
  0x69   : > { %v343_v63 = vld [vmem:[#allocation5 + $0x158] sm:$0xff]  ;;  %v1829_v4 = vpack.c.bf16 %v339_v62, %v336_v61  ;;  %v342_v8 = vld [vmem:[#allocation5 + $0x150] sm:$0xff]  ;;  %v345_v9 = vld [vmem:[#allocation5 + $0x168] sm:$0xff] }
  0x6a   : > { %1846 = vmatpush3.bf16.msra.mxu1 %v1845_v38  ;;  %v1831_v6 = vpack.c.bf16 %v346_v2, %v343_v63  ;;  %v347_v7 = vld [vmem:[#allocation5 + $0x178] sm:$0xff]  ;;  %v1833_v11 = vpack.c.bf16 %v345_v9, %v342_v8  ;;  %v638_v12 = vld [vmem:[%s3188_s3] sm:$0xff]  ;;  %v640_v16 = vld [vmem:[%s3188_s3 + $0x10] sm:$0xff] }
  0x6b   : > { %1818 = vmatpush1.bf16.msra.mxu0 %v1817_v39  ;;  %1847 = vmatprep.subr.bf16.mxu1 %v2215_v0  ;;  %v1857_v10 = vpack.c.bf16 %v347_v7, %v344_v5  ;;  %v639_v13 = vld [vmem:[%s3188_s3 + $0x8] sm:$0xff]  ;;  %v641_v17 = vld [vmem:[%s3188_s3 + $0x18] sm:$0xff]  ;;  %v642_v20 = vld [vmem:[%s3188_s3 + $0x20] sm:$0xff] }
  0x6c   : > { %1820 = vmatprep.subr.bf16.mxu0 %v1819_v41  ;;  %v2427_v14 = vld [vmem:[%s2399_s15] sm:$0xff]  ;;  %v1860_v15 = vpack.c.bf16 %v639_v13, %v638_v12  ;;  %v2442_v18 = vld [vmem:[%s2399_s15 + $0x8] sm:$0xff]  ;;  %v1863_v19 = vpack.c.bf16 %v641_v17, %v640_v16  ;;  %v2458_v22 = vld [vmem:[%s2399_s15 + $0x10] sm:$0xff] }
  0x6d   : > { %v643_v21 = vld [vmem:[%s3188_s3 + $0x28] sm:$0xff]  ;;  %v644_v24 = vld [vmem:[%s3188_s3 + $0x30] sm:$0xff]  ;;  %v645_v25 = vld [vmem:[%s3188_s3 + $0x38] sm:$0xff] }
  0x6e   : > { %1849 = vmatpush3.bf16.msra.mxu1 %v1848_v47  ;;  %v1866_v23 = vpack.c.bf16 %v643_v21, %v642_v20  ;;  %v2474_v26 = vld [vmem:[%s2399_s15 + $0x18] sm:$0xff]  ;;  %v1869_v27 = vpack.c.bf16 %v645_v25, %v644_v24  ;;  %v647_v29 = vld [vmem:[%s3188_s3 + $0x48] sm:$0xff]  ;;  %v648_v32 = vld [vmem:[%s3188_s3 + $0x50] sm:$0xff] }
  0x6f   : > { %1822 = vmatpush1.bf16.msra.mxu0 %v1821_v48  ;;  %1850 = vmatprep.subr.bf16.mxu1 %v2215_v0  ;;  %v646_v28 = vld [vmem:[%s3188_s3 + $0x40] sm:$0xff]  ;;  %v649_v33 = vld [vmem:[%s3188_s3 + $0x58] sm:$0xff]  ;;  %v2506_v34 = vld [vmem:[%s2399_s15 + $0x28] sm:$0xff]  ;;  %v3209_v48 = vmov 0  }
  0x70   : > { %1824 = vmatprep.subr.bf16.mxu0 %v1823_v50  ;;  %v2490_v30 = vld [vmem:[%s2399_s15 + $0x20] sm:$0xff]  ;;  %v1872_v31 = vpack.c.bf16 %v647_v29, %v646_v28  ;;  %v1875_v35 = vpack.c.bf16 %v649_v33, %v648_v32  ;;  %v2522_v38 = vld [vmem:[%s2399_s15 + $0x30] sm:$0xff]  ;;  %v294_v42 = vld [vmem:[%s2399_s15 + $0x38] sm:$0xff]  ;;  %1978 = vset.pattern.permute.xlu1 %v3209_v48  ;;  %v2596_v50 = vshrl.u32 %v350_v49, 7 }
  0x71   : > { %v650_v36 = vld [vmem:[%s3188_s3 + $0x60] sm:$0xff]  ;;  %v651_v37 = vld [vmem:[%s3188_s3 + $0x68] sm:$0xff]  ;;  %v652_v40 = vld [vmem:[%s3188_s3 + $0x70] sm:$0xff]  ;;  %1986 = vset.pattern.permute.xlu0 %v3209_v48 }
  0x72   : > { %1852 = vmatpush3.bf16.msra.mxu1 %v1851_v56  ;;  %v1878_v39 = vpack.c.bf16 %v651_v37, %v650_v36  ;;  %v653_v41 = vld [vmem:[%s3188_s3 + $0x78] sm:$0xff]  ;;  %v295_v44 = vld [vmem:[%s2399_s15 + $0x40] sm:$0xff]  ;;  %v296_v45 = vld [vmem:[%s2399_s15 + $0x48] sm:$0xff]  ;;  %v2599_v51 = vsub.s32 1, %v2596_v50  ;;  %v2614_v58 = vsub.s32 2, %v2596_v50 }
  0x73   : > { %1826 = vmatpush1.bf16.msra.mxu0 %v1825_v57  ;;  %1853 = vmatprep.subr.bf16.mxu1 %v2215_v0  ;;  %v1881_v43 = vpack.c.bf16 %v653_v41, %v652_v40  ;;  %v297_v46 = vld [vmem:[%s2399_s15 + $0x50] sm:$0xff]  ;;  %v299_v47 = vld [vmem:[%s2399_s15 + $0x60] sm:$0xff] }
  0x74   : > { %1828 = vmatprep.subr.bf16.mxu0 %v1827_v59  ;;  %v348_v52 = vld [vmem:[%s3187_s2] sm:$0x7]  ;;  %v2617_v59 = vsub.s32 0, %v2596_v50 }
  0x76   : > { %1855 = vmatpush3.bf16.msra.mxu1 %v1854_v3  ;;  %v2628_v3 = vrot.slane %v348_v52, %v2614_v58 }
  0x77   : > { %1830 = vmatpush1.bf16.msra.mxu0 %v1829_v4  ;;  %1856 = vmatprep.subr.bf16.mxu1 %v2215_v0  ;;  %v2631_v4 = vrot.slane %v348_v52, %v2617_v59 }
  0x78   : > { %1832 = vmatprep.subr.bf16.mxu0 %v1831_v6 }
  0x7a   : > { %1858 = vmatpush3.bf16.msra.mxu1 %v1857_v10 }
  0x7b   : > { %1834 = vmatpush1.bf16.msra.mxu0 %v1833_v11  ;;  %1883 = vmatprep.subr.bf16.mxu1 %v2215_v0 }
  0x7c   : > { %1859 = vmatprep.subr.bf16.mxu0 %v2215_v0 }
  0x7d   : > { %1694 = vmatmul.mubr.f32.vlgmr.msra.gmra.mrb[0].mxu1 %v2427_v14 }
  0x7e   : > { %430 = vmatmul.mubr.f32.vlgmr.msra.gmra.mrb[0].mxu0 %v2427_v14  ;;  %1891 = vmatpush3.bf16.msra.mxu1 %v1860_v15 }
  0x7f   : > { %1696 = vmatprep.mubr.msk.f32.mxu1 %vm2216_vm0, %v2217_v1  ;;  %435 = vmatprep.mubr.f32.mxu0 %v2217_v1 }
  0x80   : > { %1884 = vmatprep.subr.bf16.mxu1 %v2215_v0  ;;  %1861 = vmatpush3.bf16.msra.mxu0 %v1860_v15 }
  0x81   : > { %1697 = vmatmul.mubr.f32.gmra.mrb[2].mxu1 %v2442_v18  ;;  %1862 = vmatprep.subr.bf16.mxu0 %v2215_v0 }
  0x82   : > { %436 = vmatmul.mubr.f32.gmra.mrb[2].mxu0 %v2442_v18  ;;  %1699 = vmatprep.mubr.msk.f32.mxu1 %vm2216_vm0, %v2217_v1 }
  0x83   : > { %441 = vmatprep.mubr.f32.mxu0 %v2217_v1  ;;  %1892 = vmatpush3.bf16.msra.mxu1 %v1863_v19 }
  0x84   : > { %1885 = vmatprep.subr.bf16.mxu1 %v2215_v0  ;;  %1864 = vmatpush3.bf16.msra.mxu0 %v1863_v19 }
  0x85   : > { %1700 = vmatmul.mubr.f32.gmra.mrb[4].mxu1 %v2458_v22  ;;  %1865 = vmatprep.subr.bf16.mxu0 %v2215_v0 }
  0x86   : > { %442 = vmatmul.mubr.f32.gmra.mrb[4].mxu0 %v2458_v22  ;;  %1702 = vmatprep.mubr.msk.f32.mxu1 %vm2216_vm0, %v2217_v1 }
  0x87   : > { %447 = vmatprep.mubr.f32.mxu0 %v2217_v1  ;;  %1893 = vmatpush3.bf16.msra.mxu1 %v1866_v23 }
  0x88   : > { %1886 = vmatprep.subr.bf16.mxu1 %v2215_v0  ;;  %1867 = vmatpush3.bf16.msra.mxu0 %v1866_v23 }
  0x89   : > { %1703 = vmatmul.mubr.f32.gmra.mrb[6].mxu1 %v2474_v26  ;;  %1868 = vmatprep.subr.bf16.mxu0 %v2215_v0 }
  0x8a   : > { %448 = vmatmul.mubr.f32.gmra.mrb[6].mxu0 %v2474_v26  ;;  %1705 = vmatprep.mubr.msk.f32.mxu1 %vm2216_vm0, %v2217_v1 }
  0x8b   : > { %453 = vmatprep.mubr.f32.mxu0 %v2217_v1  ;;  %1894 = vmatpush3.bf16.msra.mxu1 %v1869_v27 }
  0x8c   : > { %1887 = vmatprep.subr.bf16.mxu1 %v2215_v0  ;;  %1870 = vmatpush3.bf16.msra.mxu0 %v1869_v27 }
  0x8d   : > { %1706 = vmatmul.mubr.f32.gmra.mrb[8].mxu1 %v2490_v30  ;;  %1871 = vmatprep.subr.bf16.mxu0 %v2215_v0 }
  0x8e   : > { %454 = vmatmul.mubr.f32.gmra.mrb[8].mxu0 %v2490_v30  ;;  %1708 = vmatprep.mubr.msk.f32.mxu1 %vm2216_vm0, %v2217_v1 }
  0x8f   : > { %459 = vmatprep.mubr.f32.mxu0 %v2217_v1  ;;  %1895 = vmatpush3.bf16.msra.mxu1 %v1872_v31 }
  0x90   : > { %1888 = vmatprep.subr.bf16.mxu1 %v2215_v0  ;;  %1873 = vmatpush3.bf16.msra.mxu0 %v1872_v31 }
  0x91   : > { %1709 = vmatmul.mubr.f32.gmra.mrb[10].mxu1 %v2506_v34  ;;  %1874 = vmatprep.subr.bf16.mxu0 %v2215_v0 }
  0x92   : > { %460 = vmatmul.mubr.f32.gmra.mrb[10].mxu0 %v2506_v34  ;;  %1711 = vmatprep.mubr.msk.f32.mxu1 %vm2216_vm0, %v2217_v1 }
  0x93   : > { %465 = vmatprep.mubr.f32.mxu0 %v2217_v1  ;;  %1896 = vmatpush3.bf16.msra.mxu1 %v1875_v35 }
  0x94   : > { %1889 = vmatprep.subr.bf16.mxu1 %v2215_v0  ;;  %1876 = vmatpush3.bf16.msra.mxu0 %v1875_v35 }
  0x95   : > { %1712 = vmatmul.mubr.f32.gmra.mrb[12].mxu1 %v2522_v38  ;;  %1877 = vmatprep.subr.bf16.mxu0 %v2215_v0 }
  0x96   : > { %466 = vmatmul.mubr.f32.gmra.mrb[12].mxu0 %v2522_v38  ;;  %1714 = vmatprep.mubr.msk.f32.mxu1 %vm2216_vm0, %v2217_v1 }
  0x97   : > { %471 = vmatprep.mubr.f32.mxu0 %v2217_v1  ;;  %1897 = vmatpush3.bf16.msra.mxu1 %v1878_v39 }
  0x98   : > { %1879 = vmatpush3.bf16.msra.mxu0 %v1878_v39  ;;  %1890 = vmatprep.subr.bf16.mxu1 %v2215_v0 }
  0x99   : > { %1715 = vmatmul.mubr.f32.gmra.mrb[14].mxu1 %v294_v42  ;;  %1880 = vmatprep.subr.bf16.mxu0 %v2215_v0  ;;  %v298_v0 = vld [vmem:[%s2399_s15 + $0x58] sm:$0xff]  ;;  %s2226_s15 = smov [#allocation7]  }
  0x9a   : > { %472 = vmatmul.mubr.f32.gmra.mrb[14].mxu0 %v294_v42  ;;  %1717 = vmatprep.mubr.msk.f32.mxu1 %vm2216_vm0, %v2217_v1  ;;  %s2141_s17 = sshll.u32 %s2226_s15, 4  ;;  %s2142_s17 = int_to_ptr.vmem [resolvable:$false] %s2141_s17 }
  0x9b   : > { %477 = vmatprep.mubr.f32.mxu0 %v2217_v1  ;;  %1898 = vmatpush3.bf16.msra.mxu1 %v1881_v43  ;;  %s2143_s10 = scalar_lea.vmem %s2142_s17, 9984  ;;  %p2144_p8 = scmp.lt.s32.totalorder %s3140_s29, %s2142_s17 }
  0x9c   : > { %1882 = vmatpush3.bf16.msra.mxu0 %v1881_v43  ;;  %p2145_p13 = scmp.lt.s32.totalorder %s2143_s10, %s2137_s20 }
  0x9d   : > { %1718 = vmatmul.mubr.f32.gmra.mrb[16].mxu1 %v295_v44 }
  0x9e   : > { %478 = vmatmul.mubr.f32.gmra.mrb[16].mxu0 %v295_v44  ;;  %1720 = vmatprep.mubr.msk.f32.mxu1 %vm2216_vm0, %v2217_v1  ;;  %p2146_p3 = por %p2145_p13, %p2144_p8 }
  0x9f   : > { %483 = vmatprep.mubr.f32.mxu0 %v2217_v1 }
  0xa0   : > { %p2147_p7 = pnand %p2146_p3, %p2140_p6 }
  0xa1   : > { %1721 = vmatmul.mubr.f32.gmra.mrb[18].mxu1 %v296_v45 }
  0xa2   : > { %484 = vmatmul.mubr.f32.gmra.mrb[18].mxu0 %v296_v45  ;;  %1723 = vmatprep.mubr.msk.f32.mxu1 %vm2216_vm0, %v2217_v1 }
  0xa3   : > { %489 = vmatprep.mubr.f32.mxu0 %v2217_v1 }
  0xa5   : > { %1724 = vmatmul.mubr.f32.gmra.mrb[20].mxu1 %v297_v46 }
  0xa6   : > { %490 = vmatmul.mubr.f32.gmra.mrb[20].mxu0 %v297_v46  ;;  %1726 = vmatprep.mubr.msk.f32.mxu1 %vm2216_vm0, %v2217_v1 }
  0xa7   : > { %495 = vmatprep.mubr.f32.mxu0 %v2217_v1 }
  0xa9   : > { %1727 = vmatmul.mubr.f32.gmra.mrb[22].mxu1 %v298_v0 }
  0xaa   : > { %496 = vmatmul.mubr.f32.gmra.mrb[22].mxu0 %v298_v0  ;;  %1729 = vmatprep.mubr.msk.f32.mxu1 %vm2216_vm0, %v2217_v1 }
  0xab   : > { %501 = vmatprep.mubr.f32.mxu0 %v2217_v1 }
  0xad   : > { %1730 = vmatmul.mubr.f32.gmra.mrb[24].mxu1 %v299_v47 }
  0xae   : > { %502 = vmatmul.mubr.f32.gmra.mrb[24].mxu0 %v299_v47  ;;  %1785 = vmatprep.mubr.msk.f32.mxu1 %vm2216_vm0, %v2217_v1 }
  0xaf   : > { %1764 = vmatprep.mubr.msk.f32.mxu0 %vm2216_vm0, %v2217_v1 }
  0xb1   : > { %1786 = vmatmul.mubr.f32.vlgmr.msra.gmra.mrb[26].mxu1 %v294_v42 }
  0xb2   : > { %1765 = vmatmul.mubr.f32.vlgmr.msra.gmra.mrb[26].mxu0 %v2427_v14  ;;  %1788 = vmatprep.mubr.msk.f32.mxu1 %vm2216_vm0, %v2217_v1 }
  0xb3   : > { %1767 = vmatprep.mubr.msk.f32.mxu0 %vm2216_vm0, %v2217_v1 }
  0xb5   : > { %1789 = vmatmul.mubr.f32.gmra.mrb[28].mxu1 %v295_v44 }
  0xb6   : > { %1768 = vmatmul.mubr.f32.gmra.mrb[28].mxu0 %v2442_v18  ;;  %1791 = vmatprep.mubr.msk.f32.mxu1 %vm2216_vm0, %v2217_v1 }
  0xb7   : > { %1770 = vmatprep.mubr.msk.f32.mxu0 %vm2216_vm0, %v2217_v1 }
  0xb9   : > { %1792 = vmatmul.mubr.f32.gmra.mrb[30].mxu1 %v296_v45 }
  0xba   : > { %1771 = vmatmul.mubr.f32.gmra.mrb[30].mxu0 %v2458_v22  ;;  %1794 = vmatprep.mubr.msk.f32.mxu1 %vm2216_vm0, %v2217_v1 }
  0xbb   : > { %1773 = vmatprep.mubr.msk.f32.mxu0 %vm2216_vm0, %v2217_v1 }
  0xbd   : > { %1795 = vmatmul.mubr.f32.gmra.mrb[32].mxu1 %v297_v46 }
  0xbe   : > { %1774 = vmatmul.mubr.f32.gmra.mrb[32].mxu0 %v2474_v26  ;;  %1797 = vmatprep.mubr.msk.f32.mxu1 %vm2216_vm0, %v2217_v1 }
  0xbf   : > { %1776 = vmatprep.mubr.msk.f32.mxu0 %vm2216_vm0, %v2217_v1 }
  0xc1   : > { %1798 = vmatmul.mubr.f32.gmra.mrb[34].mxu1 %v298_v0 }
  0xc2   : > { %1777 = vmatmul.mubr.f32.gmra.mrb[34].mxu0 %v2490_v30  ;;  %1800 = vmatprep.mubr.msk.f32.mxu1 %vm2216_vm0, %v2217_v1 }
  0xc3   : > { %1779 = vmatprep.mubr.msk.f32.mxu0 %vm2216_vm0, %v2217_v1 }
  0xc5   : > { %1801 = vmatmul.mubr.f32.gmra.mrb[36].mxu1 %v299_v47 }
  0xc6   : > { %1780 = vmatmul.mubr.f32.gmra.mrb[36].mxu0 %v2506_v34 }
  0xc7   : > { %1782 = vmatprep.mubr.msk.f32.mxu0 %vm2216_vm0, %v2217_v1  ;;  %v2606_v1 = vrot.slane %v348_v52, %v2599_v51 }
  0xca   : > { %1783 = vmatmul.mubr.f32.gmra.mrb[38].mxu0 %v2522_v38 }
 0x150   : > { %v2608_v53 = vpop.f32.mrb[0].mxu1 }
 0x151   : > { %v2610_v54 = vpop.f32.mrb[0].mxu0  ;;  %v1695_v55 = vpop.f32.mrb[1].mxu1 }
 0x152   : > { %v433_v56 = vpop.f32.mrb[1].mxu0 }
 0x153   : > { %v434_v57 = vadd.f32 %v433_v56, %v2606_v1 }
 0x154   : > { %v2619_v60 = vpop.f32.mrb[2].mxu1 }
 0x155   : > { %1455 = vst [vmem:[%s2621_s30 + $0x8] sm:$0xff] %v434_v57  ;;  %v2624_v61 = vpop.f32.mrb[2].mxu0  ;;  %v1698_v62 = vpop.f32.mrb[3].mxu1 }
 0x156   : > { %v439_v63 = vpop.f32.mrb[3].mxu0 }
 0x157   : > { %v440_v2 = vadd.f32 %v439_v63, %v2606_v1 }
 0x158   : > { %v584_v5 = vpop.f32.mrb[4].mxu1 }
 0x159   : > { %1456 = vst [vmem:[%s2621_s30 + $0x20] sm:$0xff] %v440_v2  ;;  %v443_v6 = vpop.f32.mrb[4].mxu0  ;;  %v2635_v7 = vadd.f32 %v584_v5, %v2628_v3  ;;  %v1701_v8 = vpop.f32.mrb[5].mxu1 }
 0x15a   : > { %v2638_v9 = vadd.f32 %v443_v6, %v2631_v4  ;;  %v445_v10 = vpop.f32.mrb[5].mxu0 }
 0x15b   : > { %v446_v11 = vadd.f32 %v445_v10, %v2606_v1 }
 0x15c   : > { %v589_v12 = vpop.f32.mrb[6].mxu1 }
 0x15d   : > { %1457 = vst [vmem:[%s2621_s30 + $0x38] sm:$0xff] %v446_v11  ;;  %v449_v13 = vpop.f32.mrb[6].mxu0  ;;  %v2643_v14 = vadd.f32 %v589_v12, %v2628_v3  ;;  %v1704_v15 = vpop.f32.mrb[7].mxu1 }
 0x15e   : > { %v2646_v16 = vadd.f32 %v449_v13, %v2631_v4  ;;  %v451_v17 = vpop.f32.mrb[7].mxu0 }
 0x15f   : > { %v452_v18 = vadd.f32 %v451_v17, %v2606_v1 }
 0x160   : > { %v594_v19 = vpop.f32.mrb[8].mxu1 }
 0x161   : > { %1458 = vst [vmem:[%s2621_s30 + $0x50] sm:$0xff] %v452_v18  ;;  %v455_v20 = vpop.f32.mrb[8].mxu0  ;;  %v2651_v21 = vadd.f32 %v594_v19, %v2628_v3  ;;  %v1707_v22 = vpop.f32.mrb[9].mxu1 }
 0x162   : > { %v2654_v23 = vadd.f32 %v455_v20, %v2631_v4  ;;  %v457_v24 = vpop.f32.mrb[9].mxu0 }
 0x163   : > { %v458_v25 = vadd.f32 %v457_v24, %v2606_v1 }
 0x164   : > { %v599_v26 = vpop.f32.mrb[10].mxu1 }
 0x165   : > { %1459 = vst [vmem:[%s2621_s30 + $0x68] sm:$0xff] %v458_v25  ;;  %v461_v27 = vpop.f32.mrb[10].mxu0  ;;  %v2659_v28 = vadd.f32 %v599_v26, %v2628_v3  ;;  %v1710_v29 = vpop.f32.mrb[11].mxu1 }
 0x166   : > { %v2662_v30 = vadd.f32 %v461_v27, %v2631_v4  ;;  %v463_v31 = vpop.f32.mrb[11].mxu0 }
 0x167   : > { %3222 = vst [vmem:[#allocation11_spill] sm:$0xff] %v2659_v28  ;;  %v464_v32 = vadd.f32 %v463_v31, %v2606_v1 }
 0x168   : > { %3223 = vst [vmem:[#allocation12_spill] sm:$0xff] %v2662_v30  ;;  %v604_v33 = vpop.f32.mrb[12].mxu1 }
 0x169   : > { %1460 = vst [vmem:[%s2621_s30 + $0x80] sm:$0xff] %v464_v32  ;;  %v467_v34 = vpop.f32.mrb[12].mxu0  ;;  %v2667_v35 = vadd.f32 %v604_v33, %v2628_v3  ;;  %v1713_v36 = vpop.f32.mrb[13].mxu1 }
 0x16a   : > { %v2670_v37 = vadd.f32 %v467_v34, %v2631_v4  ;;  %v469_v38 = vpop.f32.mrb[13].mxu0 }
 0x16b   : > { %v470_v39 = vadd.f32 %v469_v38, %v2606_v1 }
 0x16c   : > { %v2673_v40 = vpop.f32.mrb[14].mxu1 }
 0x16d   : > { %1461 = vst [vmem:[%s2621_s30 + $0x98] sm:$0xff] %v470_v39  ;;  %v2676_v41 = vpop.f32.mrb[14].mxu0  ;;  %v1716_v42 = vpop.f32.mrb[15].mxu1 }
 0x16e   : > { %v475_v43 = vpop.f32.mrb[15].mxu0 }
 0x16f   : > { %v476_v44 = vadd.f32 %v475_v43, %v2606_v1 }
 0x170   : > { %v2679_v45 = vpop.f32.mrb[16].mxu1 }
 0x171   : > { %1462 = vst [vmem:[%s2621_s30 + $0xb0] sm:$0xff] %v476_v44  ;;  %v2682_v46 = vpop.f32.mrb[16].mxu0  ;;  %v1719_v0 = vpop.f32.mrb[17].mxu1  ;;  %v3203_v44 = vmov 4  }
 0x172   : > { %v481_v47 = vpop.f32.mrb[17].mxu0 }
 0x173   : > { %v482_v49 = vadd.f32 %v481_v47, %v2606_v1 }
 0x174   : > { %v619_v52 = vpop.f32.mrb[18].mxu1 }
 0x175   : > { %1463 = vst [vmem:[%s2621_s30 + $0xc8] sm:$0xff] %v482_v49  ;;  %v485_v55 = vpop.f32.mrb[18].mxu0  ;;  %v2687_v56 = vadd.f32 %v619_v52, %v2628_v3  ;;  %v1722_v57 = vpop.f32.mrb[19].mxu1 }
 0x176   : > { %v2690_v62 = vadd.f32 %v485_v55, %v2631_v4  ;;  %v487_v63 = vpop.f32.mrb[19].mxu0  ;;  %v3201_v57 = vmov 1  }
 0x177   : > { %v488_v2 = vadd.f32 %v487_v63, %v2606_v1 }
 0x178   : > { %v624_v5 = vpop.f32.mrb[20].mxu1 }
 0x179   : > { %1464 = vst [vmem:[%s2621_s30 + $0xe0] sm:$0xff] %v488_v2  ;;  %v491_v6 = vpop.f32.mrb[20].mxu0  ;;  %v2695_v8 = vadd.f32 %v624_v5, %v2628_v3  ;;  %v1725_v10 = vpop.f32.mrb[21].mxu1 }
 0x17a   : > { %v2698_v11 = vadd.f32 %v491_v6, %v2631_v4  ;;  %v493_v12 = vpop.f32.mrb[21].mxu0  ;;  %v3199_v10 = vmov 5  }
 0x17b   : > { %v494_v13 = vadd.f32 %v493_v12, %v2606_v1 }
 0x17c   : > { %v629_v15 = vpop.f32.mrb[22].mxu1 }
 0x17d   : > { %1465 = vst [vmem:[%s2621_s30 + $0xf8] sm:$0xff] %v494_v13  ;;  %v497_v17 = vpop.f32.mrb[22].mxu0  ;;  %v2703_v18 = vadd.f32 %v629_v15, %v2628_v3  ;;  %v1728_v19 = vpop.f32.mrb[23].mxu1  ;;  %v3197_v15 = vmov 2  }
 0x17e   : > { %v2706_v20 = vadd.f32 %v497_v17, %v2631_v4  ;;  %v499_v22 = vpop.f32.mrb[23].mxu0  ;;  %v3195_v17 = vmov 6   ;;  %v3207_v19 = vmov 3  }
 0x17f   : > { %3224 = vst [vmem:[#allocation13_spill] sm:$0xff] %v2703_v18  ;;  %v500_v24 = vadd.f32 %v499_v22, %v2606_v1  ;;  %v3205_v22 = vmov 7  }
 0x180   : > { %v634_v25 = vpop.f32.mrb[24].mxu1 }
 0x181   : > { %1466 = vst [vmem:[%s2621_s30 + $0x110] sm:$0xff] %v500_v24  ;;  %v503_v26 = vpop.f32.mrb[24].mxu0  ;;  %v2711_v27 = vadd.f32 %v634_v25, %v2628_v3  ;;  %v1731_v29 = vpop.f32.mrb[25].mxu1 }
 0x182   : > { %v2714_v31 = vadd.f32 %v503_v26, %v2631_v4  ;;  %v505_v32 = vpop.f32.mrb[25].mxu0 }
 0x183   : > { %v506_v33 = vadd.f32 %v505_v32, %v2606_v1 }
 0x184   : > { %v755_v34 = vpop.f32.mrb[26].mxu1 }
 0x185   : > { %1467 = vst [vmem:[%s2621_s30 + $0x128] sm:$0xff] %v506_v33  ;;  %v2718_v36 = vpop.f32.mrb[26].mxu0  ;;  %823 = vperm.xlu1 %1978, %v755_v34   ;;  %v1787_v38 = vpop.f32.mrb[27].mxu1 }
 0x186   : > { %788 = vperm.xlu0 %1986, %v2718_v36   ;;  %v1766_v39 = vpop.f32.mrb[27].mxu0 }
 0x188   : > { %v760_v42 = vpop.f32.mrb[28].mxu1 }
 0x189   : > { %v2721_v43 = vpop.f32.mrb[28].mxu0  ;;  %1979 = vset.pattern.permute.xlu1 %v3203_v44  ;;  %v1790_v0 = vpop.f32.mrb[29].mxu1 }
 0x18a   : > { %828 = vperm.xlu0 %1986, %v760_v42   ;;  %v1769_v47 = vpop.f32.mrb[29].mxu0  ;;  %897 = vperm.xlu1 %1979, %v755_v34  }
 0x18c   : > { %v2724_v1 = vpop.f32.mrb[30].mxu1 }
 0x18d   : > { %v2726_v49 = vpop.f32.mrb[30].mxu0  ;;  %v1793_v52 = vpop.f32.mrb[31].mxu1 }
 0x18e   : > { %1994 = vset.pattern.permute.xlu0 %v3203_v44  ;;  %v1772_v55 = vpop.f32.mrb[31].mxu0  ;;  %1980 = vset.pattern.permute.xlu1 %v3201_v57 }
 0x18f   : > { %901 = vperm.xlu0 %1994, %v760_v42   ;;  %966 = vperm.xlu1 %1980, %v755_v34  }
 0x190   : > { %v2730_v63 = vpop.f32.mrb[32].mxu1 }
 0x191   : > { %v2732_v2 = vpop.f32.mrb[32].mxu0  ;;  %v1796_v5 = vpop.f32.mrb[33].mxu1 }
 0x192   : > { %v1775_v6 = vpop.f32.mrb[33].mxu0 }
 0x193   : > { %1995 = vset.pattern.permute.xlu0 %v3201_v57  ;;  %1981 = vset.pattern.permute.xlu1 %v3199_v10 }
 0x194   : > { %970 = vperm.xlu0 %1995, %v760_v42   ;;  %1048 = vperm.xlu1 %1981, %v755_v34   ;;  %v2746_v24 = vpop.f32.mrb[34].mxu1 }
 0x195   : > { %v2736_v12 = vpop.f32.mrb[34].mxu0  ;;  %v1799_v25 = vpop.f32.mrb[35].mxu1 }
 0x196   : > { %v1778_v13 = vpop.f32.mrb[35].mxu0  ;;  %v785_v25 = vld [vmem:[%s3190_s5] sm:$0xf] }
 0x198   : > { %1996 = vset.pattern.permute.xlu0 %v3199_v10  ;;  %1982 = vset.pattern.permute.xlu1 %v3197_v15  ;;  %v2748_v26 = vpop.f32.mrb[36].mxu1 }
 0x199   : > { %1052 = vperm.xlu0 %1996, %v760_v42   ;;  %1130 = vperm.xlu1 %1982, %v755_v34   ;;  %v1802_v29 = vpop.f32.mrb[37].mxu1  ;;  %v2776_v32 = vpop.f32.mrb[36].mxu0 }
 0x19a   : > { %v1781_v33 = vpop.f32.mrb[37].mxu0 }
 0x19b   : > { %v1319_v33 = vsub.s32 3, %v2596_v50 }
 0x19d   : > { %1997 = vset.pattern.permute.xlu0 %v3197_v15  ;;  %1983 = vset.pattern.permute.xlu1 %v3195_v17  ;;  %v2888_v30 = vrot.slane %v785_v25, %v1319_v33 }
 0x19e   : > { %1134 = vperm.xlu0 %1997, %v760_v42   ;;  %1212 = vperm.xlu1 %1983, %v755_v34  }
 0x1a2   : > { %1998 = vset.pattern.permute.xlu0 %v3195_v17  ;;  %1984 = vset.pattern.permute.xlu1 %v3207_v19 }
 0x1a3   : > { %1216 = vperm.xlu0 %1998, %v760_v42   ;;  %1294 = vperm.xlu1 %1984, %v755_v34  }
 0x1a7   : > { %1999 = vset.pattern.permute.xlu0 %v3207_v19  ;;  %1985 = vset.pattern.permute.xlu1 %v3205_v22 }
 0x1a8   : > { %1298 = vperm.xlu0 %1999, %v760_v42   ;;  %1376 = vperm.xlu1 %1985, %v755_v34   ;;  %v2779_v34 = vpop.f32.mrb[38].mxu0 }
 0x1a9   : > { %v1784_v38 = vpop.f32.mrb[39].mxu0 }
 0x1ac   : > { %2000 = vset.pattern.permute.xlu0 %v3205_v22  ;;  %1987 = vset.pattern.permute.xlu1 %v3203_v44 }
 0x1ad   : > { %1380 = vperm.xlu0 %2000, %v760_v42   ;;  %869 = vperm.xlu1 %1987, %v2718_v36  }
 0x1b1   : > { %2001 = vset.pattern.permute.xlu0 %v3209_v48  ;;  %1988 = vset.pattern.permute.xlu1 %v3201_v57 }
 0x1b2   : > { %793 = vperm.xlu0 %2001, %v2721_v43   ;;  %938 = vperm.xlu1 %1988, %v2718_v36  }
 0x1b6   : > { %2002 = vset.pattern.permute.xlu0 %v3203_v44  ;;  %1989 = vset.pattern.permute.xlu1 %v3199_v10 }
 0x1b7   : > { %873 = vperm.xlu0 %2002, %v2721_v43   ;;  %1020 = vperm.xlu1 %1989, %v2718_v36  }
 0x1bb   : > { %2003 = vset.pattern.permute.xlu0 %v3201_v57  ;;  %1990 = vset.pattern.permute.xlu1 %v3197_v15 }
 0x1bc   : > { %942 = vperm.xlu0 %2003, %v2721_v43   ;;  %1102 = vperm.xlu1 %1990, %v2718_v36  }
 0x1c0   : > { %2004 = vset.pattern.permute.xlu0 %v3199_v10  ;;  %1991 = vset.pattern.permute.xlu1 %v3195_v17 }
 0x1c1   : > { %1024 = vperm.xlu0 %2004, %v2721_v43   ;;  %1184 = vperm.xlu1 %1991, %v2718_v36  }
 0x1c5   : > { %2005 = vset.pattern.permute.xlu0 %v3197_v15  ;;  %1992 = vset.pattern.permute.xlu1 %v3207_v19 }
 0x1c6   : > { %1106 = vperm.xlu0 %2005, %v2721_v43   ;;  %1266 = vperm.xlu1 %1992, %v2718_v36  }
 0x1ca   : > { %2006 = vset.pattern.permute.xlu0 %v3195_v17  ;;  %1993 = vset.pattern.permute.xlu1 %v3205_v22 }
 0x1cb   : > { %1188 = vperm.xlu0 %2006, %v2721_v43   ;;  %1348 = vperm.xlu1 %1993, %v2718_v36  }
 0x1cf   : > { %2007 = vset.pattern.permute.xlu0 %v3207_v19  ;;  %2009 = vset.pattern.permute.xlu1 %v3209_v48 }
 0x1d0   : > { %1270 = vperm.xlu0 %2007, %v2721_v43   ;;  %833 = vperm.xlu1 %2009, %v2724_v1  }
 0x1d4   : > { %2008 = vset.pattern.permute.xlu0 %v3205_v22  ;;  %2010 = vset.pattern.permute.xlu1 %v3203_v44 }
 0x1d5   : > { %1352 = vperm.xlu0 %2008, %v2721_v43   ;;  %905 = vperm.xlu1 %2010, %v2724_v1  }
 0x1d9   : > { %2025 = vset.pattern.permute.xlu0 %v3209_v48  ;;  %2011 = vset.pattern.permute.xlu1 %v3201_v57 }
 0x1da   : > { %838 = vperm.xlu0 %2025, %v2730_v63   ;;  %974 = vperm.xlu1 %2011, %v2724_v1  }
 0x1de   : > { %2026 = vset.pattern.permute.xlu0 %v3203_v44  ;;  %2012 = vset.pattern.permute.xlu1 %v3199_v10 }
 0x1df   : > { %909 = vperm.xlu0 %2026, %v2730_v63   ;;  %1056 = vperm.xlu1 %2012, %v2724_v1  }
 0x1e3   : > { %2027 = vset.pattern.permute.xlu0 %v3201_v57  ;;  %2013 = vset.pattern.permute.xlu1 %v3197_v15 }
 0x1e4   : > { %978 = vperm.xlu0 %2027, %v2730_v63   ;;  %1138 = vperm.xlu1 %2013, %v2724_v1  }
 0x1e8   : > { %2028 = vset.pattern.permute.xlu0 %v3199_v10  ;;  %2014 = vset.pattern.permute.xlu1 %v3195_v17 }
 0x1e9   : > { %1060 = vperm.xlu0 %2028, %v2730_v63   ;;  %1220 = vperm.xlu1 %2014, %v2724_v1  }
 0x1ed   : > { %2029 = vset.pattern.permute.xlu0 %v3197_v15  ;;  %2015 = vset.pattern.permute.xlu1 %v3207_v19 }
 0x1ee   : > { %1142 = vperm.xlu0 %2029, %v2730_v63   ;;  %1302 = vperm.xlu1 %2015, %v2724_v1  }
 0x1f2   : > { %2030 = vset.pattern.permute.xlu0 %v3195_v17  ;;  %2016 = vset.pattern.permute.xlu1 %v3205_v22 }
 0x1f3   : > { %1224 = vperm.xlu0 %2030, %v2730_v63   ;;  %1384 = vperm.xlu1 %2016, %v2724_v1  }
 0x1f7   : > { %2031 = vset.pattern.permute.xlu0 %v3207_v19  ;;  %2017 = vset.pattern.permute.xlu1 %v3209_v48 }
 0x1f8   : > { %1306 = vperm.xlu0 %2031, %v2730_v63   ;;  %798 = vperm.xlu1 %2017, %v2726_v49  }
 0x1fc   : > { %2032 = vset.pattern.permute.xlu0 %v3205_v22  ;;  %2018 = vset.pattern.permute.xlu1 %v3203_v44 }
 0x1fd   : > { %1388 = vperm.xlu0 %2032, %v2730_v63   ;;  %877 = vperm.xlu1 %2018, %v2726_v49   ;;  %v784_v63 = vld [vmem:[%s3189_s4] sm:$0xf] }
 0x1fe   : > { %v2847_v6 = vrot.slane %v784_v63, %v2599_v51  ;;  %v2853_v13 = vrot.slane %v784_v63, %v2617_v59  ;;  %v2859_v29 = vrot.slane %v784_v63, %v2614_v58 }
 0x201   : > { %2048 = vset.pattern.permute.xlu0 %v3209_v48  ;;  %2019 = vset.pattern.permute.xlu1 %v3201_v57 }
 0x202   : > { %808 = vperm.xlu0 %2048, %v2736_v12   ;;  %946 = vperm.xlu1 %2019, %v2726_v49  }
 0x204   : > { %v824_v36 = vpop.permute.xlu1 %823 }
 0x205   : > { %v2825_v39 = vpop.permute.xlu0 %788 }
 0x206   : > { %2049 = vset.pattern.permute.xlu0 %v3203_v44  ;;  %2020 = vset.pattern.permute.xlu1 %v3199_v10  ;;  %v2867_v44 = vrot.slane %v785_v25, %v2617_v59 }
 0x207   : > { %885 = vperm.xlu0 %2049, %v2736_v12   ;;  %1028 = vperm.xlu1 %2020, %v2726_v49  }
 0x209   : > { %v829_v42 = vpop.permute.xlu0 %828  ;;  %v898_v43 = vpop.permute.xlu1 %897 }
 0x20b   : > { %2050 = vset.pattern.permute.xlu0 %v3201_v57  ;;  %2021 = vset.pattern.permute.xlu1 %v3197_v15 }
 0x20c   : > { %954 = vperm.xlu0 %2050, %v2736_v12   ;;  %1110 = vperm.xlu1 %2021, %v2726_v49  }
 0x20e   : > { %v902_v0 = vpop.permute.xlu0 %901  ;;  %v967_v47 = vpop.permute.xlu1 %966 }
 0x210   : > { %2051 = vset.pattern.permute.xlu0 %v3199_v10  ;;  %2022 = vset.pattern.permute.xlu1 %v3195_v17 }
 0x211   : > { %1036 = vperm.xlu0 %2051, %v2736_v12   ;;  %1192 = vperm.xlu1 %2022, %v2726_v49  }
 0x213   : > { %v971_v1 = vpop.permute.xlu0 %970  ;;  %v1049_v52 = vpop.permute.xlu1 %1048 }
 0x214   : > { %v1001_v10 = vmul.f32 %v2847_v6, %v971_v1 }
 0x215   : > { %2052 = vset.pattern.permute.xlu0 %v3197_v15  ;;  %2023 = vset.pattern.permute.xlu1 %v3207_v19  ;;  %v863_v15 = vmul.f32 %v2853_v13, %v829_v42  ;;  %v2877_v42 = vrot.slane %v784_v63, %v1319_v33  ;;  %v3225_v63 = vmov 7  }
 0x216   : > { %1118 = vperm.xlu0 %2052, %v2736_v12   ;;  %1274 = vperm.xlu1 %2023, %v2726_v49  }
 0x218   : > { %v1053_v55 = vpop.permute.xlu0 %1052  ;;  %v1131_v5 = vpop.permute.xlu1 %1130 }
 0x219   : > { %v1164_v50 = vmul.f32 %v2859_v29, %v1131_v5  ;;  %v931_v5 = vmul.f32 %v2867_v44, %v898_v43  ;;  %v474_v43 = vadd.f32 %v2676_v41, %v2631_v4  ;;  %v3228_v41 = vmov 1  }
 0x21a   : > { %2053 = vset.pattern.permute.xlu0 %v3195_v17  ;;  %2024 = vset.pattern.permute.xlu1 %v3205_v22  ;;  %v1000_v17 = vmul.f32 %v2847_v6, %v967_v47  ;;  %v2870_v22 = vrot.slane %v785_v25, %v2599_v51  ;;  %v2880_v47 = vrot.slane %v785_v25, %v2614_v58 }
 0x21b   : > { %1200 = vperm.xlu0 %2053, %v2736_v12   ;;  %1356 = vperm.xlu1 %2024, %v2726_v49   ;;  %v862_v49 = vmul.f32 %v2853_v13, %v824_v36  ;;  %v1014_v51 = vadd.f32 %v1001_v10, %v863_v15  ;;  %v932_v58 = vmul.f32 %v2867_v44, %v902_v0  ;;  %v3226_v15 = vmov 4  }
 0x21c   : > { %v1082_v36 = vmul.f32 %v2870_v22, %v1049_v52 }
 0x21d   : > { %v1135_v38 = vpop.permute.xlu0 %1134  ;;  %v1213_v57 = vpop.permute.xlu1 %1212  ;;  %v1013_v59 = vadd.f32 %v1000_v17, %v862_v49  ;;  %v1083_v17 = vmul.f32 %v2870_v22, %v1053_v55 }
 0x21e   : > { %v1165_v1 = vmul.f32 %v2859_v29, %v1135_v38  ;;  %v1246_v10 = vmul.f32 %v2880_v47, %v1213_v57  ;;  %v1095_v25 = vadd.f32 %v1082_v36, %v931_v5 }
 0x21f   : > { %2054 = vset.pattern.permute.xlu0 %v3207_v19  ;;  %2033 = vset.pattern.permute.xlu1 %v3209_v48  ;;  %v1177_v48 = vadd.f32 %v1164_v50, %v1013_v59  ;;  %v1096_v49 = vadd.f32 %v1083_v17, %v932_v58  ;;  %v3227_v59 = vmov 0  }
 0x220   : > { %1282 = vperm.xlu0 %2054, %v2736_v12   ;;  %803 = vperm.xlu1 %2033, %v2732_v2   ;;  %v1178_v52 = vadd.f32 %v1165_v1, %v1014_v51  ;;  %v1259_v57 = vadd.f32 %v1246_v10, %v1095_v25  ;;  %v610_v51 = vadd.f32 %v2673_v40, %v2628_v3  ;;  %v3229_v40 = vmov 5  }
 0x221   : > { %v615_v10 = vadd.f32 %v2679_v45, %v2628_v3 }
 0x222   : > { %v1217_v19 = vpop.permute.xlu0 %1216  ;;  %v1295_v18 = vpop.permute.xlu1 %1294 }
 0x223   : > { %v1328_v28 = vmul.f32 %v2877_v42, %v1295_v18  ;;  %v1247_v50 = vmul.f32 %v2880_v47, %v1217_v19 }
 0x224   : > { %2055 = vset.pattern.permute.xlu0 %v3225_v63  ;;  %2034 = vset.pattern.permute.xlu1 %v3226_v15 }
 0x225   : > { %1364 = vperm.xlu0 %2055, %v2736_v12   ;;  %v1341_v18 = vadd.f32 %v1328_v28, %v1177_v48  ;;  %881 = vperm.xlu1 %2034, %v2732_v2   ;;  %v480_v48 = vadd.f32 %v2682_v46, %v2631_v4  ;;  %v1260_v5 = vadd.f32 %v1247_v50, %v1096_v49 }
 0x227   : > { %v1299_v33 = vpop.permute.xlu0 %1298  ;;  %v1436_v38 = vadd.f32 %v1341_v18, %v474_v43  ;;  %v1377_v0 = vpop.permute.xlu1 %1376 }
 0x228   : > { %v1329_v55 = vmul.f32 %v2877_v42, %v1299_v33  ;;  %v1410_v12 = vmul.f32 %v2888_v30, %v1377_v0  ;;  %v3230_v33 = vmov 2   ;;  %v3231_v0 = vmov 6  }
 0x229   : > { %2056 = vset.pattern.permute.xlu0 %v3227_v59  ;;  %1449 = vst [vmem:[%s2621_s30 + $0xa8] sm:$0xff] %v1436_v38  ;;  %2035 = vset.pattern.permute.xlu1 %v3228_v41 }
 0x22a   : > { %v1342_v28 = vadd.f32 %v1329_v55, %v1178_v52  ;;  %848 = vperm.xlu0 %2056, %v2748_v26   ;;  %v1423_v1 = vadd.f32 %v1410_v12, %v1259_v57  ;;  %950 = vperm.xlu1 %2035, %v2732_v2   ;;  %v3232_v57 = vmov 3  }
 0x22c   : > { %v1437_v19 = vadd.f32 %v1342_v28, %v480_v48  ;;  %v1381_v36 = vpop.permute.xlu0 %1380  ;;  %v1475_v58 = vadd.f32 %v1423_v1, %v610_v51  ;;  %v870_v17 = vpop.permute.xlu1 %869  ;;  %v855_v28 = vmul.f32 %v2853_v13, %v2825_v39 }
 0x22d   : > { %v1411_v46 = vmul.f32 %v2888_v30, %v1381_v36 }
 0x22e   : > { %1450 = vst [vmem:[%s2621_s30 + $0xc0] sm:$0xff] %v1437_v19  ;;  %2057 = vset.pattern.permute.xlu0 %v3226_v15  ;;  %1488 = vst [vmem:[%s2621_s30 + $0xb8] sm:$0xff] %v1475_v58  ;;  %2036 = vset.pattern.permute.xlu1 %v3229_v40 }
 0x22f   : > { %v1424_v43 = vadd.f32 %v1411_v46, %v1260_v5  ;;  %917 = vperm.xlu0 %2057, %v2748_v26   ;;  %1032 = vperm.xlu1 %2036, %v2732_v2  }
 0x231   : > { %v1476_v52 = vadd.f32 %v1424_v43, %v615_v10  ;;  %v794_v18 = vpop.permute.xlu0 %793  ;;  %v939_v25 = vpop.permute.xlu1 %938  ;;  %v924_v43 = vmul.f32 %v2867_v44, %v870_v17 }
 0x232   : > { %v993_v12 = vmul.f32 %v2847_v6, %v939_v25  ;;  %v856_v5 = vmul.f32 %v2853_v13, %v794_v18 }
 0x233   : > { %1489 = vst [vmem:[%s2621_s30 + $0xd0] sm:$0xff] %v1476_v52  ;;  %2058 = vset.pattern.permute.xlu0 %v3228_v41  ;;  %2037 = vset.pattern.permute.xlu1 %v3230_v33 }
 0x234   : > { %986 = vperm.xlu0 %2058, %v2748_v26   ;;  %1114 = vperm.xlu1 %2037, %v2732_v2   ;;  %v1006_v1 = vadd.f32 %v993_v12, %v855_v28 }
 0x236   : > { %v874_v45 = vpop.permute.xlu0 %873  ;;  %v1021_v38 = vpop.permute.xlu1 %1020 }
 0x237   : > { %v1075_v36 = vmul.f32 %v2870_v22, %v1021_v38 }
 0x238   : > { %2059 = vset.pattern.permute.xlu0 %v3229_v40  ;;  %2038 = vset.pattern.permute.xlu1 %v3231_v0 }
 0x239   : > { %1068 = vperm.xlu0 %2059, %v2748_v26   ;;  %1196 = vperm.xlu1 %2038, %v2732_v2   ;;  %v1088_v25 = vadd.f32 %v1075_v36, %v924_v43 }
 0x23b   : > { %v943_v55 = vpop.permute.xlu0 %942  ;;  %v1103_v49 = vpop.permute.xlu1 %1102 }
 0x23c   : > { %v1157_v51 = vmul.f32 %v2859_v29, %v1103_v49  ;;  %v994_v58 = vmul.f32 %v2847_v6, %v943_v55 }
 0x23d   : > { %2060 = vset.pattern.permute.xlu0 %v3230_v33  ;;  %2039 = vset.pattern.permute.xlu1 %v3232_v57 }
 0x23e   : > { %1150 = vperm.xlu0 %2060, %v2748_v26   ;;  %1278 = vperm.xlu1 %2039, %v2732_v2   ;;  %v1170_v10 = vadd.f32 %v1157_v51, %v1006_v1  ;;  %v1007_v38 = vadd.f32 %v994_v58, %v856_v5  ;;  %v925_v51 = vmul.f32 %v2867_v44, %v874_v45 }
 0x240   : > { %v1025_v50 = vpop.permute.xlu0 %1024  ;;  %v1185_v48 = vpop.permute.xlu1 %1184 }
 0x241   : > { %v1239_v52 = vmul.f32 %v2880_v47, %v1185_v48  ;;  %v1076_v1 = vmul.f32 %v2870_v22, %v1025_v50 }
 0x242   : > { %2061 = vset.pattern.permute.xlu0 %v3231_v0  ;;  %2040 = vset.pattern.permute.xlu1 %v3225_v63 }
 0x243   : > { %1232 = vperm.xlu0 %2061, %v2748_v26   ;;  %1360 = vperm.xlu1 %2040, %v2732_v2   ;;  %v432_v2 = vadd.f32 %v2610_v54, %v2631_v4  ;;  %v1252_v28 = vadd.f32 %v1239_v52, %v1088_v25  ;;  %v575_v54 = vadd.f32 %v2608_v53, %v2628_v3 }
 0x244   : > { %v1089_v50 = vadd.f32 %v1076_v1, %v925_v51 }
 0x245   : > { %v1107_v19 = vpop.permute.xlu0 %1106  ;;  %v1267_v46 = vpop.permute.xlu1 %1266 }
 0x246   : > { %v1321_v39 = vmul.f32 %v2877_v42, %v1267_v46  ;;  %v1158_v55 = vmul.f32 %v2859_v29, %v1107_v19 }
 0x247   : > { %2062 = vset.pattern.permute.xlu0 %v3232_v57  ;;  %2041 = vset.pattern.permute.xlu1 %v3227_v59 }
 0x248   : > { %1314 = vperm.xlu0 %2062, %v2748_v26   ;;  %v1334_v18 = vadd.f32 %v1321_v39, %v1170_v10  ;;  %843 = vperm.xlu1 %2041, %v2746_v24   ;;  %v1171_v19 = vadd.f32 %v1158_v55, %v1007_v38  ;;  %v438_v39 = vadd.f32 %v2624_v61, %v2631_v4 }
 0x249   : > { %v580_v61 = vadd.f32 %v2619_v60, %v2628_v3 }
 0x24a   : > { %v1189_v49 = vpop.permute.xlu0 %1188  ;;  %v1429_v12 = vadd.f32 %v1334_v18, %v432_v2  ;;  %v1349_v17 = vpop.permute.xlu1 %1348 }
 0x24b   : > { %v1403_v48 = vmul.f32 %v2888_v30, %v1349_v17  ;;  %v1240_v10 = vmul.f32 %v2880_v47, %v1189_v49 }
 0x24c   : > { %2071 = vset.pattern.permute.xlu0 %v3227_v59  ;;  %1442 = vst [vmem:[%s2621_s30] sm:$0xff] %v1429_v12  ;;  %2042 = vset.pattern.permute.xlu1 %v3226_v15 }
 0x24d   : > { %818 = vperm.xlu0 %2071, %v2779_v34   ;;  %v1416_v36 = vadd.f32 %v1403_v48, %v1252_v28  ;;  %913 = vperm.xlu1 %2042, %v2746_v24   ;;  %v1253_v2 = vadd.f32 %v1240_v10, %v1089_v50 }
 0x24f   : > { %v1271_v5 = vpop.permute.xlu0 %1270  ;;  %v1468_v58 = vadd.f32 %v1416_v36, %v575_v54  ;;  %v834_v45 = vpop.permute.xlu1 %833 }
 0x250   : > { %v1322_v46 = vmul.f32 %v2877_v42, %v1271_v5  ;;  %v864_v1 = vmul.f32 %v2853_v13, %v834_v45 }
 0x251   : > { %2072 = vset.pattern.permute.xlu0 %v3226_v15  ;;  %1481 = vst [vmem:[%s2621_s30 + $0x10] sm:$0xff] %v1468_v58  ;;  %2043 = vset.pattern.permute.xlu1 %v3228_v41 }
 0x252   : > { %v1335_v53 = vadd.f32 %v1322_v46, %v1171_v19  ;;  %893 = vperm.xlu0 %2072, %v2779_v34   ;;  %982 = vperm.xlu1 %2043, %v2746_v24  }
 0x254   : > { %v1430_v43 = vadd.f32 %v1335_v53, %v438_v39  ;;  %v1353_v52 = vpop.permute.xlu0 %1352  ;;  %v906_v18 = vpop.permute.xlu1 %905 }
 0x255   : > { %v1404_v25 = vmul.f32 %v2888_v30, %v1353_v52 }
 0x256   : > { %1443 = vst [vmem:[%s2621_s30 + $0x18] sm:$0xff] %v1430_v43  ;;  %2073 = vset.pattern.permute.xlu0 %v3228_v41  ;;  %2044 = vset.pattern.permute.xlu1 %v3229_v40 }
 0x257   : > { %v1417_v4 = vadd.f32 %v1404_v25, %v1253_v2  ;;  %962 = vperm.xlu0 %2073, %v2779_v34   ;;  %1064 = vperm.xlu1 %2044, %v2746_v24  }
 0x259   : > { %v1469_v38 = vadd.f32 %v1417_v4, %v580_v61  ;;  %v839_v55 = vpop.permute.xlu0 %838  ;;  %v975_v49 = vpop.permute.xlu1 %974 }
 0x25a   : > { %v1002_v48 = vmul.f32 %v2847_v6, %v975_v49  ;;  %v865_v58 = vmul.f32 %v2853_v13, %v839_v55 }
 0x25b   : > { %1482 = vst [vmem:[%s2621_s30 + $0x28] sm:$0xff] %v1469_v38  ;;  %2074 = vset.pattern.permute.xlu0 %v3229_v40  ;;  %2045 = vset.pattern.permute.xlu1 %v3230_v33 }
 0x25c   : > { %1044 = vperm.xlu0 %2074, %v2779_v34   ;;  %1146 = vperm.xlu1 %2045, %v2746_v24   ;;  %v1015_v19 = vadd.f32 %v1002_v48, %v864_v1 }
 0x25e   : > { %v910_v60 = vpop.permute.xlu0 %909  ;;  %v1057_v3 = vpop.permute.xlu1 %1056 }
 0x25f   : > { %v1084_v5 = vmul.f32 %v2870_v22, %v1057_v3 }
 0x260   : > { %2075 = vset.pattern.permute.xlu0 %v3230_v33  ;;  %2046 = vset.pattern.permute.xlu1 %v3231_v0 }
 0x261   : > { %1126 = vperm.xlu0 %2075, %v2779_v34   ;;  %1228 = vperm.xlu1 %2046, %v2746_v24  }
 0x263   : > { %v979_v12 = vpop.permute.xlu0 %978  ;;  %v1139_v17 = vpop.permute.xlu1 %1138 }
 0x264   : > { %v1166_v54 = vmul.f32 %v2859_v29, %v1139_v17  ;;  %v1003_v46 = vmul.f32 %v2847_v6, %v979_v12 }
 0x265   : > { %2076 = vset.pattern.permute.xlu0 %v3231_v0  ;;  %2047 = vset.pattern.permute.xlu1 %v3232_v57 }
 0x266   : > { %1208 = vperm.xlu0 %2076, %v2779_v34   ;;  %1310 = vperm.xlu1 %2047, %v2746_v24   ;;  %v1179_v10 = vadd.f32 %v1166_v54, %v1015_v19  ;;  %v1016_v52 = vadd.f32 %v1003_v46, %v865_v58 }
 0x268   : > { %v1061_v28 = vpop.permute.xlu0 %1060  ;;  %v1221_v51 = vpop.permute.xlu1 %1220 }
 0x269   : > { %v1248_v39 = vmul.f32 %v2880_v47, %v1221_v51 }
 0x26a   : > { %2077 = vset.pattern.permute.xlu0 %v3232_v57  ;;  %2063 = vset.pattern.permute.xlu1 %v3227_v59  ;;  %v933_v59 = vmul.f32 %v2867_v44, %v906_v18 }
 0x26b   : > { %1290 = vperm.xlu0 %2077, %v2779_v34   ;;  %813 = vperm.xlu1 %2063, %v2776_v32  }
 0x26c   : > { %v1097_v43 = vadd.f32 %v1084_v5, %v933_v59 }
 0x26d   : > { %v1143_v36 = vpop.permute.xlu0 %1142  ;;  %v1303_v50 = vpop.permute.xlu1 %1302 }
 0x26e   : > { %v1330_v45 = vmul.f32 %v2877_v42, %v1303_v50  ;;  %v1167_v2 = vmul.f32 %v2859_v29, %v1143_v36  ;;  %v1261_v38 = vadd.f32 %v1248_v39, %v1097_v43 }
 0x26f   : > { %2078 = vset.pattern.permute.xlu0 %v3225_v63  ;;  %2064 = vset.pattern.permute.xlu1 %v3226_v15  ;;  %v934_v15 = vmul.f32 %v2867_v44, %v910_v60 }
 0x270   : > { %1372 = vperm.xlu0 %2078, %v2779_v34   ;;  %v1343_v53 = vadd.f32 %v1330_v45, %v1179_v10  ;;  %889 = vperm.xlu1 %2064, %v2776_v32   ;;  %v1085_v34 = vmul.f32 %v2870_v22, %v1061_v28  ;;  %v1180_v55 = vadd.f32 %v1167_v2, %v1016_v52 }
 0x272   : > { %v1225_v25 = vpop.permute.xlu0 %1224  ;;  %v1438_v61 = vadd.f32 %v1343_v53, %v2690_v62  ;;  %v1385_v4 = vpop.permute.xlu1 %1384  ;;  %v1098_v48 = vadd.f32 %v1085_v34, %v934_v15 }
 0x273   : > { %v1412_v18 = vmul.f32 %v2888_v30, %v1385_v4 }
 0x274   : > { %1396 = vperm.xlu0 %2078, %v2748_v26   ;;  %1451 = vst [vmem:[%s2621_s30 + $0xd8] sm:$0xff] %v1438_v61  ;;  %2065 = vset.pattern.permute.xlu1 %v3228_v41  ;;  %v1249_v26 = vmul.f32 %v2880_v47, %v1225_v25 }
 0x275   : > { %v1425_v49 = vadd.f32 %v1412_v18, %v1261_v38  ;;  %958 = vperm.xlu1 %2065, %v2776_v32  }
 0x276   : > { %v1262_v51 = vadd.f32 %v1249_v26, %v1098_v48 }
 0x277   : > { %v1307_v62 = vpop.permute.xlu0 %1306  ;;  %v1477_v3 = vadd.f32 %v1425_v49, %v2687_v56  ;;  %v799_v17 = vpop.permute.xlu1 %798 }
 0x278   : > { %v1331_v12 = vmul.f32 %v2877_v42, %v1307_v62 }
 0x279   : > { %1490 = vst [vmem:[%s2621_s30 + $0xe8] sm:$0xff] %v1477_v3  ;;  %2066 = vset.pattern.permute.xlu1 %v3229_v40 }
 0x27a   : > { %v1344_v60 = vadd.f32 %v1331_v12, %v1180_v55  ;;  %1040 = vperm.xlu1 %2066, %v2776_v32  }
 0x27c   : > { %v1439_v41 = vadd.f32 %v1344_v60, %v2698_v11  ;;  %v1389_v28 = vpop.permute.xlu0 %1388  ;;  %v878_v56 = vpop.permute.xlu1 %877 }
 0x27d   : > { %v1413_v1 = vmul.f32 %v2888_v30, %v1389_v28  ;;  %v926_v52 = vmul.f32 %v2867_v44, %v878_v56 }
 0x27e   : > { %1452 = vst [vmem:[%s2621_s30 + $0xf0] sm:$0xff] %v1439_v41  ;;  %2067 = vset.pattern.permute.xlu1 %v3230_v33 }
 0x27f   : > { %v1426_v54 = vadd.f32 %v1413_v1, %v1262_v51  ;;  %1122 = vperm.xlu1 %2067, %v2776_v32  }
 0x281   : > { %v1478_v19 = vadd.f32 %v1426_v54, %v2695_v8  ;;  %v809_v36 = vpop.permute.xlu0 %808  ;;  %v947_v5 = vpop.permute.xlu1 %946 }
 0x282   : > { %v995_v33 = vmul.f32 %v2847_v6, %v947_v5  ;;  %v859_v39 = vmul.f32 %v2853_v13, %v809_v36 }
 0x283   : > { %1491 = vst [vmem:[%s2621_s30 + $0x100] sm:$0xff] %v1478_v19  ;;  %2068 = vset.pattern.permute.xlu1 %v3231_v0  ;;  %v857_v0 = vmul.f32 %v2853_v13, %v799_v17 }
 0x284   : > { %1204 = vperm.xlu1 %2068, %v2776_v32  }
 0x285   : > { %v1008_v45 = vadd.f32 %v995_v33, %v857_v0 }
 0x286   : > { %v886_v11 = vpop.permute.xlu0 %885  ;;  %v1029_v40 = vpop.permute.xlu1 %1028 }
 0x287   : > { %v1077_v59 = vmul.f32 %v2870_v22, %v1029_v40  ;;  %v928_v49 = vmul.f32 %v2867_v44, %v886_v11 }
 0x288   : > { %2069 = vset.pattern.permute.xlu1 %v3232_v57 }
 0x289   : > { %1286 = vperm.xlu1 %2069, %v2776_v32   ;;  %v1090_v61 = vadd.f32 %v1077_v59, %v926_v52 }
 0x28b   : > { %v955_v58 = vpop.permute.xlu0 %954  ;;  %v1111_v46 = vpop.permute.xlu1 %1110 }
 0x28c   : > { %v1159_v10 = vmul.f32 %v2859_v29, %v1111_v46 }
 0x28d   : > { %2070 = vset.pattern.permute.xlu1 %v3225_v63  ;;  %v997_v63 = vmul.f32 %v2847_v6, %v955_v58 }
 0x28e   : > { %1368 = vperm.xlu1 %2070, %v2776_v32   ;;  %v1172_v32 = vadd.f32 %v1159_v10, %v1008_v45 }
 0x290   : > { %v1037_v8 = vpop.permute.xlu0 %1036  ;;  %v1193_v50 = vpop.permute.xlu1 %1192 }
 0x291   : > { %v1241_v2 = vmul.f32 %v2880_v47, %v1193_v50  ;;  %v1079_v62 = vmul.f32 %v2870_v22, %v1037_v8 }
 0x292   : > { %1392 = vperm.xlu1 %2070, %v2746_v24   ;;  %v1010_v24 = vadd.f32 %v997_v63, %v859_v39 }
 0x293   : > { %v1254_v34 = vadd.f32 %v1241_v2, %v1090_v61 }
 0x295   : > { %v1119_v57 = vpop.permute.xlu0 %1118  ;;  %v1275_v53 = vpop.permute.xlu1 %1274 }
 0x296   : > { %v1323_v43 = vmul.f32 %v2877_v42, %v1275_v53  ;;  %v1161_v4 = vmul.f32 %v2859_v29, %v1119_v57 }
 0x298   : > { %v1336_v25 = vadd.f32 %v1323_v43, %v1172_v32  ;;  %v1174_v3 = vadd.f32 %v1161_v4, %v1010_v24 }
 0x29a   : > { %v1201_v38 = vpop.permute.xlu0 %1200  ;;  %v1431_v18 = vadd.f32 %v1336_v25, %v2638_v9  ;;  %v1357_v15 = vpop.permute.xlu1 %1356  ;;  %v1092_v9 = vadd.f32 %v1079_v62, %v928_v49 }
 0x29b   : > { %v1405_v55 = vmul.f32 %v2888_v30, %v1357_v15  ;;  %v1243_v41 = vmul.f32 %v2880_v47, %v1201_v38 }
 0x29c   : > { %1444 = vst [vmem:[%s2621_s30 + $0x30] sm:$0xff] %v1431_v18 }
 0x29d   : > { %v1418_v12 = vadd.f32 %v1405_v55, %v1254_v34  ;;  %v1256_v56 = vadd.f32 %v1243_v41, %v1092_v9 }
 0x29f   : > { %v1283_v17 = vpop.permute.xlu0 %1282  ;;  %v1470_v48 = vadd.f32 %v1418_v12, %v2635_v7  ;;  %v804_v26 = vpop.permute.xlu1 %803 }
 0x2a0   : > { %v1325_v60 = vmul.f32 %v2877_v42, %v1283_v17  ;;  %v858_v0 = vmul.f32 %v2853_v13, %v804_v26 }
 0x2a1   : > { %1483 = vst [vmem:[%s2621_s30 + $0x40] sm:$0xff] %v1470_v48 }
 0x2a2   : > { %v1338_v28 = vadd.f32 %v1325_v60, %v1174_v3 }
 0x2a4   : > { %v1433_v51 = vadd.f32 %v1338_v28, %v2654_v23  ;;  %v1365_v1 = vpop.permute.xlu0 %1364  ;;  %v882_v54 = vpop.permute.xlu1 %881 }
 0x2a5   : > { %v1407_v19 = vmul.f32 %v2888_v30, %v1365_v1  ;;  %v927_v43 = vmul.f32 %v2867_v44, %v882_v54 }
 0x2a6   : > { %1446 = vst [vmem:[%s2621_s30 + $0x60] sm:$0xff] %v1433_v51 }
 0x2a7   : > { %v1420_v36 = vadd.f32 %v1407_v19, %v1256_v56 }
 0x2a9   : > { %v1472_v7 = vadd.f32 %v1420_v36, %v2651_v21  ;;  %v849_v5 = vpop.permute.xlu0 %848  ;;  %v951_v11 = vpop.permute.xlu1 %950 }
 0x2aa   : > { %v996_v23 = vmul.f32 %v2847_v6, %v951_v11  ;;  %v867_v59 = vmul.f32 %v2853_v13, %v849_v5 }
 0x2ab   : > { %1485 = vst [vmem:[%s2621_s30 + $0x70] sm:$0xff] %v1472_v7 }
 0x2ac   : > { %v1009_v45 = vadd.f32 %v996_v23, %v858_v0 }
 0x2ae   : > { %v3063_v40 = vpop.permute.xlu0 %917  ;;  %v1033_v58 = vpop.permute.xlu1 %1032 }
 0x2af   : > { %v1078_v21 = vmul.f32 %v2870_v22, %v1033_v58 }
 0x2b1   : > { %v1091_v25 = vadd.f32 %v1078_v21, %v927_v43 }
 0x2b3   : > { %v987_v46 = vpop.permute.xlu0 %986  ;;  %v1115_v8 = vpop.permute.xlu1 %1114 }
 0x2b4   : > { %v1160_v10 = vmul.f32 %v2859_v29, %v1115_v8  ;;  %v1005_v39 = vmul.f32 %v2847_v6, %v987_v46 }
 0x2b6   : > { %v1173_v53 = vadd.f32 %v1160_v10, %v1009_v45  ;;  %v1018_v61 = vadd.f32 %v1005_v39, %v867_v59 }
 0x2b8   : > { %v3065_v33 = vpop.permute.xlu0 %1068  ;;  %v1197_v50 = vpop.permute.xlu1 %1196 }
 0x2b9   : > { %v1242_v52 = vmul.f32 %v2880_v47, %v1197_v50  ;;  %v1087_v43 = vmul.f32 %v2870_v22, %v3065_v33 }
 0x2bb   : > { %v1255_v15 = vadd.f32 %v1242_v52, %v1091_v25 }
 0x2bd   : > { %v1151_v57 = vpop.permute.xlu0 %1150  ;;  %v1279_v63 = vpop.permute.xlu1 %1278 }
 0x2be   : > { %v1324_v32 = vmul.f32 %v2877_v42, %v1279_v63  ;;  %v1169_v24 = vmul.f32 %v2859_v29, %v1151_v57 }
 0x2c0   : > { %v1337_v2 = vadd.f32 %v1324_v32, %v1173_v53  ;;  %v1182_v55 = vadd.f32 %v1169_v24, %v1018_v61  ;;  %v936_v32 = vmul.f32 %v2867_v44, %v3063_v40 }
 0x2c2   : > { %v1233_v4 = vpop.permute.xlu0 %1232  ;;  %v1432_v38 = vadd.f32 %v1337_v2, %v2646_v16  ;;  %v1361_v18 = vpop.permute.xlu1 %1360 }
 0x2c3   : > { %v1406_v34 = vmul.f32 %v2888_v30, %v1361_v18 }
 0x2c4   : > { %1445 = vst [vmem:[%s2621_s30 + $0x48] sm:$0xff] %v1432_v38  ;;  %v1251_v38 = vmul.f32 %v2880_v47, %v1233_v4 }
 0x2c5   : > { %v1419_v49 = vadd.f32 %v1406_v34, %v1255_v15 }
 0x2c7   : > { %v1315_v62 = vpop.permute.xlu0 %1314  ;;  %v1471_v3 = vadd.f32 %v1419_v49, %v2643_v14  ;;  %v844_v12 = vpop.permute.xlu1 %843 }
 0x2c8   : > { %v1333_v17 = vmul.f32 %v2877_v42, %v1315_v62 }
 0x2c9   : > { %1484 = vst [vmem:[%s2621_s30 + $0x58] sm:$0xff] %v1471_v3 }
 0x2ca   : > { %v1346_v48 = vadd.f32 %v1333_v17, %v1182_v55 }
 0x2cc   : > { %v1441_v26 = vadd.f32 %v1346_v48, %v2714_v31  ;;  %v819_v60 = vpop.permute.xlu0 %818  ;;  %v3084_v16 = vpop.permute.xlu1 %913  ;;  %v866_v31 = vmul.f32 %v2853_v13, %v844_v12 }
 0x2cd   : > { %v861_v19 = vmul.f32 %v2853_v13, %v819_v60 }
 0x2ce   : > { %1454 = vst [vmem:[%s2621_s30 + $0x120] sm:$0xff] %v1441_v26 }
 0x2d1   : > { %v894_v9 = vpop.permute.xlu0 %893  ;;  %v983_v41 = vpop.permute.xlu1 %982 }
 0x2d2   : > { %v1004_v14 = vmul.f32 %v2847_v6, %v983_v41  ;;  %v930_v10 = vmul.f32 %v2867_v44, %v894_v9 }
 0x2d4   : > { %v1017_v11 = vadd.f32 %v1004_v14, %v866_v31  ;;  %v935_v31 = vmul.f32 %v2867_v44, %v3084_v16 }
 0x2d6   : > { %v963_v28 = vpop.permute.xlu0 %962  ;;  %v3087_v51 = vpop.permute.xlu1 %1064 }
 0x2d7   : > { %v999_v36 = vmul.f32 %v2847_v6, %v963_v28 }
 0x2d9   : > { %v1012_v58 = vadd.f32 %v999_v36, %v861_v19 }
 0x2db   : > { %v1045_v1 = vpop.permute.xlu0 %1044  ;;  %v1147_v56 = vpop.permute.xlu1 %1146 }
 0x2dc   : > { %v1168_v5 = vmul.f32 %v2859_v29, %v1147_v56  ;;  %v1081_v45 = vmul.f32 %v2870_v22, %v1045_v1 }
 0x2de   : > { %v1181_v50 = vadd.f32 %v1168_v5, %v1017_v11  ;;  %v1094_v52 = vadd.f32 %v1081_v45, %v930_v10 }
 0x2e0   : > { %v1127_v54 = vpop.permute.xlu0 %1126  ;;  %v1229_v7 = vpop.permute.xlu1 %1228 }
 0x2e1   : > { %v1163_v46 = vmul.f32 %v2859_v29, %v1127_v54 }
 0x2e3   : > { %v1176_v57 = vadd.f32 %v1163_v46, %v1012_v58 }
 0x2e5   : > { %v1209_v8 = vpop.permute.xlu0 %1208  ;;  %v1311_v23 = vpop.permute.xlu1 %1310 }
 0x2e6   : > { %v1332_v0 = vmul.f32 %v2877_v42, %v1311_v23  ;;  %v1245_v2 = vmul.f32 %v2880_v47, %v1209_v8  ;;  %v3234_v8 = vld [vmem:[#allocation11_spill] sm:$0xff] }
 0x2e8   : > { %v1345_v21 = vadd.f32 %v1332_v0, %v1181_v50  ;;  %v1258_v18 = vadd.f32 %v1245_v2, %v1094_v52 }
 0x2ea   : > { %v1291_v59 = vpop.permute.xlu0 %1290  ;;  %v1440_v39 = vadd.f32 %v1345_v21, %v2706_v20  ;;  %v814_v63 = vpop.permute.xlu1 %813  ;;  %v1100_v20 = vadd.f32 %v1087_v43, %v936_v32 }
 0x2eb   : > { %v1327_v53 = vmul.f32 %v2877_v42, %v1291_v59  ;;  %v860_v60 = vmul.f32 %v2853_v13, %v814_v63 }
 0x2ec   : > { %1453 = vst [vmem:[%s2621_s30 + $0x108] sm:$0xff] %v1440_v39  ;;  %v1264_v55 = vadd.f32 %v1251_v38, %v1100_v20 }
 0x2ed   : > { %v1340_v25 = vadd.f32 %v1327_v53, %v1176_v57 }
 0x2ef   : > { %v1435_v61 = vadd.f32 %v1340_v25, %v2670_v37  ;;  %v1373_v24 = vpop.permute.xlu0 %1372  ;;  %v890_v15 = vpop.permute.xlu1 %889 }
 0x2f0   : > { %v1409_v40 = vmul.f32 %v2888_v30, %v1373_v24 }
 0x2f1   : > { %1448 = vst [vmem:[%s2621_s30 + $0x90] sm:$0xff] %v1435_v61 }
 0x2f2   : > { %v1422_v34 = vadd.f32 %v1409_v40, %v1258_v18 }
 0x2f3   : > { %v1397_v33 = vpop.permute.xlu0 %1396 }
 0x2f4   : > { %v1474_v49 = vadd.f32 %v1422_v34, %v2667_v35  ;;  %v1415_v62 = vmul.f32 %v2888_v30, %v1397_v33  ;;  %v959_v3 = vpop.permute.xlu1 %958 }
 0x2f5   : > { %v998_v48 = vmul.f32 %v2847_v6, %v959_v3  ;;  %v1086_v6 = vmul.f32 %v2870_v22, %v3087_v51 }
 0x2f6   : > { %1487 = vst [vmem:[%s2621_s30 + $0xa0] sm:$0xff] %v1474_v49  ;;  %v1428_v37 = vadd.f32 %v1415_v62, %v1264_v55 }
 0x2f7   : > { %v1011_v41 = vadd.f32 %v998_v48, %v860_v60  ;;  %v1099_v58 = vadd.f32 %v1086_v6, %v935_v31 }
 0x2f8   : > { %v1480_v12 = vadd.f32 %v1428_v37, %v2711_v27  ;;  %v929_v27 = vmul.f32 %v2867_v44, %v890_v15 }
 0x2f9   : > { %v1041_v17 = vpop.permute.xlu1 %1040 }
 0x2fa   : > { %1493 = vst [vmem:[%s2621_s30 + $0x130] sm:$0xff] %v1480_v12  ;;  %v1080_v35 = vmul.f32 %v2870_v22, %v1041_v17 }
 0x2fc   : > { %v1093_v13 = vadd.f32 %v1080_v35, %v929_v27 }
 0x2fe   : > { %v1123_v4 = vpop.permute.xlu1 %1122 }
 0x2ff   : > { %v1162_v9 = vmul.f32 %v2859_v29, %v1123_v4  ;;  %v3233_v29 = vld [vmem:[#allocation12_spill] sm:$0xff] }
 0x301   : > { %v1175_v1 = vadd.f32 %v1162_v9, %v1011_v41 }
 0x303   : > { %v1205_v26 = vpop.permute.xlu1 %1204 }
 0x304   : > { %v1244_v54 = vmul.f32 %v2880_v47, %v1205_v26 }
 0x306   : > { %v1257_v5 = vadd.f32 %v1244_v54, %v1093_v13 }
 0x308   : > { %v1287_v28 = vpop.permute.xlu1 %1286 }
 0x309   : > { %v1326_v56 = vmul.f32 %v2877_v42, %v1287_v28  ;;  %v1250_v42 = vmul.f32 %v2880_v47, %v1229_v7  ;;  %v3235_v47 = vld [vmem:[#allocation13_spill] sm:$0xff] }
 0x30b   : > { %v1339_v14 = vadd.f32 %v1326_v56, %v1175_v1  ;;  %v1263_v51 = vadd.f32 %v1250_v42, %v1099_v58 }
 0x30d   : > { %v1434_v19 = vadd.f32 %v1339_v14, %v3233_v29  ;;  %v1369_v36 = vpop.permute.xlu1 %1368 }
 0x30e   : > { %v1408_v11 = vmul.f32 %v2888_v30, %v1369_v36 }
 0x30f   : > { %1447 = vst [vmem:[%s2621_s30 + $0x78] sm:$0xff] %v1434_v19 }
 0x310   : > { %v1421_v46 = vadd.f32 %v1408_v11, %v1257_v5 }
 0x311   : > { %v1393_v22 = vpop.permute.xlu1 %1392 }
 0x312   : > { %v1473_v23 = vadd.f32 %v1421_v46, %v3234_v8  ;;  %v1414_v50 = vmul.f32 %v2888_v30, %v1393_v22 }
 0x314   : > { %1486 = vst [vmem:[%s2621_s30 + $0x88] sm:$0xff] %v1473_v23  ;;  %v1427_v44 = vadd.f32 %v1414_v50, %v1263_v51 }
 0x316   : > { %v1479_v16 = vadd.f32 %v1427_v44, %v3235_v47 }
 0x318   : > { %1492 = vst [vmem:[%s2621_s30 + $0x118] sm:$0xff] %v1479_v16 }
 0x319   : > { %2150 = shalt.err (!%p2147_p7)
}
 0x31a   : > { %s2151_s30 = scalar_lea.hbm %s3138_s11, 4992  ;;  %s2155_s8 = scalar_lea.hbm %s3191_s6, 19968 }
 0x31b   : > { %p2152_p9 = scmp.ne.s32.totalorder %s3138_s11, %s2151_s30  ;;  %p2156_p5 = scmp.lt.u32.totalorder %s3138_s11, %s3191_s6 }
 0x31c   : > { %p2157_p10 = scmp.lt.u32.totalorder %s2155_s8, %s2151_s30  ;;  %p2159_p1 = scmp.lt.u32.totalorder %s2151_s30, %s3138_s11 }
 0x31d   : > { %p2153_p11 = pnand %p2152_p9, %p2347_p12 }
 0x31e   : > { %p2158_p2 = por %p2157_p10, %p2156_p5 }
 0x31f   : > { %p2154_p0 = pneg %p2153_p11 }
 0x320   : > { %p2160_p4 = por %p2159_p1, %p2158_p2 }
 0x322   : > { %p2161_p6 = pnand %p2160_p4, %p2154_p0 }
 0x324   : > { %2164 = shalt.err (!%p2161_p6)
}
 0x325   : > { %s2227_s19 = smov 384   ;;  %s2228_s7 = smov 24  }
 0x326   : > { %1909 = dma.vmem_to_hbm [thread:$0]  (%p2347_p12), %s3140_s29, 4992, %s3138_s11, %s1495_s25, %s2227_s19, %s2227_s19, %s2228_s7  }
 0x327 PF: > { %p1927_p8 = scmp.ge.s32.totalorder %s2207_s24, 2  ;;  %s1524_s20 = sand.u32 1, %s2195_s21  }
 0x328   : > { %p3236_p13 = scmp.ne.s32.totalorder %s3212_s28, 0  ;;  %s1525_s15 = scalar_lea.sflag [#allocation4], %s1524_s20 }
 0x32a   : > { %p1920_p3 = pnand %p1927_p8, %p3236_p13 }
 0x32c   : > { %2190 = dma.done.wait (!%p1920_p3), %s1525_s15, 4992  }
 0x32d   : > { %2192 = vsyncadd (!%p1920_p3), %s1525_s15, 4294962304  ;;  %p20_p7 = scmp.ge.s32.totalorder %s2317_s9, 6   ;;  %s3237_s21 = smov %s2199_s22 }
 0x32e   : > { %s3238_s22 = smov %s2203_s23  ;;  %s3239_s23 = smov %s2343_s13 }
 0x32f   : > { %s3240_s24 = smov %s2317_s9  ;;  %22 = sbr.rel (!%p20_p7) target bundleno = 6 (0x6), region = 93 }
 0x336   :  { %1530 = vsyncpa [#allocation3], 1 }
 0x337   :  { %1532 = vsyncpa [#allocation3 + $0x1], 1 }
 0x338   :  { %1533 = vsyncpa [#allocation6], 1 }
 0x339   :  { %1534 = vsyncpa [#allocation4], 1 }
 0x33a   :  { %1536 = vsyncpa [#allocation4 + $0x1], 1 }

</bundles_post_ra>
